<compile_context>
chip_gen: v7x
topology: tpu7x:2x2x1
jax: 0.10.0
libtpu: 0.0.40
codegen_flags: <defaults>
</compile_context>

<pallas_src>
import jax
import jax.numpy as jnp
from jax.experimental import pallas as pl
from jax.experimental.pallas import tpu as pltpu

D_IN = 28 * 28      # 784 (ragged: 6*128 + 16 lanes; handled natively by Mosaic)
H = 512
LANE = 128


def _round_up(x, m):
    return (x + m - 1) // m * m


def _pick_block_b(batch):
    """~8 grid steps (>=4 per TC on v7x), tile in [128, 1024] rows, 128-aligned."""
    bp = _round_up(batch, LANE)
    tb = max(1, bp // 8)
    return max(LANE, min(1024, _round_up(tb, LANE)))


def vae_fwd_kernel(x_ref, eps_ref,
                   w_enc_ref, b_enc_ref,
                   w_head_ref, b_head_ref,
                   w_d1_ref, b_d1_ref,
                   w_d2_ref, b_d2_ref,
                   out_ref):
    """One batch tile of the VAE forward pass. bf16 matmul inputs, f32 MXU accumulation."""
    x = x_ref[...]                                # (TB, 784) bf16 (cast guard below)
    if x.dtype != jnp.bfloat16:
        x = x.astype(jnp.bfloat16)
    eps = eps_ref[...]                            # (TB, ZP) f32

    # Encoder: Linear(784, 512) + ReLU (ragged K=784 contraction on the MXU).
    h = jnp.dot(x, w_enc_ref[...], preferred_element_type=jnp.float32) + b_enc_ref[...]
    h = jnp.maximum(h, 0.0).astype(jnp.bfloat16)  # (TB, 512)

    # Fused mu / log_var heads: single (512, 2*ZP) matmul, split at a 128-lane boundary.
    head = jnp.dot(h, w_head_ref[...], preferred_element_type=jnp.float32) + b_head_ref[...]
    zp = w_head_ref.shape[1] // 2
    mu = head[:, :zp]                             # (TB, ZP): lanes >= n_z are 0
    log_var = head[:, zp:]                        # (TB, ZP): lanes >= n_z are 0

    # Reparameterization: z = mu + exp(log_var / 2) * eps
    std = jnp.exp(log_var * 0.5)                  # padded lanes: exp(0) = 1
    z = (mu + std * eps).astype(jnp.bfloat16)     # padded lanes: 0 + 1*0 = 0 (inert: w_d1 rows are 0)

    # Decoder: Linear(n_z, 512) + ReLU + Linear(512, 784) + Sigmoid
    d = jnp.dot(z, w_d1_ref[...], preferred_element_type=jnp.float32) + b_d1_ref[...]
    d = jnp.maximum(d, 0.0).astype(jnp.bfloat16)
    logits = jnp.dot(d, w_d2_ref[...], preferred_element_type=jnp.float32) + b_d2_ref[...]
    out_ref[...] = jax.nn.sigmoid(logits).astype(out_ref.dtype)   # (TB, 784) bf16


def vae_forward(x, eps, params, *, block_b=None):
    """x: (B, 784) bf16 (preferred) or f32, eps: (B, n_z) f32. Returns (B, 784) bf16."""
    B, d_in = x.shape
    assert d_in == D_IN
    n_z = eps.shape[1]
    zp = params["w_d1"].shape[0]                  # n_z padded to a multiple of 128
    assert zp == _round_up(n_z, LANE)

    if block_b is None:
        block_b = _pick_block_b(B)
    bp = _round_up(B, block_b)

    # Callers should supply bf16 x (no extra pass); cast here only as a fallback.
    if x.dtype != jnp.bfloat16:
        x = x.astype(jnp.bfloat16)
    # Pad the latent noise to a 128-lane boundary (tiny: n_z f32 lanes per row).
    if zp != n_z:
        eps = jnp.pad(eps, ((0, 0), (0, zp - n_z)))
    # Pad batch rows only when B is not a multiple of block_b (no-op in the common case).
    if bp != B:
        x = jnp.pad(x, ((0, bp - B), (0, 0)))
        eps = jnp.pad(eps, ((0, bp - B), (0, 0)))

    grid = (bp // block_b,)

    def resident(arr):  # weight/bias: one full block, constant index -> DMA'd once, VMEM-resident
        return pl.BlockSpec(arr.shape, lambda i: (0, 0))

    in_specs = [
        pl.BlockSpec((block_b, D_IN), lambda i: (i, 0)),    # x: batch-tiled, pipelined, bf16
        pl.BlockSpec((block_b, zp), lambda i: (i, 0)),      # eps: batch-tiled, pipelined
        resident(params["w_enc"]), resident(params["b_enc"]),
        resident(params["w_head"]), resident(params["b_head"]),
        resident(params["w_d1"]), resident(params["b_d1"]),
        resident(params["w_d2"]), resident(params["b_d2"]),
    ]
    out_specs = pl.BlockSpec((block_b, D_IN), lambda i: (i, 0))

    out = pl.pallas_call(
        vae_fwd_kernel,
        out_shape=jax.ShapeDtypeStruct((bp, D_IN), jnp.bfloat16),
        grid=grid,
        in_specs=in_specs,
        out_specs=out_specs,
        compiler_params=pltpu.CompilerParams(
            dimension_semantics=("parallel",),
            # Covers TB up to 1024 (x/eps/out double-buffers + f32 intermediates
            # + ~2 MiB resident bf16 weights) on v5e's 16 MiB default scoped
            # limit while staying below v7x's 64 MiB physical VMEM.
            vmem_limit_bytes=48 * 1024 * 1024,
        ),
    )(x, eps,
      params["w_enc"], params["b_enc"],
      params["w_head"], params["b_head"],
      params["w_d1"], params["b_d1"],
      params["w_d2"], params["b_d2"])

    return out if bp == B else out[:B]


def init_params(key, n_z):
    """nn.Linear-style init; weights stored transposed (in, out), latent padded, heads fused, bf16."""
    zp = _round_up(n_z, LANE)

    def linear(k, fan_in, fan_out):
        kw, kb = jax.random.split(k)
        bound = 1.0 / jnp.sqrt(fan_in)
        w = jax.random.uniform(kw, (fan_in, fan_out), jnp.float32, -bound, bound)
        b = jax.random.uniform(kb, (1, fan_out), jnp.float32, -bound, bound)
        return w, b

    keys = jax.random.split(key, 5)
    w_enc, b_enc = linear(keys[0], D_IN, H)
    w_mu, b_mu = linear(keys[1], H, n_z)
    w_var, b_var = linear(keys[2], H, n_z)
    w_d1, b_d1 = linear(keys[3], n_z, H)
    w_d2, b_d2 = linear(keys[4], H, D_IN)

    # Fused mu || log_var head, each padded to zp lanes (zero weight & bias in pads).
    w_head = jnp.zeros((H, 2 * zp), jnp.float32)
    w_head = w_head.at[:, :n_z].set(w_mu).at[:, zp:zp + n_z].set(w_var)
    b_head = jnp.zeros((1, 2 * zp), jnp.float32)
    b_head = b_head.at[:, :n_z].set(b_mu).at[:, zp:zp + n_z].set(b_var)

    # Decoder input n_z -> zp (zero rows: padded z lanes contribute nothing).
    w_d1_p = jnp.zeros((zp, H), jnp.float32).at[:n_z, :].set(w_d1)

    bf16 = jnp.bfloat16
    return dict(
        w_enc=w_enc.astype(bf16), b_enc=b_enc,          # (784, 512), (1, 512)
        w_head=w_head.astype(bf16), b_head=b_head,      # (512, 2*zp), (1, 2*zp)
        w_d1=w_d1_p.astype(bf16), b_d1=b_d1,            # (zp, 512), (1, 512)
        w_d2=w_d2.astype(bf16), b_d2=b_d2,              # (512, 784), (1, 784)
    )


def vae_reference(x, eps, params):
    """Pure-JAX mirror of the kernel math (same bf16 weights, f32 accumulation)."""
    bf16 = jnp.bfloat16
    n_z = eps.shape[1]
    zp = params["w_d1"].shape[0]
    x = x.astype(bf16)
    eps_p = jnp.pad(eps, ((0, 0), (0, zp - n_z)))
    h = jnp.maximum(jnp.dot(x, params["w_enc"], preferred_element_type=jnp.float32)
                    + params["b_enc"], 0.0).astype(bf16)
    head = jnp.dot(h, params["w_head"], preferred_element_type=jnp.float32) + params["b_head"]
    mu, log_var = head[:, :zp], head[:, zp:]
    z = (mu + jnp.exp(0.5 * log_var) * eps_p).astype(bf16)
    d = jnp.maximum(jnp.dot(z, params["w_d1"], preferred_element_type=jnp.float32)
                    + params["b_d1"], 0.0).astype(bf16)
    logits = jnp.dot(d, params["w_d2"], preferred_element_type=jnp.float32) + params["b_d2"]
    return jax.nn.sigmoid(logits).astype(bf16)


if __name__ == "__main__":
    key = jax.random.PRNGKey(0)
    k_params, k_x, k_eps = jax.random.split(key, 3)

    B = 256          # -> block_b=128, grid=(2,): batch-tiled, parallel across TCs on v7x
    n_z = 32

    params = init_params(k_params, n_z)
    # Flattened MNIST-like input, supplied in bf16 (preferred kernel input dtype).
    x = jax.random.uniform(k_x, (B, D_IN), jnp.float32).astype(jnp.bfloat16)
    eps = jax.random.normal(k_eps, (B, n_z), jnp.float32)    # reparameterization noise

    out = vae_forward(x, eps, params)
    out = jax.block_until_ready(out)

    ref = jax.block_until_ready(vae_reference(x, eps, params))

    assert out.shape == (B, D_IN) and out.dtype == jnp.bfloat16
    out_f = out.astype(jnp.float32)
    ref_f = ref.astype(jnp.float32)
    assert bool(jnp.all((out_f >= 0.0) & (out_f <= 1.0)))
    assert bool(jnp.max(jnp.abs(out_f - ref_f)) < 2e-2)
    print("KERNEL_OK")
</pallas_src>

<mosaic_0001>
module attributes {stable_mosaic.version = 11 : i64} {
  func.func @vae_fwd_kernel(%arg0: i32, %arg1: memref<128x784xbf16, #tpu.memory_space<vmem>>, %arg2: memref<128x128xf32, #tpu.memory_space<vmem>>, %arg3: memref<784x512xbf16, #tpu.memory_space<vmem>>, %arg4: memref<1x512xf32, #tpu.memory_space<vmem>>, %arg5: memref<512x256xbf16, #tpu.memory_space<vmem>>, %arg6: memref<1x256xf32, #tpu.memory_space<vmem>>, %arg7: memref<128x512xbf16, #tpu.memory_space<vmem>>, %arg8: memref<1x512xf32, #tpu.memory_space<vmem>>, %arg9: memref<512x784xbf16, #tpu.memory_space<vmem>>, %arg10: memref<1x784xf32, #tpu.memory_space<vmem>>, %arg11: memref<128x784xbf16, #tpu.memory_space<vmem>>) attributes {dimension_semantics = [#tpu.dimension_semantics<parallel>], iteration_bounds = array<i64: 2>, scalar_prefetch = 0 : i64, scratch_operands = 0 : i64, tpu.core_type = #tpu.core_type<tc>, window_params = [{transform_indices = @transform_0, window_bounds = array<i64: 128, 784>}, {transform_indices = @transform_1, window_bounds = array<i64: 128, 128>}, {pipeline_mode = #tpu.pipeline_mode<synchronous>, transform_indices = @transform_2, window_bounds = array<i64: 784, 512>}, {pipeline_mode = #tpu.pipeline_mode<synchronous>, transform_indices = @transform_3, window_bounds = array<i64: 1, 512>}, {pipeline_mode = #tpu.pipeline_mode<synchronous>, transform_indices = @transform_4, window_bounds = array<i64: 512, 256>}, {pipeline_mode = #tpu.pipeline_mode<synchronous>, transform_indices = @transform_5, window_bounds = array<i64: 1, 256>}, {pipeline_mode = #tpu.pipeline_mode<synchronous>, transform_indices = @transform_6, window_bounds = array<i64: 128, 512>}, {pipeline_mode = #tpu.pipeline_mode<synchronous>, transform_indices = @transform_7, window_bounds = array<i64: 1, 512>}, {pipeline_mode = #tpu.pipeline_mode<synchronous>, transform_indices = @transform_8, window_bounds = array<i64: 512, 784>}, {pipeline_mode = #tpu.pipeline_mode<synchronous>, transform_indices = @transform_9, window_bounds = array<i64: 1, 784>}, {transform_indices = @transform_10, window_bounds = array<i64: 128, 784>}]} {
    %c0 = arith.constant 0 : index
    %c0_0 = arith.constant 0 : index
    %0 = vector.load %arg1[%c0, %c0_0] : memref<128x784xbf16, #tpu.memory_space<vmem>>, vector<128x784xbf16>
    %c0_1 = arith.constant 0 : index
    %c0_2 = arith.constant 0 : index
    %1 = vector.load %arg2[%c0_1, %c0_2] : memref<128x128xf32, #tpu.memory_space<vmem>>, vector<128x128xf32>
    %c0_3 = arith.constant 0 : index
    %c0_4 = arith.constant 0 : index
    %2 = vector.load %arg3[%c0_3, %c0_4] : memref<784x512xbf16, #tpu.memory_space<vmem>>, vector<784x512xbf16>
    %cst = arith.constant dense<0.000000e+00> : vector<128x512xf32>
    %3 = tpu.matmul %0, %2, %cst {dimension_numbers = #tpu.dot_dimension_numbers<[1], [0], [0], [1], [0, 0, 1, 1], [], []>} : vector<128x784xbf16>, vector<784x512xbf16>, vector<128x512xf32> -> vector<128x512xf32>
    %c0_5 = arith.constant 0 : index
    %c0_6 = arith.constant 0 : index
    %4 = vector.load %arg4[%c0_5, %c0_6] : memref<1x512xf32, #tpu.memory_space<vmem>>, vector<1x512xf32>
    %5 = vector.broadcast %4 : vector<1x512xf32> to vector<128x512xf32>
    %6 = arith.addf %3, %5 : vector<128x512xf32>
    %cst_7 = arith.constant 0.000000e+00 : f32
    %7 = vector.broadcast %cst_7 : f32 to vector<128x512xf32>
    %8 = arith.maximumf %6, %7 : vector<128x512xf32>
    %9 = arith.truncf %8 : vector<128x512xf32> to vector<128x512xbf16>
    %c0_8 = arith.constant 0 : index
    %c0_9 = arith.constant 0 : index
    %10 = vector.load %arg5[%c0_8, %c0_9] : memref<512x256xbf16, #tpu.memory_space<vmem>>, vector<512x256xbf16>
    %cst_10 = arith.constant dense<0.000000e+00> : vector<128x256xf32>
    %11 = tpu.matmul %9, %10, %cst_10 {dimension_numbers = #tpu.dot_dimension_numbers<[1], [0], [0], [1], [0, 0, 1, 1], [], []>} : vector<128x512xbf16>, vector<512x256xbf16>, vector<128x256xf32> -> vector<128x256xf32>
    %c0_11 = arith.constant 0 : index
    %c0_12 = arith.constant 0 : index
    %12 = vector.load %arg6[%c0_11, %c0_12] : memref<1x256xf32, #tpu.memory_space<vmem>>, vector<1x256xf32>
    %13 = vector.broadcast %12 : vector<1x256xf32> to vector<128x256xf32>
    %14 = arith.addf %11, %13 : vector<128x256xf32>
    %15 = vector.extract_strided_slice %14 {offsets = [0, 0], sizes = [128, 128], strides = [1, 1]} : vector<128x256xf32> to vector<128x128xf32>
    %16 = vector.extract_strided_slice %14 {offsets = [0, 128], sizes = [128, 128], strides = [1, 1]} : vector<128x256xf32> to vector<128x128xf32>
    %cst_13 = arith.constant 5.000000e-01 : f32
    %17 = vector.broadcast %cst_13 : f32 to vector<128x128xf32>
    %18 = arith.mulf %16, %17 : vector<128x128xf32>
    %19 = math.exp %18 : vector<128x128xf32>
    %20 = arith.mulf %19, %1 : vector<128x128xf32>
    %21 = arith.addf %15, %20 : vector<128x128xf32>
    %22 = arith.truncf %21 : vector<128x128xf32> to vector<128x128xbf16>
    %c0_14 = arith.constant 0 : index
    %c0_15 = arith.constant 0 : index
    %23 = vector.load %arg7[%c0_14, %c0_15] : memref<128x512xbf16, #tpu.memory_space<vmem>>, vector<128x512xbf16>
    %cst_16 = arith.constant dense<0.000000e+00> : vector<128x512xf32>
    %24 = tpu.matmul %22, %23, %cst_16 {dimension_numbers = #tpu.dot_dimension_numbers<[1], [0], [0], [1], [0, 0, 1, 1], [], []>} : vector<128x128xbf16>, vector<128x512xbf16>, vector<128x512xf32> -> vector<128x512xf32>
    %c0_17 = arith.constant 0 : index
    %c0_18 = arith.constant 0 : index
    %25 = vector.load %arg8[%c0_17, %c0_18] : memref<1x512xf32, #tpu.memory_space<vmem>>, vector<1x512xf32>
    %26 = vector.broadcast %25 : vector<1x512xf32> to vector<128x512xf32>
    %27 = arith.addf %24, %26 : vector<128x512xf32>
    %cst_19 = arith.constant 0.000000e+00 : f32
    %28 = vector.broadcast %cst_19 : f32 to vector<128x512xf32>
    %29 = arith.maximumf %27, %28 : vector<128x512xf32>
    %30 = arith.truncf %29 : vector<128x512xf32> to vector<128x512xbf16>
    %c0_20 = arith.constant 0 : index
    %c0_21 = arith.constant 0 : index
    %31 = vector.load %arg9[%c0_20, %c0_21] : memref<512x784xbf16, #tpu.memory_space<vmem>>, vector<512x784xbf16>
    %cst_22 = arith.constant dense<0.000000e+00> : vector<128x784xf32>
    %32 = tpu.matmul %30, %31, %cst_22 {dimension_numbers = #tpu.dot_dimension_numbers<[1], [0], [0], [1], [0, 0, 1, 1], [], []>} : vector<128x512xbf16>, vector<512x784xbf16>, vector<128x784xf32> -> vector<128x784xf32>
    %c0_23 = arith.constant 0 : index
    %c0_24 = arith.constant 0 : index
    %33 = vector.load %arg10[%c0_23, %c0_24] : memref<1x784xf32, #tpu.memory_space<vmem>>, vector<1x784xf32>
    %34 = vector.broadcast %33 : vector<1x784xf32> to vector<128x784xf32>
    %35 = arith.addf %32, %34 : vector<128x784xf32>
    %36 = arith.negf %35 : vector<128x784xf32>
    %37 = math.exp %36 : vector<128x784xf32>
    %cst_25 = arith.constant 1.000000e+00 : f32
    %38 = vector.broadcast %cst_25 : f32 to vector<128x784xf32>
    %39 = arith.addf %38, %37 : vector<128x784xf32>
    %40 = arith.divf %38, %39 : vector<128x784xf32>
    %41 = arith.truncf %40 : vector<128x784xf32> to vector<128x784xbf16>
    %c0_26 = arith.constant 0 : index
    %c0_27 = arith.constant 0 : index
    %42 = vector.load %arg11[%c0_26, %c0_27] : memref<128x784xbf16, #tpu.memory_space<vmem>>, vector<128x784xbf16>
    tpu.vector_store %arg11[%c0_26, %c0_27], %41 {strides = array<i32>} : memref<128x784xbf16, #tpu.memory_space<vmem>>, vector<128x784xbf16>,
    return
  }
  func.func @transform_0(%arg0: i32) -> (i32, i32) {
    %c0_i32 = arith.constant 0 : i32
    %c0_i32_0 = arith.constant 0 : i32
    return %arg0, %c0_i32 : i32, i32
  }
  func.func @transform_1(%arg0: i32) -> (i32, i32) {
    %c0_i32 = arith.constant 0 : i32
    %c0_i32_0 = arith.constant 0 : i32
    return %arg0, %c0_i32 : i32, i32
  }
  func.func @transform_2(%arg0: i32) -> (i32, i32) {
    %c0_i32 = arith.constant 0 : i32
    %c0_i32_0 = arith.constant 0 : i32
    %c0_i32_1 = arith.constant 0 : i32
    return %c0_i32, %c0_i32_0 : i32, i32
  }
  func.func @transform_3(%arg0: i32) -> (i32, i32) {
    %c0_i32 = arith.constant 0 : i32
    %c0_i32_0 = arith.constant 0 : i32
    %c0_i32_1 = arith.constant 0 : i32
    return %c0_i32, %c0_i32_0 : i32, i32
  }
  func.func @transform_4(%arg0: i32) -> (i32, i32) {
    %c0_i32 = arith.constant 0 : i32
    %c0_i32_0 = arith.constant 0 : i32
    %c0_i32_1 = arith.constant 0 : i32
    return %c0_i32, %c0_i32_0 : i32, i32
  }
  func.func @transform_5(%arg0: i32) -> (i32, i32) {
    %c0_i32 = arith.constant 0 : i32
    %c0_i32_0 = arith.constant 0 : i32
    %c0_i32_1 = arith.constant 0 : i32
    return %c0_i32, %c0_i32_0 : i32, i32
  }
  func.func @transform_6(%arg0: i32) -> (i32, i32) {
    %c0_i32 = arith.constant 0 : i32
    %c0_i32_0 = arith.constant 0 : i32
    %c0_i32_1 = arith.constant 0 : i32
    return %c0_i32, %c0_i32_0 : i32, i32
  }
  func.func @transform_7(%arg0: i32) -> (i32, i32) {
    %c0_i32 = arith.constant 0 : i32
    %c0_i32_0 = arith.constant 0 : i32
    %c0_i32_1 = arith.constant 0 : i32
    return %c0_i32, %c0_i32_0 : i32, i32
  }
  func.func @transform_8(%arg0: i32) -> (i32, i32) {
    %c0_i32 = arith.constant 0 : i32
    %c0_i32_0 = arith.constant 0 : i32
    %c0_i32_1 = arith.constant 0 : i32
    return %c0_i32, %c0_i32_0 : i32, i32
  }
  func.func @transform_9(%arg0: i32) -> (i32, i32) {
    %c0_i32 = arith.constant 0 : i32
    %c0_i32_0 = arith.constant 0 : i32
    %c0_i32_1 = arith.constant 0 : i32
    return %c0_i32, %c0_i32_0 : i32, i32
  }
  func.func @transform_10(%arg0: i32) -> (i32, i32) {
    %c0_i32 = arith.constant 0 : i32
    %c0_i32_0 = arith.constant 0 : i32
    return %arg0, %c0_i32 : i32, i32
  }
}

</mosaic_0001>

<bundles_post_ra>
// kernel: tpu_custom_call.1
= control target key start
LH: loop header
LB: loop body
LE: loop exit
PB: predicated region body
PF: predicated region fallthrough
CT: control target
= control target key end

     0   :  { %s10570_s13 = smov 0   ;;  %s13271_s0 = inlined_call_operand.vmem [shape: bf16[256,784], index: 0, kind: input, shape index: {}]   ;;  %s13272_s1 = inlined_call_operand.vmem [shape: f32[256,128], index: 1, kind: input, shape index: {}]   ;;  %s13273_s2 = inlined_call_operand.vmem [shape: bf16[784,512], index: 2, kind: input, shape index: {}]   ;;  %s13274_s3 = inlined_call_operand.vmem [shape: f32[1,512], index: 3, kind: input, shape index: {}]   ;;  %s13275_s4 = inlined_call_operand.vmem [shape: bf16[512,256], index: 4, kind: input, shape index: {}]   ;;  %s13276_s5 = inlined_call_operand.vmem [shape: f32[1,256], index: 5, kind: input, shape index: {}]   ;;  %s13277_s6 = inlined_call_operand.vmem [shape: bf16[128,512], index: 6, kind: input, shape index: {}]   ;;  %s13278_s7 = inlined_call_operand.vmem [shape: f32[1,512], index: 7, kind: input, shape index: {}]   ;;  %s13279_s8 = inlined_call_operand.vmem [shape: bf16[512,784], index: 8, kind: input, shape index: {}]   ;;  %s13280_s9 = inlined_call_operand.vmem [shape: f32[1,784], index: 9, kind: input, shape index: {}]   ;;  %s13281_s10 = inlined_call_operand.vmem [shape: bf16[256,784], index: 10, kind: output, shape index: {}]  }
   0x1 LB: > { %s7696_s14 = sadd.s32 4294967295, %s10512_s13   ;;  %p7700_p0 = scmp.ge.s32.totalorder %s10512_s13, 1  ;;  %s10512_s13 = sphi %s10570_s13, %s20_s13  }
   0x2   : > { %p325_p1 = scmp.lt.s32.totalorder %s10512_s13, 3 }
   0x4   : > { %p326_p2 = pnand %p7700_p0, %p325_p1 }
   0x5   : > { %v9187_v0 = vld [vmem:[%s13273_s2 + $0x4] ss:$16 sps:$4 sm:$0xff] (!%p326_p2)   ;;  %v9189_v1 = vld [vmem:[%s13273_s2 + $0xc] ss:$16 sps:$4 sm:$0xff] (!%p326_p2)   ;;  %v9191_v2 = vld [vmem:[%s13273_s2] ss:$16 sps:$4 sm:$0xff] (!%p326_p2)  }
   0x6   : > { %329 = sbr.rel (%p326_p2) target bundleno = 1534 (0x5fe), region = 60  ;;  %1974 = vmatprep.subr.bf16.mxu0 (!%p326_p2), %v9187_v0  ;;  %v9192_v3 = vld [vmem:[%s13273_s2 + $0x8] ss:$16 sps:$4 sm:$0xff] (!%p326_p2)   ;;  %2426 = vmatprep.subr.bf16.mxu1 (!%p326_p2), %v9189_v1  ;;  %v9193_v4 = vld [vmem:[%s13273_s2 + $0x24] ss:$16 sps:$4 sm:$0xff] (!%p326_p2)   ;;  %s7701_s21 = sshll.u32 (!%p326_p2), %s7696_s14, 4 }
   0x7   : > { %1975 = vmatpush1.bf16.msra.mxu0 (!%p326_p2), %v9191_v2  ;;  %2427 = vmatpush1.bf16.msra.mxu1 (!%p326_p2), %v9192_v3  ;;  %v9195_v5 = vld [vmem:[%s13273_s2 + $0x2c] ss:$16 sps:$4 sm:$0xff] (!%p326_p2)   ;;  %v9197_v6 = vld [vmem:[%s13273_s2 + $0x20] ss:$16 sps:$4 sm:$0xff] (!%p326_p2)   ;;  %v9198_v7 = vld [vmem:[%s13273_s2 + $0x28] ss:$16 sps:$4 sm:$0xff] (!%p326_p2)  }
   0x8   : > { %1976 = vmatprep.subr.bf16.mxu0 (!%p326_p2), %v9193_v4  ;;  %2428 = vmatprep.subr.bf16.mxu1 (!%p326_p2), %v9195_v5  ;;  %v9199_v8 = vld [vmem:[%s13273_s2 + $0x44] ss:$16 sps:$4 sm:$0xff] (!%p326_p2)   ;;  %v9201_v9 = vld [vmem:[%s13273_s2 + $0x4c] ss:$16 sps:$4 sm:$0xff] (!%p326_p2)   ;;  %v9203_v10 = vld [vmem:[%s13273_s2 + $0x40] ss:$16 sps:$4 sm:$0xff] (!%p326_p2)  }
   0x9   : > { %v9204_v11 = vld [vmem:[%s13273_s2 + $0x48] ss:$16 sps:$4 sm:$0xff] (!%p326_p2)   ;;  %v9205_v12 = vld [vmem:[%s13273_s2 + $0x64] ss:$16 sps:$4 sm:$0xff] (!%p326_p2)   ;;  %v9207_v13 = vld [vmem:[%s13273_s2 + $0x6c] ss:$16 sps:$4 sm:$0xff] (!%p326_p2)  }
   0xa   : > { %v9209_v14 = vld [vmem:[%s13273_s2 + $0x60] ss:$16 sps:$4 sm:$0xff] (!%p326_p2)   ;;  %v9210_v15 = vld [vmem:[%s13273_s2 + $0x68] ss:$16 sps:$4 sm:$0xff] (!%p326_p2)   ;;  %v9211_v16 = vld [vmem:[%s13273_s2 + $0x84] ss:$16 sps:$4 sm:$0xff] (!%p326_p2)  }
   0xb   : > { %1977 = vmatpush1.bf16.msra.mxu0 (!%p326_p2), %v9197_v6  ;;  %2429 = vmatpush1.bf16.msra.mxu1 (!%p326_p2), %v9198_v7  ;;  %v9213_v17 = vld [vmem:[%s13273_s2 + $0x8c] ss:$16 sps:$4 sm:$0xff] (!%p326_p2)   ;;  %v9215_v18 = vld [vmem:[%s13273_s2 + $0x80] ss:$16 sps:$4 sm:$0xff] (!%p326_p2)   ;;  %v9216_v19 = vld [vmem:[%s13273_s2 + $0x88] ss:$16 sps:$4 sm:$0xff] (!%p326_p2)  }
   0xc   : > { %1978 = vmatprep.subr.bf16.mxu0 (!%p326_p2), %v9199_v8  ;;  %2430 = vmatprep.subr.bf16.mxu1 (!%p326_p2), %v9201_v9  ;;  %v9217_v20 = vld [vmem:[%s13273_s2 + $0xa4] ss:$16 sps:$4 sm:$0xff] (!%p326_p2)   ;;  %v9219_v21 = vld [vmem:[%s13273_s2 + $0xac] ss:$16 sps:$4 sm:$0xff] (!%p326_p2)   ;;  %v9221_v22 = vld [vmem:[%s13273_s2 + $0xa0] ss:$16 sps:$4 sm:$0xff] (!%p326_p2)  }
   0xd   : > { %v9222_v23 = vld [vmem:[%s13273_s2 + $0xa8] ss:$16 sps:$4 sm:$0xff]   ;;  %v9223_v24 = vld [vmem:[%s13273_s2 + $0xc4] ss:$16 sps:$4 sm:$0xff]   ;;  %v9225_v25 = vld [vmem:[%s13273_s2 + $0xcc] ss:$16 sps:$4 sm:$0xff]  }
   0xe   : > { %v9227_v26 = vld [vmem:[%s13273_s2 + $0xc0] ss:$16 sps:$4 sm:$0xff]   ;;  %v9228_v27 = vld [vmem:[%s13273_s2 + $0xc8] ss:$16 sps:$4 sm:$0xff]   ;;  %v9229_v28 = vld [vmem:[%s13273_s2 + $0xe4] ss:$16 sps:$4 sm:$0xff]  }
   0xf   : > { %1979 = vmatpush1.bf16.msra.mxu0 %v9203_v10  ;;  %2431 = vmatpush1.bf16.msra.mxu1 %v9204_v11  ;;  %v9231_v29 = vld [vmem:[%s13273_s2 + $0xec] ss:$16 sps:$4 sm:$0xff]   ;;  %v9233_v30 = vld [vmem:[%s13273_s2 + $0xe0] ss:$16 sps:$4 sm:$0xff]   ;;  %v9234_v31 = vld [vmem:[%s13273_s2 + $0xe8] ss:$16 sps:$4 sm:$0xff]  }
  0x10   : > { %1980 = vmatprep.subr.bf16.mxu0 %v9205_v12  ;;  %2432 = vmatprep.subr.bf16.mxu1 %v9207_v13  ;;  %v9235_v32 = vld [vmem:[%s13273_s2 + $0x104] ss:$16 sps:$4 sm:$0xff]   ;;  %p371_p3 = scmp.lt.s32.totalorder %s7701_s21, 31  ;;  %v9237_v33 = vld [vmem:[%s13273_s2 + $0x10c] ss:$16 sps:$4 sm:$0xff]   ;;  %vm1949_vm0 = vcmask 130048  }
  0x11   : > { %v9239_v34 = vld [vmem:[%s13273_s2 + $0x100] ss:$16 sps:$4 sm:$0xff]   ;;  %v9240_v35 = vld [vmem:[%s13273_s2 + $0x108] ss:$16 sps:$4 sm:$0xff]   ;;  %v9241_v36 = vld [vmem:[%s13273_s2 + $0x124] ss:$16 sps:$4 sm:$0xff]  }
  0x12   : > { %s13283_s21 = smov (!%p371_p3, %s7701_s21), 31  ;;  %v9243_v37 = vld [vmem:[%s13273_s2 + $0x12c] ss:$16 sps:$4 sm:$0xff]   ;;  %v9245_v38 = vld [vmem:[%s13273_s2 + $0x120] ss:$16 sps:$4 sm:$0xff]   ;;  %vm7564_vm1 = vcmask 125952  }
  0x13   : > { %1981 = vmatpush1.bf16.msra.mxu0 %v9209_v14  ;;  %2433 = vmatpush1.bf16.msra.mxu1 %v9210_v15  ;;  %v9246_v39 = vld [vmem:[%s13273_s2 + $0x128] ss:$16 sps:$4 sm:$0xff]   ;;  %v9247_v40 = vld [vmem:[%s13273_s2 + $0x144] ss:$16 sps:$4 sm:$0xff]   ;;  %s9177_s26 = smul.u32 28, %s13283_s21  ;;  %s7704_s15 = sshll.u32 %s13283_s21, 3 }
  0x14   : > { %1982 = vmatprep.subr.bf16.mxu0 %v9211_v16  ;;  %2434 = vmatprep.subr.bf16.mxu1 %v9213_v17  ;;  %v9249_v41 = vld [vmem:[%s13273_s2 + $0x14c] ss:$16 sps:$4 sm:$0xff]   ;;  %v9251_v42 = vld [vmem:[%s13273_s2 + $0x140] ss:$16 sps:$4 sm:$0xff]   ;;  %v9252_v43 = vld [vmem:[%s13273_s2 + $0x148] ss:$16 sps:$4 sm:$0xff]   ;;  %s11658_s19 = scalar_lea.vmem %s13272_s1, %s7704_s15 }
  0x15   : > { %v9253_v44 = vld [vmem:[%s13273_s2 + $0x164] ss:$16 sps:$4 sm:$0xff]   ;;  %s10723_s18 = scalar_lea.vmem %s13271_s0, %s9177_s26  ;;  %v9255_v45 = vld [vmem:[%s13273_s2 + $0x16c] ss:$16 sps:$4 sm:$0xff]   ;;  %v9257_v46 = vld [vmem:[%s13273_s2 + $0x160] ss:$16 sps:$4 sm:$0xff]   ;;  %s12835_s12 = scalar_lea.vmem %s13281_s10, %s9177_s26 }
  0x16   : > { %v9258_v47 = vld [vmem:[%s13273_s2 + $0x168] ss:$16 sps:$4 sm:$0xff]   ;;  %v9285_v48 = vld [vmem:[%s10723_s18 + $0x4] ss:$28 sps:$4 sm:$0xff]   ;;  %v9261_v50 = vld [vmem:[%s13273_s2 + $0x18c] ss:$16 sps:$4 sm:$0xff]  }
  0x17   : > { %1983 = vmatpush1.bf16.msra.mxu0 %v9215_v18  ;;  %2435 = vmatpush1.bf16.msra.mxu1 %v9216_v19  ;;  %v9259_v49 = vld [vmem:[%s13273_s2 + $0x184] ss:$16 sps:$4 sm:$0xff]   ;;  %v9263_v51 = vld [vmem:[%s13273_s2 + $0x180] ss:$16 sps:$4 sm:$0xff]   ;;  %v9264_v52 = vld [vmem:[%s13273_s2 + $0x188] ss:$16 sps:$4 sm:$0xff]  }
  0x18   : > { %1984 = vmatprep.subr.bf16.mxu0 %v9217_v20  ;;  %2436 = vmatprep.subr.bf16.mxu1 %v9219_v21  ;;  %v9265_v53 = vld [vmem:[%s13273_s2 + $0x1a4] ss:$16 sps:$4 sm:$0xff]   ;;  %v9267_v54 = vld [vmem:[%s13273_s2 + $0x1ac] ss:$16 sps:$4 sm:$0xff]   ;;  %v9269_v55 = vld [vmem:[%s13273_s2 + $0x1a0] ss:$16 sps:$4 sm:$0xff]  }
  0x19   : > { %2006 = vmatprep.mubr.bf16.mxu0 %v9285_v48  ;;  %2458 = vmatprep.mubr.bf16.mxu1 %v9285_v48  ;;  %v9270_v56 = vld [vmem:[%s13273_s2 + $0x1a8] ss:$16 sps:$4 sm:$0xff]   ;;  %v9271_v57 = vld [vmem:[%s13273_s2 + $0x1c4] ss:$16 sps:$4 sm:$0xff]   ;;  %v9273_v58 = vld [vmem:[%s13273_s2 + $0x1cc] ss:$16 sps:$4 sm:$0xff]  }
  0x1a   : > { %v9275_v59 = vld [vmem:[%s13273_s2 + $0x1c0] ss:$16 sps:$4 sm:$0xff]   ;;  %v9276_v60 = vld [vmem:[%s13273_s2 + $0x1c8] ss:$16 sps:$4 sm:$0xff]   ;;  %v9277_v61 = vld [vmem:[%s13273_s2 + $0x1e4] ss:$16 sps:$4 sm:$0xff]  }
  0x1b   : > { %1985 = vmatpush1.bf16.msra.mxu0 %v9221_v22  ;;  %2437 = vmatpush1.bf16.msra.mxu1 %v9222_v23  ;;  %v9279_v62 = vld [vmem:[%s13273_s2 + $0x1ec] ss:$16 sps:$4 sm:$0xff]   ;;  %v9281_v63 = vld [vmem:[%s13273_s2 + $0x1e0] ss:$16 sps:$4 sm:$0xff]   ;;  %v9282_v0 = vld [vmem:[%s13273_s2 + $0x1e8] ss:$16 sps:$4 sm:$0xff]  }
  0x1c   : > { %1986 = vmatprep.subr.bf16.mxu0 %v9223_v24  ;;  %2438 = vmatprep.subr.bf16.mxu1 %v9225_v25  ;;  %v9288_v1 = vld [vmem:[%s13273_s2 + $0x204] ss:$16 sps:$4 sm:$0xff]   ;;  %v9291_v2 = vld [vmem:[%s13273_s2 + $0x20c] ss:$16 sps:$4 sm:$0xff]   ;;  %v9286_v4 = vld [vmem:[%s13273_s2 + $0x200] ss:$16 sps:$4 sm:$0xff]  }
  0x1d   : > { %v9283_v3 = vld [vmem:[%s10723_s18] ss:$28 sps:$4 sm:$0xff]   ;;  %v9289_v5 = vld [vmem:[%s13273_s2 + $0x208] ss:$16 sps:$4 sm:$0xff]   ;;  %v9294_v6 = vld [vmem:[%s13273_s2 + $0x224] ss:$16 sps:$4 sm:$0xff]  }
  0x1e   : > { %v9297_v7 = vld [vmem:[%s13273_s2 + $0x22c] ss:$16 sps:$4 sm:$0xff]   ;;  %v9292_v9 = vld [vmem:[%s13273_s2 + $0x220] ss:$16 sps:$4 sm:$0xff]   ;;  %v9295_v10 = vld [vmem:[%s13273_s2 + $0x228] ss:$16 sps:$4 sm:$0xff]  }
  0x1f   : > { %1987 = vmatpush1.bf16.msra.mxu0 %v9227_v26  ;;  %2439 = vmatpush1.bf16.msra.mxu1 %v9228_v27  ;;  %v9298_v8 = vld [vmem:[%s10723_s18 + $0x3c] ss:$28 sps:$4 sm:$0xff]   ;;  %v9303_v11 = vld [vmem:[%s13273_s2 + $0x244] ss:$16 sps:$4 sm:$0xff]   ;;  %v9301_v14 = vld [vmem:[%s13273_s2 + $0x240] ss:$16 sps:$4 sm:$0xff]  }
  0x20   : > { %1988 = vmatprep.subr.bf16.mxu0 %v9229_v28  ;;  %2440 = vmatprep.subr.bf16.mxu1 %v9231_v29  ;;  %v9306_v12 = vld [vmem:[%s13273_s2 + $0x24c] ss:$16 sps:$4 sm:$0xff]   ;;  %v9300_v13 = vld [vmem:[%s10723_s18 + $0x38] ss:$28 sps:$4 sm:$0xff]   ;;  %v9307_v19 = vld [vmem:[%s13273_s2 + $0x260] ss:$16 sps:$4 sm:$0xff]  }
  0x21   : > { %v9304_v15 = vld [vmem:[%s13273_s2 + $0x248] ss:$16 sps:$4 sm:$0xff]   ;;  %v9309_v16 = vld [vmem:[%s13273_s2 + $0x264] ss:$16 sps:$4 sm:$0xff]   ;;  %v9312_v17 = vld [vmem:[%s13273_s2 + $0x26c] ss:$16 sps:$4 sm:$0xff]  }
  0x22   : > { %v9313_v18 = vld [vmem:[%s10723_s18 + $0x74] ss:$28 sps:$4 sm:$0xff]   ;;  %v9310_v20 = vld [vmem:[%s13273_s2 + $0x268] ss:$16 sps:$4 sm:$0xff]   ;;  %v9321_v22 = vld [vmem:[%s13273_s2 + $0x28c] ss:$16 sps:$4 sm:$0xff]  }
  0x23   : > { %1989 = vmatpush1.bf16.msra.mxu0 %v9233_v30  ;;  %2441 = vmatpush1.bf16.msra.mxu1 %v9234_v31  ;;  %v9318_v21 = vld [vmem:[%s13273_s2 + $0x284] ss:$16 sps:$4 sm:$0xff]   ;;  %v9315_v23 = vld [vmem:[%s10723_s18 + $0x70] ss:$28 sps:$4 sm:$0xff]   ;;  %v9319_v25 = vld [vmem:[%s13273_s2 + $0x288] ss:$16 sps:$4 sm:$0xff]  }
  0x24   : > { %1990 = vmatprep.subr.bf16.mxu0 %v9235_v32  ;;  %2442 = vmatprep.subr.bf16.mxu1 %v9237_v33  ;;  %v9316_v24 = vld [vmem:[%s13273_s2 + $0x280] ss:$16 sps:$4 sm:$0xff]   ;;  %v9324_v26 = vld [vmem:[%s13273_s2 + $0x2a4] ss:$16 sps:$4 sm:$0xff]   ;;  %v9327_v27 = vld [vmem:[%s13273_s2 + $0x2ac] ss:$16 sps:$4 sm:$0xff]  }
  0x25   : > { %v9328_v28 = vld [vmem:[%s10723_s18 + $0xac] ss:$28 sps:$4 sm:$0xff]   ;;  %v9322_v29 = vld [vmem:[%s13273_s2 + $0x2a0] ss:$16 sps:$4 sm:$0xff]   ;;  %v9333_v31 = vld [vmem:[%s13273_s2 + $0x2c4] ss:$16 sps:$4 sm:$0xff]  }
  0x26   : > { %v9325_v30 = vld [vmem:[%s13273_s2 + $0x2a8] ss:$16 sps:$4 sm:$0xff]   ;;  %v9336_v32 = vld [vmem:[%s13273_s2 + $0x2cc] ss:$16 sps:$4 sm:$0xff]  }
  0x27   : > { %1991 = vmatpush1.bf16.msra.mxu0 %v9239_v34  ;;  %2443 = vmatpush1.bf16.msra.mxu1 %v9240_v35  ;;  %v9330_v33 = vld [vmem:[%s10723_s18 + $0xa8] ss:$28 sps:$4 sm:$0xff]   ;;  %v9331_v34 = vld [vmem:[%s13273_s2 + $0x2c0] ss:$16 sps:$4 sm:$0xff]   ;;  %v9358_v48 = vld [vmem:[%s10723_s18 + $0x11c] ss:$28 sps:$4 sm:$0xff]  }
  0x28   : > { %1992 = vmatprep.subr.bf16.mxu0 %v9241_v36  ;;  %2444 = vmatprep.subr.bf16.mxu1 %v9243_v37  ;;  %v9334_v35 = vld [vmem:[%s13273_s2 + $0x2c8] ss:$16 sps:$4 sm:$0xff]   ;;  %v9339_v36 = vld [vmem:[%s13273_s2 + $0x2e4] ss:$16 sps:$4 sm:$0xff]   ;;  %v9342_v37 = vld [vmem:[%s13273_s2 + $0x2ec] ss:$16 sps:$4 sm:$0xff]  }
  0x2b   : > { %1993 = vmatpush1.bf16.msra.mxu0 %v9245_v38  ;;  %2445 = vmatpush1.bf16.msra.mxu1 %v9246_v39  ;;  %v9343_v38 = vld [vmem:[%s10723_s18 + $0xe4] ss:$28 sps:$4 sm:$0xff]  }
  0x2c   : > { %1994 = vmatprep.subr.bf16.mxu0 %v9247_v40  ;;  %2446 = vmatprep.subr.bf16.mxu1 %v9249_v41  ;;  %v9337_v39 = vld [vmem:[%s13273_s2 + $0x2e0] ss:$16 sps:$4 sm:$0xff]   ;;  %v9340_v40 = vld [vmem:[%s13273_s2 + $0x2e8] ss:$16 sps:$4 sm:$0xff]   ;;  %v9348_v41 = vld [vmem:[%s13273_s2 + $0x304] ss:$16 sps:$4 sm:$0xff]  }
  0x2f   : > { %1995 = vmatpush1.bf16.msra.mxu0 %v9251_v42  ;;  %2447 = vmatpush1.bf16.msra.mxu1 %v9252_v43  ;;  %v9351_v42 = vld [vmem:[%s13273_s2 + $0x30c] ss:$16 sps:$4 sm:$0xff]  }
  0x30   : > { %1996 = vmatprep.subr.bf16.mxu0 %v9253_v44  ;;  %2448 = vmatprep.subr.bf16.mxu1 %v9255_v45  ;;  %v9345_v43 = vld [vmem:[%s10723_s18 + $0xe0] ss:$28 sps:$4 sm:$0xff]   ;;  %v9349_v45 = vld [vmem:[%s13273_s2 + $0x308] ss:$16 sps:$4 sm:$0xff]  }
  0x31   : > { %v9346_v44 = vld [vmem:[%s13273_s2 + $0x300] ss:$16 sps:$4 sm:$0xff]  }
  0x33   : > { %1997 = vmatpush1.bf16.msra.mxu0 %v9257_v46  ;;  %2449 = vmatpush1.bf16.msra.mxu1 %v9258_v47  ;;  %v9354_v46 = vld [vmem:[%s13273_s2 + $0x324] ss:$16 sps:$4 sm:$0xff]   ;;  %v9357_v47 = vld [vmem:[%s13273_s2 + $0x32c] ss:$16 sps:$4 sm:$0xff]  }
  0x34   : > { %1998 = vmatprep.subr.bf16.mxu0 %v9259_v49  ;;  %2450 = vmatprep.subr.bf16.mxu1 %v9261_v50  ;;  %v9352_v49 = vld [vmem:[%s13273_s2 + $0x320] ss:$16 sps:$4 sm:$0xff]   ;;  %v9355_v50 = vld [vmem:[%s13273_s2 + $0x328] ss:$16 sps:$4 sm:$0xff]  }
  0x37   : > { %1999 = vmatpush1.bf16.msra.mxu0 %v9263_v51  ;;  %2451 = vmatpush1.bf16.msra.mxu1 %v9264_v52  ;;  %v9363_v51 = vld [vmem:[%s13273_s2 + $0x344] ss:$16 sps:$4 sm:$0xff]   ;;  %v9366_v52 = vld [vmem:[%s13273_s2 + $0x34c] ss:$16 sps:$4 sm:$0xff]  }
  0x38   : > { %2000 = vmatprep.subr.bf16.mxu0 %v9265_v53  ;;  %2452 = vmatprep.subr.bf16.mxu1 %v9267_v54  ;;  %v9360_v53 = vld [vmem:[%s10723_s18 + $0x118] ss:$28 sps:$4 sm:$0xff]   ;;  %v9361_v54 = vld [vmem:[%s13273_s2 + $0x340] ss:$16 sps:$4 sm:$0xff]  }
  0x3b   : > { %2001 = vmatpush1.bf16.msra.mxu0 %v9269_v55  ;;  %2453 = vmatpush1.bf16.msra.mxu1 %v9270_v56  ;;  %v9364_v55 = vld [vmem:[%s13273_s2 + $0x348] ss:$16 sps:$4 sm:$0xff]   ;;  %v9369_v56 = vld [vmem:[%s13273_s2 + $0x364] ss:$16 sps:$4 sm:$0xff]  }
  0x3c   : > { %2002 = vmatprep.subr.bf16.mxu0 %v9271_v57  ;;  %2454 = vmatprep.subr.bf16.mxu1 %v9273_v58  ;;  %v9372_v57 = vld [vmem:[%s13273_s2 + $0x36c] ss:$16 sps:$4 sm:$0xff]   ;;  %v9373_v58 = vld [vmem:[%s10723_s18 + $0x154] ss:$28 sps:$4 sm:$0xff]  }
  0x3f   : > { %2003 = vmatpush1.bf16.msra.mxu0 %v9275_v59  ;;  %2455 = vmatpush1.bf16.msra.mxu1 %v9276_v60  ;;  %v9367_v59 = vld [vmem:[%s13273_s2 + $0x360] ss:$16 sps:$4 sm:$0xff]   ;;  %v9370_v60 = vld [vmem:[%s13273_s2 + $0x368] ss:$16 sps:$4 sm:$0xff]  }
  0x40   : > { %2004 = vmatprep.subr.bf16.mxu0 %v9277_v61  ;;  %2456 = vmatprep.subr.bf16.mxu1 %v9279_v62  ;;  %v9378_v61 = vld [vmem:[%s13273_s2 + $0x384] ss:$16 sps:$4 sm:$0xff]   ;;  %v9381_v62 = vld [vmem:[%s13273_s2 + $0x38c] ss:$16 sps:$4 sm:$0xff]  }
  0x43   : > { %2005 = vmatpush1.bf16.msra.mxu0 %v9281_v63  ;;  %2457 = vmatpush1.bf16.msra.mxu1 %v9282_v0  ;;  %v9375_v63 = vld [vmem:[%s10723_s18 + $0x150] ss:$28 sps:$4 sm:$0xff]  }
  0x44   : > { %2087 = vmatprep.subr.bf16.mxu0 %v9288_v1  ;;  %2539 = vmatprep.subr.bf16.mxu1 %v9291_v2  ;;  %v9376_v0 = vld [vmem:[%s13273_s2 + $0x380] ss:$16 sps:$4 sm:$0xff]   ;;  %v9379_v1 = vld [vmem:[%s13273_s2 + $0x388] ss:$16 sps:$4 sm:$0xff]   ;;  %v9384_v2 = vld [vmem:[%s13273_s2 + $0x3a4] ss:$16 sps:$4 sm:$0xff]  }
  0x46   : > { %2007 = vmatmul.mubr.bf16.vlgmr.msra.gmra.mrb[0].mxu0 %v9283_v3  ;;  %2459 = vmatmul.mubr.bf16.vlgmr.msra.gmra.mrb[0].mxu1 %v9283_v3  ;;  %v9387_v3 = vld [vmem:[%s13273_s2 + $0x3ac] ss:$16 sps:$4 sm:$0xff]  }
  0x47   : > { %2088 = vmatpush1.bf16.msra.mxu0 %v9286_v4  ;;  %2540 = vmatpush1.bf16.msra.mxu1 %v9289_v5  ;;  %v9388_v4 = vld [vmem:[%s10723_s18 + $0x18c] ss:$28 sps:$4 sm:$0xff]   ;;  %v9382_v5 = vld [vmem:[%s13273_s2 + $0x3a0] ss:$16 sps:$4 sm:$0xff]  }
  0x48   : > { %2089 = vmatprep.subr.bf16.mxu0 %v9294_v6  ;;  %2541 = vmatprep.subr.bf16.mxu1 %v9297_v7  ;;  %v9385_v6 = vld [vmem:[%s13273_s2 + $0x3a8] ss:$16 sps:$4 sm:$0xff]   ;;  %v9393_v7 = vld [vmem:[%s13273_s2 + $0x3c4] ss:$16 sps:$4 sm:$0xff]  }
  0x49   : > { %2016 = vmatprep.mubr.bf16.mxu0 %v9298_v8  ;;  %2468 = vmatprep.mubr.bf16.mxu1 %v9298_v8  ;;  %v9396_v8 = vld [vmem:[%s13273_s2 + $0x3cc] ss:$16 sps:$4 sm:$0xff]  }
  0x4b   : > { %2090 = vmatpush1.bf16.msra.mxu0 %v9292_v9  ;;  %2542 = vmatpush1.bf16.msra.mxu1 %v9295_v10  ;;  %v9390_v9 = vld [vmem:[%s10723_s18 + $0x188] ss:$28 sps:$4 sm:$0xff]   ;;  %v9391_v10 = vld [vmem:[%s13273_s2 + $0x3c0] ss:$16 sps:$4 sm:$0xff]  }
  0x4c   : > { %2091 = vmatprep.subr.bf16.mxu0 %v9303_v11  ;;  %2543 = vmatprep.subr.bf16.mxu1 %v9306_v12  ;;  %v9394_v11 = vld [vmem:[%s13273_s2 + $0x3c8] ss:$16 sps:$4 sm:$0xff]   ;;  %v9399_v12 = vld [vmem:[%s13273_s2 + $0x3e4] ss:$16 sps:$4 sm:$0xff]  }
  0x4e   : > { %2017 = vmatmul.mubr.bf16.gmra.mrb[4].mxu0 %v9300_v13  ;;  %2469 = vmatmul.mubr.bf16.gmra.mrb[4].mxu1 %v9300_v13  ;;  %v9402_v13 = vld [vmem:[%s13273_s2 + $0x3ec] ss:$16 sps:$4 sm:$0xff]  }
  0x4f   : > { %2092 = vmatpush1.bf16.msra.mxu0 %v9301_v14  ;;  %2544 = vmatpush1.bf16.msra.mxu1 %v9304_v15  ;;  %v9405_v14 = vld [vmem:[%s10723_s18 + $0xc] ss:$28 sps:$4 sm:$0xff]   ;;  %v9397_v15 = vld [vmem:[%s13273_s2 + $0x3e0] ss:$16 sps:$4 sm:$0xff]  }
  0x50   : > { %2093 = vmatprep.subr.bf16.mxu0 %v9309_v16  ;;  %2545 = vmatprep.subr.bf16.mxu1 %v9312_v17  ;;  %v9400_v16 = vld [vmem:[%s13273_s2 + $0x3e8] ss:$16 sps:$4 sm:$0xff]   ;;  %v9408_v17 = vld [vmem:[%s13273_s2 + $0x404] ss:$16 sps:$4 sm:$0xff]  }
  0x51   : > { %2026 = vmatprep.mubr.bf16.mxu0 %v9313_v18  ;;  %2478 = vmatprep.mubr.bf16.mxu1 %v9313_v18  ;;  %v9411_v18 = vld [vmem:[%s13273_s2 + $0x40c] ss:$16 sps:$4 sm:$0xff]  }
  0x53   : > { %2094 = vmatpush1.bf16.msra.mxu0 %v9307_v19  ;;  %2546 = vmatpush1.bf16.msra.mxu1 %v9310_v20  ;;  %v9403_v19 = vld [vmem:[%s10723_s18 + $0x8] ss:$28 sps:$4 sm:$0xff]   ;;  %v9406_v20 = vld [vmem:[%s13273_s2 + $0x400] ss:$16 sps:$4 sm:$0xff]  }
  0x54   : > { %2095 = vmatprep.subr.bf16.mxu0 %v9318_v21  ;;  %2547 = vmatprep.subr.bf16.mxu1 %v9321_v22  ;;  %v9409_v21 = vld [vmem:[%s13273_s2 + $0x408] ss:$16 sps:$4 sm:$0xff]   ;;  %v9414_v22 = vld [vmem:[%s13273_s2 + $0x424] ss:$16 sps:$4 sm:$0xff]  }
  0x56   : > { %2027 = vmatmul.mubr.bf16.gmra.mrb[8].mxu0 %v9315_v23  ;;  %2479 = vmatmul.mubr.bf16.gmra.mrb[8].mxu1 %v9315_v23  ;;  %v9417_v23 = vld [vmem:[%s13273_s2 + $0x42c] ss:$16 sps:$4 sm:$0xff]  }
  0x57   : > { %2096 = vmatpush1.bf16.msra.mxu0 %v9316_v24  ;;  %2548 = vmatpush1.bf16.msra.mxu1 %v9319_v25  ;;  %v9418_v24 = vld [vmem:[%s10723_s18 + $0x44] ss:$28 sps:$4 sm:$0xff]  }
  0x58   : > { %2097 = vmatprep.subr.bf16.mxu0 %v9324_v26  ;;  %2549 = vmatprep.subr.bf16.mxu1 %v9327_v27  ;;  %v9412_v25 = vld [vmem:[%s13273_s2 + $0x420] ss:$16 sps:$4 sm:$0xff]   ;;  %v9415_v26 = vld [vmem:[%s13273_s2 + $0x428] ss:$16 sps:$4 sm:$0xff]   ;;  %v9423_v27 = vld [vmem:[%s13273_s2 + $0x444] ss:$16 sps:$4 sm:$0xff]  }
  0x59   : > { %2036 = vmatprep.mubr.bf16.mxu0 %v9328_v28  ;;  %2488 = vmatprep.mubr.bf16.mxu1 %v9328_v28  ;;  %v9426_v28 = vld [vmem:[%s13273_s2 + $0x44c] ss:$16 sps:$4 sm:$0xff]  }
  0x5b   : > { %2098 = vmatpush1.bf16.msra.mxu0 %v9322_v29  ;;  %2550 = vmatpush1.bf16.msra.mxu1 %v9325_v30  ;;  %v9420_v29 = vld [vmem:[%s10723_s18 + $0x40] ss:$28 sps:$4 sm:$0xff]  }
  0x5c   : > { %2099 = vmatprep.subr.bf16.mxu0 %v9333_v31  ;;  %2551 = vmatprep.subr.bf16.mxu1 %v9336_v32  ;;  %v9421_v30 = vld [vmem:[%s13273_s2 + $0x440] ss:$16 sps:$4 sm:$0xff]   ;;  %v9424_v31 = vld [vmem:[%s13273_s2 + $0x448] ss:$16 sps:$4 sm:$0xff]   ;;  %v9429_v32 = vld [vmem:[%s13273_s2 + $0x464] ss:$16 sps:$4 sm:$0xff]  }
  0x5e   : > { %2037 = vmatmul.mubr.bf16.gmra.mrb[12].mxu0 %v9330_v33  ;;  %2489 = vmatmul.mubr.bf16.gmra.mrb[12].mxu1 %v9330_v33  ;;  %v9432_v33 = vld [vmem:[%s13273_s2 + $0x46c] ss:$16 sps:$4 sm:$0xff]  }
  0x5f   : > { %2100 = vmatpush1.bf16.msra.mxu0 %v9331_v34  ;;  %2552 = vmatpush1.bf16.msra.mxu1 %v9334_v35  ;;  %v9433_v34 = vld [vmem:[%s10723_s18 + $0x7c] ss:$28 sps:$4 sm:$0xff]   ;;  %v9427_v35 = vld [vmem:[%s13273_s2 + $0x460] ss:$16 sps:$4 sm:$0xff]  }
  0x60   : > { %2101 = vmatprep.subr.bf16.mxu0 %v9339_v36  ;;  %2553 = vmatprep.subr.bf16.mxu1 %v9342_v37  ;;  %v9430_v36 = vld [vmem:[%s13273_s2 + $0x468] ss:$16 sps:$4 sm:$0xff]   ;;  %v9438_v37 = vld [vmem:[%s13273_s2 + $0x484] ss:$16 sps:$4 sm:$0xff]  }
  0x61   : > { %2046 = vmatprep.mubr.bf16.mxu0 %v9343_v38  ;;  %2498 = vmatprep.mubr.bf16.mxu1 %v9343_v38  ;;  %v9441_v38 = vld [vmem:[%s13273_s2 + $0x48c] ss:$16 sps:$4 sm:$0xff]  }
  0x63   : > { %2102 = vmatpush1.bf16.msra.mxu0 %v9337_v39  ;;  %2554 = vmatpush1.bf16.msra.mxu1 %v9340_v40  ;;  %v9435_v39 = vld [vmem:[%s10723_s18 + $0x78] ss:$28 sps:$4 sm:$0xff]   ;;  %v9436_v40 = vld [vmem:[%s13273_s2 + $0x480] ss:$16 sps:$4 sm:$0xff]  }
  0x64   : > { %2103 = vmatprep.subr.bf16.mxu0 %v9348_v41  ;;  %2555 = vmatprep.subr.bf16.mxu1 %v9351_v42  ;;  %v9439_v41 = vld [vmem:[%s13273_s2 + $0x488] ss:$16 sps:$4 sm:$0xff]   ;;  %v9444_v42 = vld [vmem:[%s13273_s2 + $0x4a4] ss:$16 sps:$4 sm:$0xff]  }
  0x66   : > { %2047 = vmatmul.mubr.bf16.gmra.mrb[16].mxu0 %v9345_v43  ;;  %2499 = vmatmul.mubr.bf16.gmra.mrb[16].mxu1 %v9345_v43  ;;  %v9447_v43 = vld [vmem:[%s13273_s2 + $0x4ac] ss:$16 sps:$4 sm:$0xff]  }
  0x67   : > { %2104 = vmatpush1.bf16.msra.mxu0 %v9346_v44  ;;  %2556 = vmatpush1.bf16.msra.mxu1 %v9349_v45  ;;  %v9448_v44 = vld [vmem:[%s10723_s18 + $0xb4] ss:$28 sps:$4 sm:$0xff]  }
  0x68   : > { %2105 = vmatprep.subr.bf16.mxu0 %v9354_v46  ;;  %2557 = vmatprep.subr.bf16.mxu1 %v9357_v47  ;;  %v9442_v45 = vld [vmem:[%s13273_s2 + $0x4a0] ss:$16 sps:$4 sm:$0xff]   ;;  %v9445_v46 = vld [vmem:[%s13273_s2 + $0x4a8] ss:$16 sps:$4 sm:$0xff]   ;;  %v9453_v47 = vld [vmem:[%s13273_s2 + $0x4c4] ss:$16 sps:$4 sm:$0xff]  }
  0x69   : > { %2056 = vmatprep.mubr.bf16.mxu0 %v9358_v48  ;;  %2508 = vmatprep.mubr.bf16.mxu1 %v9358_v48  ;;  %v9456_v48 = vld [vmem:[%s13273_s2 + $0x4cc] ss:$16 sps:$4 sm:$0xff]  }
  0x6b   : > { %2106 = vmatpush1.bf16.msra.mxu0 %v9352_v49  ;;  %2558 = vmatpush1.bf16.msra.mxu1 %v9355_v50  ;;  %v9450_v49 = vld [vmem:[%s10723_s18 + $0xb0] ss:$28 sps:$4 sm:$0xff]  }
  0x6c   : > { %2107 = vmatprep.subr.bf16.mxu0 %v9363_v51  ;;  %2559 = vmatprep.subr.bf16.mxu1 %v9366_v52  ;;  %v9451_v50 = vld [vmem:[%s13273_s2 + $0x4c0] ss:$16 sps:$4 sm:$0xff]   ;;  %v9454_v51 = vld [vmem:[%s13273_s2 + $0x4c8] ss:$16 sps:$4 sm:$0xff]   ;;  %v9459_v52 = vld [vmem:[%s13273_s2 + $0x4e4] ss:$16 sps:$4 sm:$0xff]  }
  0x6e   : > { %2057 = vmatmul.mubr.bf16.gmra.mrb[20].mxu0 %v9360_v53  ;;  %2509 = vmatmul.mubr.bf16.gmra.mrb[20].mxu1 %v9360_v53  ;;  %v9462_v53 = vld [vmem:[%s13273_s2 + $0x4ec] ss:$16 sps:$4 sm:$0xff]  }
  0x6f   : > { %2108 = vmatpush1.bf16.msra.mxu0 %v9361_v54  ;;  %2560 = vmatpush1.bf16.msra.mxu1 %v9364_v55  ;;  %v9463_v54 = vld [vmem:[%s10723_s18 + $0xec] ss:$28 sps:$4 sm:$0xff]   ;;  %v9457_v55 = vld [vmem:[%s13273_s2 + $0x4e0] ss:$16 sps:$4 sm:$0xff]  }
  0x70   : > { %2109 = vmatprep.subr.bf16.mxu0 %v9369_v56  ;;  %2561 = vmatprep.subr.bf16.mxu1 %v9372_v57  ;;  %v9460_v56 = vld [vmem:[%s13273_s2 + $0x4e8] ss:$16 sps:$4 sm:$0xff]   ;;  %v9468_v57 = vld [vmem:[%s13273_s2 + $0x504] ss:$16 sps:$4 sm:$0xff]  }
  0x71   : > { %2066 = vmatprep.mubr.bf16.mxu0 %v9373_v58  ;;  %2518 = vmatprep.mubr.bf16.mxu1 %v9373_v58  ;;  %v9471_v58 = vld [vmem:[%s13273_s2 + $0x50c] ss:$16 sps:$4 sm:$0xff]  }
  0x73   : > { %2110 = vmatpush1.bf16.msra.mxu0 %v9367_v59  ;;  %2562 = vmatpush1.bf16.msra.mxu1 %v9370_v60  ;;  %v9465_v59 = vld [vmem:[%s10723_s18 + $0xe8] ss:$28 sps:$4 sm:$0xff]   ;;  %v9466_v60 = vld [vmem:[%s13273_s2 + $0x500] ss:$16 sps:$4 sm:$0xff]  }
  0x74   : > { %2111 = vmatprep.subr.bf16.mxu0 %v9378_v61  ;;  %2563 = vmatprep.subr.bf16.mxu1 %v9381_v62  ;;  %v9469_v61 = vld [vmem:[%s13273_s2 + $0x508] ss:$16 sps:$4 sm:$0xff]   ;;  %v9474_v62 = vld [vmem:[%s13273_s2 + $0x524] ss:$16 sps:$4 sm:$0xff]  }
  0x76   : > { %2067 = vmatmul.mubr.bf16.gmra.mrb[24].mxu0 %v9375_v63  ;;  %2519 = vmatmul.mubr.bf16.gmra.mrb[24].mxu1 %v9375_v63  ;;  %v9477_v63 = vld [vmem:[%s13273_s2 + $0x52c] ss:$16 sps:$4 sm:$0xff]  }
  0x77   : > { %2112 = vmatpush1.bf16.msra.mxu0 %v9376_v0  ;;  %2564 = vmatpush1.bf16.msra.mxu1 %v9379_v1  ;;  %v9472_v0 = vld [vmem:[%s13273_s2 + $0x520] ss:$16 sps:$4 sm:$0xff]  }
  0x78   : > { %2113 = vmatprep.subr.bf16.mxu0 %v9384_v2  ;;  %2565 = vmatprep.subr.bf16.mxu1 %v9387_v3  ;;  %v9478_v1 = vld [vmem:[%s10723_s18 + $0x124] ss:$28 sps:$4 sm:$0xff]   ;;  %v9475_v2 = vld [vmem:[%s13273_s2 + $0x528] ss:$16 sps:$4 sm:$0xff]  }
  0x79   : > { %2076 = vmatprep.mubr.bf16.mxu0 %v9388_v4  ;;  %2528 = vmatprep.mubr.bf16.mxu1 %v9388_v4  ;;  %v9483_v3 = vld [vmem:[%s13273_s2 + $0x544] ss:$16 sps:$4 sm:$0xff]   ;;  %v9480_v4 = vld [vmem:[%s10723_s18 + $0x120] ss:$28 sps:$4 sm:$0xff]  }
  0x7b   : > { %2114 = vmatpush1.bf16.msra.mxu0 %v9382_v5  ;;  %2566 = vmatpush1.bf16.msra.mxu1 %v9385_v6  ;;  %v9486_v5 = vld [vmem:[%s13273_s2 + $0x54c] ss:$16 sps:$4 sm:$0xff]   ;;  %v9481_v6 = vld [vmem:[%s13273_s2 + $0x540] ss:$16 sps:$4 sm:$0xff]  }
  0x7c   : > { %2115 = vmatprep.subr.bf16.mxu0 %v9393_v7  ;;  %2567 = vmatprep.subr.bf16.mxu1 %v9396_v8  ;;  %v9484_v7 = vld [vmem:[%s13273_s2 + $0x548] ss:$16 sps:$4 sm:$0xff]   ;;  %v9489_v8 = vld [vmem:[%s13273_s2 + $0x564] ss:$16 sps:$4 sm:$0xff]  }
  0x7e   : > { %2077 = vmatmul.mubr.bf16.gmra.mrb[28].mxu0 %v9390_v9  ;;  %2529 = vmatmul.mubr.bf16.gmra.mrb[28].mxu1 %v9390_v9  ;;  %v9492_v9 = vld [vmem:[%s13273_s2 + $0x56c] ss:$16 sps:$4 sm:$0xff]  }
  0x7f   : > { %2116 = vmatpush1.bf16.msra.mxu0 %v9391_v10  ;;  %2568 = vmatpush1.bf16.msra.mxu1 %v9394_v11  ;;  %v9493_v10 = vld [vmem:[%s10723_s18 + $0x15c] ss:$28 sps:$4 sm:$0xff]   ;;  %v9487_v11 = vld [vmem:[%s13273_s2 + $0x560] ss:$16 sps:$4 sm:$0xff]  }
  0x80   : > { %2117 = vmatprep.subr.bf16.mxu0 %v9399_v12  ;;  %2569 = vmatprep.subr.bf16.mxu1 %v9402_v13  ;;  %v9490_v12 = vld [vmem:[%s13273_s2 + $0x568] ss:$16 sps:$4 sm:$0xff]   ;;  %v9498_v13 = vld [vmem:[%s13273_s2 + $0x584] ss:$16 sps:$4 sm:$0xff]  }
  0x81   : > { %2119 = vmatprep.mubr.bf16.mxu0 %v9405_v14  ;;  %2571 = vmatprep.mubr.bf16.mxu1 %v9405_v14  ;;  %v9501_v14 = vld [vmem:[%s13273_s2 + $0x58c] ss:$16 sps:$4 sm:$0xff]  }
  0x83   : > { %2118 = vmatpush1.bf16.msra.mxu0 %v9397_v15  ;;  %2570 = vmatpush1.bf16.msra.mxu1 %v9400_v16  ;;  %v9495_v15 = vld [vmem:[%s10723_s18 + $0x158] ss:$28 sps:$4 sm:$0xff]   ;;  %v9496_v16 = vld [vmem:[%s13273_s2 + $0x580] ss:$16 sps:$4 sm:$0xff]  }
  0x84   : > { %2200 = vmatprep.subr.bf16.mxu0 %v9408_v17  ;;  %2652 = vmatprep.subr.bf16.mxu1 %v9411_v18  ;;  %v9499_v17 = vld [vmem:[%s13273_s2 + $0x588] ss:$16 sps:$4 sm:$0xff]   ;;  %v9504_v18 = vld [vmem:[%s13273_s2 + $0x5a4] ss:$16 sps:$4 sm:$0xff]  }
  0x86   : > { %2120 = vmatmul.mubr.bf16.vlgmr.msra.gmra.mrb[0].mxu0 %v9403_v19  ;;  %2572 = vmatmul.mubr.bf16.vlgmr.msra.gmra.mrb[0].mxu1 %v9403_v19  ;;  %v9507_v19 = vld [vmem:[%s13273_s2 + $0x5ac] ss:$16 sps:$4 sm:$0xff]  }
  0x87   : > { %2201 = vmatpush1.bf16.msra.mxu0 %v9406_v20  ;;  %2653 = vmatpush1.bf16.msra.mxu1 %v9409_v21  ;;  %v9508_v20 = vld [vmem:[%s10723_s18 + $0x194] ss:$28 sps:$4 sm:$0xff]  }
  0x88   : > { %2202 = vmatprep.subr.bf16.mxu0 %v9414_v22  ;;  %2654 = vmatprep.subr.bf16.mxu1 %v9417_v23  ;;  %v9502_v21 = vld [vmem:[%s13273_s2 + $0x5a0] ss:$16 sps:$4 sm:$0xff]   ;;  %v9505_v22 = vld [vmem:[%s13273_s2 + $0x5a8] ss:$16 sps:$4 sm:$0xff]   ;;  %v9513_v23 = vld [vmem:[%s13273_s2 + $0x5c4] ss:$16 sps:$4 sm:$0xff]  }
  0x89   : > { %2129 = vmatprep.mubr.bf16.mxu0 %v9418_v24  ;;  %2581 = vmatprep.mubr.bf16.mxu1 %v9418_v24  ;;  %v9516_v24 = vld [vmem:[%s13273_s2 + $0x5cc] ss:$16 sps:$4 sm:$0xff]  }
  0x8b   : > { %2203 = vmatpush1.bf16.msra.mxu0 %v9412_v25  ;;  %2655 = vmatpush1.bf16.msra.mxu1 %v9415_v26  ;;  %v9510_v25 = vld [vmem:[%s10723_s18 + $0x190] ss:$28 sps:$4 sm:$0xff]  }
  0x8c   : > { %2204 = vmatprep.subr.bf16.mxu0 %v9423_v27  ;;  %2656 = vmatprep.subr.bf16.mxu1 %v9426_v28  ;;  %v9511_v26 = vld [vmem:[%s13273_s2 + $0x5c0] ss:$16 sps:$4 sm:$0xff]   ;;  %v9514_v27 = vld [vmem:[%s13273_s2 + $0x5c8] ss:$16 sps:$4 sm:$0xff]   ;;  %v9519_v28 = vld [vmem:[%s13273_s2 + $0x5e4] ss:$16 sps:$4 sm:$0xff]  }
  0x8e   : > { %2130 = vmatmul.mubr.bf16.gmra.mrb[4].mxu0 %v9420_v29  ;;  %2582 = vmatmul.mubr.bf16.gmra.mrb[4].mxu1 %v9420_v29  ;;  %v9522_v29 = vld [vmem:[%s13273_s2 + $0x5ec] ss:$16 sps:$4 sm:$0xff]  }
  0x8f   : > { %2205 = vmatpush1.bf16.msra.mxu0 %v9421_v30  ;;  %2657 = vmatpush1.bf16.msra.mxu1 %v9424_v31  ;;  %v9525_v30 = vld [vmem:[%s10723_s18 + $0x14] ss:$28 sps:$4 sm:$0xff]  }
  0x90   : > { %2206 = vmatprep.subr.bf16.mxu0 %v9429_v32  ;;  %2658 = vmatprep.subr.bf16.mxu1 %v9432_v33  ;;  %v9517_v31 = vld [vmem:[%s13273_s2 + $0x5e0] ss:$16 sps:$4 sm:$0xff]   ;;  %v9520_v32 = vld [vmem:[%s13273_s2 + $0x5e8] ss:$16 sps:$4 sm:$0xff]   ;;  %v9528_v33 = vld [vmem:[%s13273_s2 + $0x604] ss:$16 sps:$4 sm:$0xff]  }
  0x91   : > { %2139 = vmatprep.mubr.bf16.mxu0 %v9433_v34  ;;  %2591 = vmatprep.mubr.bf16.mxu1 %v9433_v34  ;;  %v9552_v34 = vld [vmem:[%s13273_s2 + $0x60c] ss:$16 sps:$4 sm:$0xff]  }
  0x93   : > { %2207 = vmatpush1.bf16.msra.mxu0 %v9427_v35  ;;  %2659 = vmatpush1.bf16.msra.mxu1 %v9430_v36  ;;  %v9523_v35 = vld [vmem:[%s10723_s18 + $0x10] ss:$28 sps:$4 sm:$0xff]  }
  0x94   : > { %2208 = vmatprep.subr.bf16.mxu0 %v9438_v37  ;;  %2660 = vmatprep.subr.bf16.mxu1 %v9441_v38  ;;  %v9526_v36 = vld [vmem:[%s13273_s2 + $0x600] ss:$16 sps:$4 sm:$0xff]   ;;  %v9529_v37 = vld [vmem:[%s10723_s18 + $0x4c] ss:$28 sps:$4 sm:$0xff]  }
  0x95   : > { %v9550_v38 = vld [vmem:[%s13273_s2 + $0x608] ss:$16 sps:$4 sm:$0xff]  }
  0x96   : > { %2140 = vmatmul.mubr.bf16.gmra.mrb[8].mxu0 %v9435_v39  ;;  %2592 = vmatmul.mubr.bf16.gmra.mrb[8].mxu1 %v9435_v39  ;;  %v9563_v39 = vld [vmem:[%s13275_s4 + $0x4] ss:$8 sps:$4 sm:$0xff]  }
  0x97   : > { %2209 = vmatpush1.bf16.msra.mxu0 %v9436_v40  ;;  %2661 = vmatpush1.bf16.msra.mxu1 %v9439_v41  ;;  %v9531_v40 = vld [vmem:[%s10723_s18 + $0x48] ss:$28 sps:$4 sm:$0xff]  }
  0x98   : > { %2210 = vmatprep.subr.bf16.mxu0 %v9444_v42  ;;  %2662 = vmatprep.subr.bf16.mxu1 %v9447_v43  ;;  %v9532_v41 = vld [vmem:[%s10723_s18 + $0x84] ss:$28 sps:$4 sm:$0xff]   ;;  %v9535_v43 = vld [vmem:[%s10723_s18 + $0xbc] ss:$28 sps:$4 sm:$0xff]  }
  0x99   : > { %2149 = vmatprep.mubr.bf16.mxu0 %v9448_v44  ;;  %2601 = vmatprep.mubr.bf16.mxu1 %v9448_v44  ;;  %v9534_v42 = vld [vmem:[%s10723_s18 + $0x80] ss:$28 sps:$4 sm:$0xff]   ;;  %v9537_v44 = vld [vmem:[%s10723_s18 + $0xb8] ss:$28 sps:$4 sm:$0xff]  }
  0x9b   : > { %2211 = vmatpush1.bf16.msra.mxu0 %v9442_v45  ;;  %2663 = vmatpush1.bf16.msra.mxu1 %v9445_v46  ;;  %v9538_v45 = vld [vmem:[%s10723_s18 + $0xf4] ss:$28 sps:$4 sm:$0xff]  }
  0x9c   : > { %2212 = vmatprep.subr.bf16.mxu0 %v9453_v47  ;;  %2664 = vmatprep.subr.bf16.mxu1 %v9456_v48  ;;  %v9540_v46 = vld [vmem:[%s10723_s18 + $0xf0] ss:$28 sps:$4 sm:$0xff]   ;;  %v9543_v48 = vld [vmem:[%s10723_s18 + $0x128] ss:$28 sps:$4 sm:$0xff]  }
  0x9d   : > { %v9541_v47 = vld [vmem:[%s10723_s18 + $0x12c] ss:$28 sps:$4 sm:$0xff]  }
  0x9e   : > { %2150 = vmatmul.mubr.bf16.gmra.mrb[12].mxu0 %v9450_v49  ;;  %2602 = vmatmul.mubr.bf16.gmra.mrb[12].mxu1 %v9450_v49  ;;  %v9544_v49 = vld [vmem:[%s10723_s18 + $0x164] ss:$28 sps:$4 sm:$0xff]  }
  0x9f   : > { %2213 = vmatpush1.bf16.msra.mxu0 %v9451_v50  ;;  %2665 = vmatpush1.bf16.msra.mxu1 %v9454_v51  ;;  %v9546_v50 = vld [vmem:[%s10723_s18 + $0x160] ss:$28 sps:$4 sm:$0xff]  }
  0xa0   : > { %2214 = vmatprep.subr.bf16.mxu0 %v9459_v52  ;;  %2666 = vmatprep.subr.bf16.mxu1 %v9462_v53  ;;  %v9547_v51 = vld [vmem:[%s10723_s18 + $0x19c] ss:$28 sps:$4 sm:$0xff]   ;;  %v10514_v53 = vmov 0  }
  0xa1   : > { %2159 = vmatprep.mubr.bf16.mxu0 %v9463_v54  ;;  %2611 = vmatprep.mubr.bf16.mxu1 %v9463_v54  ;;  %v9549_v52 = vld [vmem:[%s10723_s18 + $0x198] ss:$28 sps:$4 sm:$0xff]  }
  0xa2   : > { %v9553_v54 = vld [vmem:[%s10723_s18 + $0x18] ss:$28 sps:$4 sm:$0xff]  }
  0xa3   : > { %2215 = vmatpush1.bf16.msra.mxu0 %v9457_v55  ;;  %2667 = vmatpush1.bf16.msra.mxu1 %v9460_v56  ;;  %v9561_v55 = vld [vmem:[%s13275_s4] ss:$8 sps:$4 sm:$0xff]   ;;  %v9566_v56 = vld [vmem:[%s13275_s4 + $0x14] ss:$8 sps:$4 sm:$0xff]  }
  0xa4   : > { %2216 = vmatprep.subr.bf16.mxu0 %v9468_v57  ;;  %2668 = vmatprep.subr.bf16.mxu1 %v9471_v58  ;;  %v9564_v57 = vld [vmem:[%s13275_s4 + $0x10] ss:$8 sps:$4 sm:$0xff]   ;;  %v9569_v58 = vld [vmem:[%s13275_s4 + $0x24] ss:$8 sps:$4 sm:$0xff]  }
  0xa6   : > { %2160 = vmatmul.mubr.bf16.gmra.mrb[16].mxu0 %v9465_v59  ;;  %2612 = vmatmul.mubr.bf16.gmra.mrb[16].mxu1 %v9465_v59  ;;  %v9554_v59 = vld [vmem:[%s10723_s18 + $0x50] ss:$28 sps:$4 sm:$0xff]  }
  0xa7   : > { %2217 = vmatpush1.bf16.msra.mxu0 %v9466_v60  ;;  %2669 = vmatpush1.bf16.msra.mxu1 %v9469_v61  ;;  %v9567_v60 = vld [vmem:[%s13275_s4 + $0x20] ss:$8 sps:$4 sm:$0xff]   ;;  %v9572_v61 = vld [vmem:[%s13275_s4 + $0x34] ss:$8 sps:$4 sm:$0xff]  }
  0xa8   : > { %2218 = vmatprep.subr.bf16.mxu0 %v9474_v62  ;;  %2670 = vmatprep.subr.bf16.mxu1 %v9477_v63  ;;  %v9570_v62 = vld [vmem:[%s13275_s4 + $0x30] ss:$8 sps:$4 sm:$0xff]   ;;  %v9575_v63 = vld [vmem:[%s13275_s4 + $0x44] ss:$8 sps:$4 sm:$0xff]  }
  0xa9   : > { %2169 = vmatprep.mubr.bf16.mxu0 %v9478_v1  ;;  %2621 = vmatprep.mubr.bf16.mxu1 %v9478_v1  ;;  %v9573_v1 = vld [vmem:[%s13275_s4 + $0x40] ss:$8 sps:$4 sm:$0xff]  }
  0xab   : > { %2219 = vmatpush1.bf16.msra.mxu0 %v9472_v0  ;;  %2671 = vmatpush1.bf16.msra.mxu1 %v9475_v2  ;;  %v9555_v0 = vld [vmem:[%s10723_s18 + $0x88] ss:$28 sps:$4 sm:$0xff]   ;;  %v9578_v2 = vld [vmem:[%s13275_s4 + $0x54] ss:$8 sps:$4 sm:$0xff]  }
  0xac   : > { %2220 = vmatprep.subr.bf16.mxu0 %v9483_v3  ;;  %2672 = vmatprep.subr.bf16.mxu1 %v9486_v5  ;;  %v9576_v3 = vld [vmem:[%s13275_s4 + $0x50] ss:$8 sps:$4 sm:$0xff]   ;;  %v9556_v5 = vld [vmem:[%s10723_s18 + $0xc0] ss:$28 sps:$4 sm:$0xff]  }
  0xae   : > { %2170 = vmatmul.mubr.bf16.gmra.mrb[20].mxu0 %v9480_v4  ;;  %2622 = vmatmul.mubr.bf16.gmra.mrb[20].mxu1 %v9480_v4  ;;  %v9581_v4 = vld [vmem:[%s13275_s4 + $0x64] ss:$8 sps:$4 sm:$0xff]  }
  0xaf   : > { %2221 = vmatpush1.bf16.msra.mxu0 %v9481_v6  ;;  %2673 = vmatpush1.bf16.msra.mxu1 %v9484_v7  ;;  %v9579_v6 = vld [vmem:[%s13275_s4 + $0x60] ss:$8 sps:$4 sm:$0xff]   ;;  %v9584_v7 = vld [vmem:[%s13275_s4 + $0x74] ss:$8 sps:$4 sm:$0xff]  }
  0xb0   : > { %2222 = vmatprep.subr.bf16.mxu0 %v9489_v8  ;;  %2674 = vmatprep.subr.bf16.mxu1 %v9492_v9  ;;  %v9582_v8 = vld [vmem:[%s13275_s4 + $0x70] ss:$8 sps:$4 sm:$0xff]   ;;  %v9587_v9 = vld [vmem:[%s13275_s4 + $0x84] ss:$8 sps:$4 sm:$0xff]  }
  0xb1   : > { %2179 = vmatprep.mubr.bf16.mxu0 %v9493_v10  ;;  %2631 = vmatprep.mubr.bf16.mxu1 %v9493_v10  ;;  %v9557_v10 = vld [vmem:[%s10723_s18 + $0xf8] ss:$28 sps:$4 sm:$0xff]  }
  0xb3   : > { %2223 = vmatpush1.bf16.msra.mxu0 %v9487_v11  ;;  %2675 = vmatpush1.bf16.msra.mxu1 %v9490_v12  ;;  %v9585_v11 = vld [vmem:[%s13275_s4 + $0x80] ss:$8 sps:$4 sm:$0xff]   ;;  %v9590_v12 = vld [vmem:[%s13275_s4 + $0x94] ss:$8 sps:$4 sm:$0xff]  }
  0xb4   : > { %2224 = vmatprep.subr.bf16.mxu0 %v9498_v13  ;;  %2676 = vmatprep.subr.bf16.mxu1 %v9501_v14  ;;  %v9588_v13 = vld [vmem:[%s13275_s4 + $0x90] ss:$8 sps:$4 sm:$0xff]   ;;  %v9593_v14 = vld [vmem:[%s13275_s4 + $0xa4] ss:$8 sps:$4 sm:$0xff]  }
  0xb6   : > { %2180 = vmatmul.mubr.bf16.gmra.mrb[24].mxu0 %v9495_v15  ;;  %2632 = vmatmul.mubr.bf16.gmra.mrb[24].mxu1 %v9495_v15  ;;  %v9558_v15 = vld [vmem:[%s10723_s18 + $0x130] ss:$28 sps:$4 sm:$0xff]  }
  0xb7   : > { %2225 = vmatpush1.bf16.msra.mxu0 %v9496_v16  ;;  %2677 = vmatpush1.bf16.msra.mxu1 %v9499_v17  ;;  %v9591_v16 = vld [vmem:[%s13275_s4 + $0xa0] ss:$8 sps:$4 sm:$0xff]   ;;  %v9596_v17 = vld [vmem:[%s13275_s4 + $0xb4] ss:$8 sps:$4 sm:$0xff]  }
  0xb8   : > { %2226 = vmatprep.subr.bf16.mxu0 %v9504_v18  ;;  %2678 = vmatprep.subr.bf16.mxu1 %v9507_v19  ;;  %v9594_v18 = vld [vmem:[%s13275_s4 + $0xb0] ss:$8 sps:$4 sm:$0xff]   ;;  %v9599_v19 = vld [vmem:[%s13275_s4 + $0xc4] ss:$8 sps:$4 sm:$0xff]  }
  0xb9   : > { %2189 = vmatprep.mubr.bf16.mxu0 %v9508_v20  ;;  %2641 = vmatprep.mubr.bf16.mxu1 %v9508_v20  ;;  %v9559_v20 = vld [vmem:[%s10723_s18 + $0x168] ss:$28 sps:$4 sm:$0xff]  }
  0xbb   : > { %2227 = vmatpush1.bf16.msra.mxu0 %v9502_v21  ;;  %2679 = vmatpush1.bf16.msra.mxu1 %v9505_v22  ;;  %v9597_v21 = vld [vmem:[%s13275_s4 + $0xc0] ss:$8 sps:$4 sm:$0xff]   ;;  %v9602_v22 = vld [vmem:[%s13275_s4 + $0xd4] ss:$8 sps:$4 sm:$0xff]  }
  0xbc   : > { %2228 = vmatprep.subr.bf16.mxu0 %v9513_v23  ;;  %2680 = vmatprep.subr.bf16.mxu1 %v9516_v24  ;;  %v9600_v23 = vld [vmem:[%s13275_s4 + $0xd0] ss:$8 sps:$4 sm:$0xff]   ;;  %v9560_v24 = vld [vmem:[%s10723_s18 + $0x1a0] ss:$28 sps:$4 sm:$0xff]  }
  0xbe   : > { %2190 = vmatmul.mubr.bf16.gmra.mrb[28].mxu0 %v9510_v25  ;;  %2642 = vmatmul.mubr.bf16.gmra.mrb[28].mxu1 %v9510_v25  ;;  %v9605_v25 = vld [vmem:[%s13275_s4 + $0xe4] ss:$8 sps:$4 sm:$0xff]  }
  0xbf   : > { %2229 = vmatpush1.bf16.msra.mxu0 %v9511_v26  ;;  %2681 = vmatpush1.bf16.msra.mxu1 %v9514_v27  ;;  %v9603_v26 = vld [vmem:[%s13275_s4 + $0xe0] ss:$8 sps:$4 sm:$0xff]   ;;  %v9608_v27 = vld [vmem:[%s13275_s4 + $0xf4] ss:$8 sps:$4 sm:$0xff]  }
  0xc0   : > { %2230 = vmatprep.subr.bf16.mxu0 %v9519_v28  ;;  %2682 = vmatprep.subr.bf16.mxu1 %v9522_v29  ;;  %v9606_v28 = vld [vmem:[%s13275_s4 + $0xf0] ss:$8 sps:$4 sm:$0xff]   ;;  %v9611_v29 = vld [vmem:[%s13275_s4 + $0x104] ss:$8 sps:$4 sm:$0xff]  }
  0xc1   : > { %2232 = vmatprep.mubr.bf16.mxu0 %v9525_v30  ;;  %2684 = vmatprep.mubr.bf16.mxu1 %v9525_v30  ;;  %v669_v30 = vlaneseq }
  0xc3   : > { %2231 = vmatpush1.bf16.msra.mxu0 %v9517_v31  ;;  %2683 = vmatpush1.bf16.msra.mxu1 %v9520_v32  ;;  %v11366_v31 = vshrl.u32 %v669_v30, 7  ;;  %v9612_v30 = vld [vmem:[%s13275_s4 + $0x110] ss:$8 sps:$4 sm:$0xff]  }
  0xc4   : > { %2313 = vmatprep.subr.bf16.mxu0 %v9528_v33  ;;  %2765 = vmatprep.subr.bf16.mxu1 %v9552_v34  ;;  %v667_v34 = vld [vmem:[%s13274_s3] sm:$0xf] }
  0xc5   : > { %v11369_v32 = vsub.s32 0, %v11366_v31  ;;  %v11372_v33 = vsub.s32 2, %v11366_v31 }
  0xc6   : > { %2233 = vmatmul.mubr.bf16.vlgmr.msra.gmra.mrb[0].mxu0 %v9523_v35  ;;  %2685 = vmatmul.mubr.bf16.vlgmr.msra.gmra.mrb[0].mxu1 %v9523_v35  ;;  %v11378_v35 = vsub.s32 1, %v11366_v31 }
  0xc7   : > { %2314 = vmatpush1.bf16.msra.mxu0 %v9526_v36  ;;  %2242 = vmatprep.mubr.bf16.mxu0 %v9529_v37  ;;  %v11381_v36 = vsub.s32 3, %v11366_v31 }
  0xc8   : > { %2694 = vmatprep.mubr.bf16.mxu1 %v9529_v37  ;;  %2766 = vmatpush1.bf16.msra.mxu1 %v9550_v38  ;;  %v11384_v37 = vrot.slane %v667_v34, %v11369_v32  ;;  %v11387_v38 = vrot.slane %v667_v34, %v11372_v33 }
  0xc9   : > { %3370 = vmatprep.subr.bf16.mxu0 %v9563_v39  ;;  %v11390_v39 = vrot.slane %v667_v34, %v11378_v35 }
  0xce   : > { %2243 = vmatmul.mubr.bf16.gmra.mrb[4].mxu0 %v9531_v40  ;;  %2695 = vmatmul.mubr.bf16.gmra.mrb[4].mxu1 %v9531_v40  ;;  %v11393_v40 = vrot.slane %v667_v34, %v11381_v36  ;;  %v9668_v34 = vld [vmem:[%s13277_s6 + $0x64] ss:$16 sps:$4 sm:$0xff]  }
  0xcf   : > { %2252 = vmatprep.mubr.bf16.mxu0 %v9532_v41  ;;  %2704 = vmatprep.mubr.bf16.mxu1 %v9532_v41 }
  0xd6   : > { %2253 = vmatmul.mubr.bf16.gmra.mrb[8].mxu0 %v9534_v42  ;;  %2705 = vmatmul.mubr.bf16.gmra.mrb[8].mxu1 %v9534_v42 }
  0xd7   : > { %2262 = vmatprep.mubr.bf16.mxu0 %v9535_v43  ;;  %2714 = vmatprep.mubr.bf16.mxu1 %v9535_v43 }
  0xde   : > { %2263 = vmatmul.mubr.bf16.gmra.mrb[12].mxu0 %v9537_v44  ;;  %2715 = vmatmul.mubr.bf16.gmra.mrb[12].mxu1 %v9537_v44 }
  0xdf   : > { %2272 = vmatprep.mubr.bf16.mxu0 %v9538_v45  ;;  %2724 = vmatprep.mubr.bf16.mxu1 %v9538_v45 }
  0xe6   : > { %2273 = vmatmul.mubr.bf16.gmra.mrb[16].mxu0 %v9540_v46  ;;  %2725 = vmatmul.mubr.bf16.gmra.mrb[16].mxu1 %v9540_v46 }
  0xe7   : > { %2282 = vmatprep.mubr.bf16.mxu0 %v9541_v47  ;;  %2734 = vmatprep.mubr.bf16.mxu1 %v9541_v47 }
  0xee   : > { %2283 = vmatmul.mubr.bf16.gmra.mrb[20].mxu0 %v9543_v48  ;;  %2735 = vmatmul.mubr.bf16.gmra.mrb[20].mxu1 %v9543_v48 }
  0xef   : > { %2292 = vmatprep.mubr.bf16.mxu0 %v9544_v49  ;;  %2744 = vmatprep.mubr.bf16.mxu1 %v9544_v49 }
  0xf6   : > { %2293 = vmatmul.mubr.bf16.gmra.mrb[24].mxu0 %v9546_v50  ;;  %2745 = vmatmul.mubr.bf16.gmra.mrb[24].mxu1 %v9546_v50 }
  0xf7   : > { %2302 = vmatprep.mubr.bf16.mxu0 %v9547_v51  ;;  %2754 = vmatprep.mubr.bf16.mxu1 %v9547_v51 }
  0xfe   : > { %2303 = vmatmul.mubr.bf16.gmra.mrb[28].mxu0 %v9549_v52  ;;  %2755 = vmatmul.mubr.bf16.gmra.mrb[28].mxu1 %v9549_v52 }
  0xff   : > { %2345 = vmatprep.mubr.bf16.mxu0 %v10514_v53  ;;  %2797 = vmatprep.mubr.bf16.mxu1 %v10514_v53 }
 0x106   : > { %7959 = vmatmul.mubr.msk.bf16.vlgmr.msra.gmra.mrb[0].mxu0 %vm1949_vm0, %v9553_v54  ;;  %7967 = vmatmul.mubr.msk.bf16.vlgmr.msra.gmra.mrb[0].mxu1 %vm1949_vm0, %v9553_v54 }
 0x107   : > { %2355 = vmatprep.mubr.bf16.mxu0 %v10514_v53  ;;  %2807 = vmatprep.mubr.bf16.mxu1 %v10514_v53 }
 0x108   : > { %3371 = vmatpush1.bf16.msra.mxu0 %v9561_v55 }
 0x109   : > { %3372 = vmatprep.subr.bf16.mxu0 %v9566_v56  ;;  %v9657_v56 = vld [vmem:[%s13277_s6] ss:$16 sps:$4 sm:$0xff]  }
 0x10c   : > { %3373 = vmatpush1.bf16.msra.mxu0 %v9564_v57 }
 0x10d   : > { %3374 = vmatprep.subr.bf16.mxu0 %v9569_v58 }
 0x10e   : > { %7960 = vmatmul.mubr.msk.bf16.gmra.mrb[4].mxu0 %vm1949_vm0, %v9554_v59  ;;  %7968 = vmatmul.mubr.msk.bf16.gmra.mrb[4].mxu1 %vm1949_vm0, %v9554_v59  ;;  %v9659_v59 = vld [vmem:[%s13277_s6 + $0x4] ss:$16 sps:$4 sm:$0xff]  }
 0x10f   : > { %2365 = vmatprep.mubr.bf16.mxu0 %v10514_v53  ;;  %2817 = vmatprep.mubr.bf16.mxu1 %v10514_v53 }
 0x110   : > { %3375 = vmatpush1.bf16.msra.mxu0 %v9567_v60  ;;  %3898 = vmatprep.subr.bf16.mxu1 %v9659_v59  ;;  %v9671_v59 = vld [vmem:[%s13277_s6 + $0x84] ss:$16 sps:$4 sm:$0xff]  }
 0x111   : > { %3376 = vmatprep.subr.bf16.mxu0 %v9572_v61  ;;  %3899 = vmatpush1.bf16.msra.mxu1 %v9657_v56 }
 0x114   : > { %3377 = vmatpush1.bf16.msra.mxu0 %v9570_v62 }
 0x115   : > { %3378 = vmatprep.subr.bf16.mxu0 %v9575_v63 }
 0x116   : > { %7961 = vmatmul.mubr.msk.bf16.gmra.mrb[8].mxu0 %vm1949_vm0, %v9555_v0  ;;  %7969 = vmatmul.mubr.msk.bf16.gmra.mrb[8].mxu1 %vm1949_vm0, %v9555_v0  ;;  %v9662_v0 = vld [vmem:[%s13277_s6 + $0x24] ss:$16 sps:$4 sm:$0xff]  }
 0x117   : > { %2375 = vmatprep.mubr.bf16.mxu0 %v10514_v53  ;;  %2827 = vmatprep.mubr.bf16.mxu1 %v10514_v53 }
 0x118   : > { %3379 = vmatpush1.bf16.msra.mxu0 %v9573_v1  ;;  %3900 = vmatprep.subr.bf16.mxu1 %v9662_v0  ;;  %v9620_v0 = vld [vmem:[%s13275_s4 + $0x134] ss:$8 sps:$4 sm:$0xff]  }
 0x119   : > { %3380 = vmatprep.subr.bf16.mxu0 %v9578_v2 }
 0x11c   : > { %3381 = vmatpush1.bf16.msra.mxu0 %v9576_v3 }
 0x11d   : > { %3382 = vmatprep.subr.bf16.mxu0 %v9581_v4 }
 0x11e   : > { %7962 = vmatmul.mubr.msk.bf16.gmra.mrb[12].mxu0 %vm1949_vm0, %v9556_v5  ;;  %7970 = vmatmul.mubr.msk.bf16.gmra.mrb[12].mxu1 %vm1949_vm0, %v9556_v5 }
 0x11f   : > { %2385 = vmatprep.mubr.bf16.mxu0 %v10514_v53  ;;  %2837 = vmatprep.mubr.bf16.mxu1 %v10514_v53 }
 0x120   : > { %3383 = vmatpush1.bf16.msra.mxu0 %v9579_v6 }
 0x121   : > { %3384 = vmatprep.subr.bf16.mxu0 %v9584_v7  ;;  %v9660_v7 = vld [vmem:[%s13277_s6 + $0x20] ss:$16 sps:$4 sm:$0xff]  }
 0x122   : > { %3901 = vmatpush1.bf16.msra.mxu1 %v9660_v7 }
 0x124   : > { %3385 = vmatpush1.bf16.msra.mxu0 %v9582_v8 }
 0x125   : > { %3386 = vmatprep.subr.bf16.mxu0 %v9587_v9 }
 0x126   : > { %7963 = vmatmul.mubr.msk.bf16.gmra.mrb[16].mxu0 %vm1949_vm0, %v9557_v10  ;;  %7971 = vmatmul.mubr.msk.bf16.gmra.mrb[16].mxu1 %vm1949_vm0, %v9557_v10 }
 0x127   : > { %2395 = vmatprep.mubr.bf16.mxu0 %v10514_v53  ;;  %2847 = vmatprep.mubr.bf16.mxu1 %v10514_v53 }
 0x128   : > { %3387 = vmatpush1.bf16.msra.mxu0 %v9585_v11 }
 0x129   : > { %3388 = vmatprep.subr.bf16.mxu0 %v9590_v12  ;;  %v9609_v12 = vld [vmem:[%s13275_s4 + $0x100] ss:$8 sps:$4 sm:$0xff]  }
 0x12c   : > { %3389 = vmatpush1.bf16.msra.mxu0 %v9588_v13  ;;  %v9665_v13 = vld [vmem:[%s13277_s6 + $0x44] ss:$16 sps:$4 sm:$0xff]  }
 0x12d   : > { %3390 = vmatprep.subr.bf16.mxu0 %v9593_v14  ;;  %3902 = vmatprep.subr.bf16.mxu1 %v9665_v13 }
 0x12e   : > { %7964 = vmatmul.mubr.msk.bf16.gmra.mrb[20].mxu0 %vm1949_vm0, %v9558_v15  ;;  %7972 = vmatmul.mubr.msk.bf16.gmra.mrb[20].mxu1 %vm1949_vm0, %v9558_v15 }
 0x12f   : > { %2405 = vmatprep.mubr.bf16.mxu0 %v10514_v53  ;;  %2857 = vmatprep.mubr.bf16.mxu1 %v10514_v53 }
 0x130   : > { %3391 = vmatpush1.bf16.msra.mxu0 %v9591_v16 }
 0x131   : > { %3392 = vmatprep.subr.bf16.mxu0 %v9596_v17 }
 0x134   : > { %3393 = vmatpush1.bf16.msra.mxu0 %v9594_v18  ;;  %v9614_v18 = vld [vmem:[%s13275_s4 + $0x114] ss:$8 sps:$4 sm:$0xff]  }
 0x135   : > { %3394 = vmatprep.subr.bf16.mxu0 %v9599_v19 }
 0x136   : > { %7965 = vmatmul.mubr.msk.bf16.gmra.mrb[24].mxu0 %vm1949_vm0, %v9559_v20  ;;  %7973 = vmatmul.mubr.msk.bf16.gmra.mrb[24].mxu1 %vm1949_vm0, %v9559_v20 }
 0x137   : > { %2415 = vmatprep.mubr.bf16.mxu0 %v10514_v53  ;;  %2867 = vmatprep.mubr.bf16.mxu1 %v10514_v53 }
 0x138   : > { %3395 = vmatpush1.bf16.msra.mxu0 %v9597_v21 }
 0x139   : > { %3396 = vmatprep.subr.bf16.mxu0 %v9602_v22 }
 0x13c   : > { %3397 = vmatpush1.bf16.msra.mxu0 %v9600_v23 }
 0x13d   : > { %3398 = vmatprep.subr.bf16.mxu0 %v9605_v25 }
 0x13e   : > { %7966 = vmatmul.mubr.msk.bf16.gmra.mrb[28].mxu0 %vm1949_vm0, %v9560_v24  ;;  %7974 = vmatmul.mubr.msk.bf16.gmra.mrb[28].mxu1 %vm1949_vm0, %v9560_v24 }
 0x13f   : > { %3930 = vmatprep.mubr.bf16.mxu1 %v10514_v53 }
 0x140   : > { %3399 = vmatpush1.bf16.msra.mxu0 %v9603_v26 }
 0x141   : > { %3400 = vmatprep.subr.bf16.mxu0 %v9608_v27  ;;  %v9663_v27 = vld [vmem:[%s13277_s6 + $0x40] ss:$16 sps:$4 sm:$0xff]  }
 0x142   : > { %3903 = vmatpush1.bf16.msra.mxu1 %v9663_v27 }
 0x143   : > { %3904 = vmatprep.subr.bf16.mxu1 %v9668_v34 }
 0x144   : > { %3401 = vmatpush1.bf16.msra.mxu0 %v9606_v28 }
 0x145   : > { %3483 = vmatprep.subr.bf16.mxu0 %v9611_v29 }
 0x1d9   : > { %v2347_v41 = vpop.f32.mrb[0].mxu0  ;;  %v2799_v42 = vpop.f32.mrb[0].mxu1 }
 0x1da   : > { %v8665_v43 = vadd.f32 %v2347_v41, %v11384_v37  ;;  %v8697_v44 = vadd.f32 %v2799_v42, %v11387_v38  ;;  %v2349_v45 = vpop.f32.mrb[1].mxu0  ;;  %v2801_v46 = vpop.f32.mrb[1].mxu1 }
 0x1db   : > { %v8666_v47 = vadd.f32 %v2349_v45, %v11390_v39  ;;  %v8698_v48 = vadd.f32 %v2801_v46, %v11393_v40  ;;  %v2351_v49 = vpop.f32.mrb[2].mxu0  ;;  %v2803_v50 = vpop.f32.mrb[2].mxu1  ;;  %v9617_v45 = vld [vmem:[%s13275_s4 + $0x124] ss:$8 sps:$4 sm:$0xff]  }
 0x1dc   : > { %v8667_v51 = vadd.f32 %v2351_v49, %v11384_v37  ;;  %v8699_v52 = vadd.f32 %v2803_v50, %v11387_v38  ;;  %v2353_v54 = vpop.f32.mrb[3].mxu0  ;;  %v2805_v55 = vpop.f32.mrb[3].mxu1  ;;  %v2878_v60 = vmax.f32 %v8665_v43, 0.0  ;;  %v2880_v61 = vmax.f32 %v8697_v44, 0.0 }
 0x1dd   : > { %v8668_v57 = vadd.f32 %v2353_v54, %v11390_v39  ;;  %v8700_v58 = vadd.f32 %v2805_v55, %v11393_v40  ;;  %v2879_v1 = vmax.f32 %v8666_v47, 0.0  ;;  %v2881_v2 = vmax.f32 %v8698_v48, 0.0 }
 0x1de   : > { %v2882_v62 = vmax.f32 %v8667_v51, 0.0  ;;  %v2884_v63 = vmax.f32 %v8699_v52, 0.0  ;;  %v9666_v52 = vld [vmem:[%s13277_s6 + $0x60] ss:$16 sps:$4 sm:$0xff]  }
 0x1df   : > { %v2883_v3 = vmax.f32 %v8668_v57, 0.0  ;;  %v2885_v4 = vmax.f32 %v8700_v58, 0.0  ;;  %v9615_v58 = vld [vmem:[%s13275_s4 + $0x120] ss:$8 sps:$4 sm:$0xff]   ;;  %3905 = vmatpush1.bf16.msra.mxu1 %v9666_v52 }
 0x1e0   : > { %v2942_v5 = vpack.c.bf16 %v2882_v62, %v2878_v60  ;;  %v11412_v6 = vpack.c.bf16 %v2884_v63, %v2880_v61  ;;  %3906 = vmatprep.subr.bf16.mxu1 %v9671_v59 }
 0x1e1   : > { %v2943_v8 = vpack.c.bf16 %v2883_v3, %v2879_v1  ;;  %v11417_v9 = vpack.c.bf16 %v2885_v4, %v2881_v2  ;;  %v2357_v10 = vpop.f32.mrb[4].mxu0  ;;  %v2809_v11 = vpop.f32.mrb[4].mxu1 }
 0x1e2   : > { %v8669_v14 = vadd.f32 %v2357_v10, %v11384_v37  ;;  %v8701_v15 = vadd.f32 %v2809_v11, %v11387_v38  ;;  %v2359_v16 = vpop.f32.mrb[5].mxu0  ;;  %v2811_v17 = vpop.f32.mrb[5].mxu1  ;;  %v9669_v11 = vld [vmem:[%s13277_s6 + $0x80] ss:$16 sps:$4 sm:$0xff]  }
 0x1e3   : > { %v8670_v19 = vadd.f32 %v2359_v16, %v11390_v39  ;;  %v8702_v20 = vadd.f32 %v2811_v17, %v11393_v40  ;;  %v2361_v21 = vpop.f32.mrb[6].mxu0  ;;  %v2813_v22 = vpop.f32.mrb[6].mxu1  ;;  %3402 = vmatprep.mubr.bf16.mxu0 %v2943_v8  ;;  %3907 = vmatpush1.bf16.msra.mxu1 %v9669_v11 }
 0x1e4   : > { %v8671_v23 = vadd.f32 %v2361_v21, %v11384_v37  ;;  %v8703_v24 = vadd.f32 %v2813_v22, %v11387_v38  ;;  %v2363_v25 = vpop.f32.mrb[7].mxu0  ;;  %v2815_v26 = vpop.f32.mrb[7].mxu1  ;;  %3403 = vmatmul.mubr.bf16.vlgmr.msra.gmra.mrb[32].mxu0 %v2942_v5  ;;  %v2886_v41 = vmax.f32 %v8669_v14, 0.0  ;;  %v2888_v42 = vmax.f32 %v8701_v15, 0.0  ;;  %v9618_v14 = vld [vmem:[%s13275_s4 + $0x130] ss:$8 sps:$4 sm:$0xff]  }
 0x1e5   : > { %v8672_v28 = vadd.f32 %v2363_v25, %v11390_v39  ;;  %v8704_v29 = vadd.f32 %v2815_v26, %v11393_v40  ;;  %3484 = vmatpush1.bf16.msra.mxu0 %v9609_v12  ;;  %v2887_v46 = vmax.f32 %v8670_v19, 0.0  ;;  %v2889_v47 = vmax.f32 %v8702_v20, 0.0  ;;  %v9623_v19 = vld [vmem:[%s13275_s4 + $0x144] ss:$8 sps:$4 sm:$0xff]  }
 0x1e6   : > { %v2890_v43 = vmax.f32 %v8671_v23, 0.0  ;;  %v2892_v44 = vmax.f32 %v8703_v24, 0.0  ;;  %3485 = vmatprep.subr.bf16.mxu0 %v9614_v18 }
 0x1e7   : > { %v2891_v48 = vmax.f32 %v8672_v28, 0.0  ;;  %v2893_v49 = vmax.f32 %v8704_v29, 0.0 }
 0x1e8   : > { %v2946_v50 = vpack.c.bf16 %v2890_v43, %v2886_v41  ;;  %v11448_v51 = vpack.c.bf16 %v2892_v44, %v2888_v42  ;;  %v9626_v44 = vld [vmem:[%s13275_s4 + $0x154] ss:$8 sps:$4 sm:$0xff]  }
 0x1e9   : > { %v2947_v54 = vpack.c.bf16 %v2891_v48, %v2887_v46  ;;  %v11453_v55 = vpack.c.bf16 %v2893_v49, %v2889_v47  ;;  %v2367_v56 = vpop.f32.mrb[8].mxu0  ;;  %v2819_v57 = vpop.f32.mrb[8].mxu1  ;;  %3486 = vmatpush1.bf16.msra.mxu0 %v9612_v30  ;;  %v9621_v30 = vld [vmem:[%s13275_s4 + $0x140] ss:$8 sps:$4 sm:$0xff]  }
 0x1ea   : > { %v8673_v60 = vadd.f32 %v2367_v56, %v11384_v37  ;;  %v8705_v61 = vadd.f32 %v2819_v57, %v11387_v38  ;;  %v2369_v62 = vpop.f32.mrb[9].mxu0  ;;  %v2821_v63 = vpop.f32.mrb[9].mxu1  ;;  %3487 = vmatprep.subr.bf16.mxu0 %v9617_v45 }
 0x1eb   : > { %v8674_v1 = vadd.f32 %v2369_v62, %v11390_v39  ;;  %v8706_v2 = vadd.f32 %v2821_v63, %v11393_v40  ;;  %v2371_v3 = vpop.f32.mrb[10].mxu0  ;;  %v2823_v4 = vpop.f32.mrb[10].mxu1  ;;  %3412 = vmatprep.mubr.bf16.mxu0 %v2947_v54  ;;  %v9629_v63 = vld [vmem:[%s13275_s4 + $0x164] ss:$8 sps:$4 sm:$0xff]  }
 0x1ec   : > { %v8675_v5 = vadd.f32 %v2371_v3, %v11384_v37  ;;  %v8707_v7 = vadd.f32 %v2823_v4, %v11387_v38  ;;  %v2373_v8 = vpop.f32.mrb[11].mxu0  ;;  %v2825_v10 = vpop.f32.mrb[11].mxu1  ;;  %3413 = vmatmul.mubr.bf16.gmra.mrb[36].mxu0 %v2946_v50  ;;  %v2894_v15 = vmax.f32 %v8673_v60, 0.0  ;;  %v2896_v16 = vmax.f32 %v8705_v61, 0.0 }
 0x1ed   : > { %v8676_v12 = vadd.f32 %v2373_v8, %v11390_v39  ;;  %v8708_v13 = vadd.f32 %v2825_v10, %v11393_v40  ;;  %3488 = vmatpush1.bf16.msra.mxu0 %v9615_v58  ;;  %v2895_v20 = vmax.f32 %v8674_v1, 0.0  ;;  %v2897_v21 = vmax.f32 %v8706_v2, 0.0  ;;  %v9624_v58 = vld [vmem:[%s13275_s4 + $0x150] ss:$8 sps:$4 sm:$0xff]  }
 0x1ee   : > { %v2898_v17 = vmax.f32 %v8675_v5, 0.0  ;;  %v2900_v18 = vmax.f32 %v8707_v7, 0.0  ;;  %3489 = vmatprep.subr.bf16.mxu0 %v9620_v0 }
 0x1ef   : > { %v2899_v22 = vmax.f32 %v8676_v12, 0.0  ;;  %v2901_v23 = vmax.f32 %v8708_v13, 0.0  ;;  %v9627_v12 = vld [vmem:[%s13275_s4 + $0x160] ss:$8 sps:$4 sm:$0xff]  }
 0x1f0   : > { %v2950_v24 = vpack.c.bf16 %v2898_v17, %v2894_v15  ;;  %v11481_v25 = vpack.c.bf16 %v2900_v18, %v2896_v16  ;;  %v9632_v17 = vld [vmem:[%s13275_s4 + $0x174] ss:$8 sps:$4 sm:$0xff]  }
 0x1f1   : > { %v2951_v26 = vpack.c.bf16 %v2899_v22, %v2895_v20  ;;  %v11483_v27 = vpack.c.bf16 %v2901_v23, %v2897_v21  ;;  %v2377_v28 = vpop.f32.mrb[12].mxu0  ;;  %v2829_v29 = vpop.f32.mrb[12].mxu1  ;;  %3490 = vmatpush1.bf16.msra.mxu0 %v9618_v14 }
 0x1f2   : > { %v8677_v34 = vadd.f32 %v2377_v28, %v11384_v37  ;;  %v8709_v41 = vadd.f32 %v2829_v29, %v11387_v38  ;;  %v2379_v42 = vpop.f32.mrb[13].mxu0  ;;  %v2831_v43 = vpop.f32.mrb[13].mxu1  ;;  %3491 = vmatprep.subr.bf16.mxu0 %v9623_v19 }
 0x1f3   : > { %v8678_v45 = vadd.f32 %v2379_v42, %v11390_v39  ;;  %v8710_v46 = vadd.f32 %v2831_v43, %v11393_v40  ;;  %v2381_v47 = vpop.f32.mrb[14].mxu0  ;;  %v2833_v48 = vpop.f32.mrb[14].mxu1  ;;  %3422 = vmatprep.mubr.bf16.mxu0 %v2951_v26 }
 0x1f4   : > { %v8679_v49 = vadd.f32 %v2381_v47, %v11384_v37  ;;  %v8711_v50 = vadd.f32 %v2833_v48, %v11387_v38  ;;  %v2383_v52 = vpop.f32.mrb[15].mxu0  ;;  %v2835_v54 = vpop.f32.mrb[15].mxu1  ;;  %3423 = vmatmul.mubr.bf16.gmra.mrb[40].mxu0 %v2950_v24  ;;  %v2902_v59 = vmax.f32 %v8677_v34, 0.0  ;;  %v2904_v60 = vmax.f32 %v8709_v41, 0.0 }
 0x1f5   : > { %v8680_v56 = vadd.f32 %v2383_v52, %v11390_v39  ;;  %v8712_v57 = vadd.f32 %v2835_v54, %v11393_v40  ;;  %3492 = vmatpush1.bf16.msra.mxu0 %v9621_v30  ;;  %v2903_v0 = vmax.f32 %v8678_v45, 0.0  ;;  %v2905_v1 = vmax.f32 %v8710_v46, 0.0  ;;  %v9630_v30 = vld [vmem:[%s13275_s4 + $0x170] ss:$8 sps:$4 sm:$0xff]  }
 0x1f6   : > { %v2906_v61 = vmax.f32 %v8679_v49, 0.0  ;;  %v2908_v62 = vmax.f32 %v8711_v50, 0.0  ;;  %3493 = vmatprep.subr.bf16.mxu0 %v9626_v44  ;;  %v9635_v44 = vld [vmem:[%s13275_s4 + $0x184] ss:$8 sps:$4 sm:$0xff]  }
 0x1f7   : > { %v2907_v2 = vmax.f32 %v8680_v56, 0.0  ;;  %v2909_v3 = vmax.f32 %v8712_v57, 0.0 }
 0x1f8   : > { %v2954_v4 = vpack.c.bf16 %v2906_v61, %v2902_v59  ;;  %v11505_v5 = vpack.c.bf16 %v2908_v62, %v2904_v60 }
 0x1f9   : > { %v2955_v7 = vpack.c.bf16 %v2907_v2, %v2903_v0  ;;  %v11507_v8 = vpack.c.bf16 %v2909_v3, %v2905_v1  ;;  %v2387_v10 = vpop.f32.mrb[16].mxu0  ;;  %v2839_v11 = vpop.f32.mrb[16].mxu1  ;;  %3494 = vmatpush1.bf16.msra.mxu0 %v9624_v58  ;;  %v9633_v58 = vld [vmem:[%s13275_s4 + $0x180] ss:$8 sps:$4 sm:$0xff]  }
 0x1fa   : > { %v8681_v13 = vadd.f32 %v2387_v10, %v11384_v37  ;;  %v8713_v14 = vadd.f32 %v2839_v11, %v11387_v38  ;;  %v2389_v15 = vpop.f32.mrb[17].mxu0  ;;  %v2841_v16 = vpop.f32.mrb[17].mxu1  ;;  %3495 = vmatprep.subr.bf16.mxu0 %v9629_v63  ;;  %v9638_v63 = vld [vmem:[%s13275_s4 + $0x194] ss:$8 sps:$4 sm:$0xff]  }
 0x1fb   : > { %v8682_v18 = vadd.f32 %v2389_v15, %v11390_v39  ;;  %v8714_v19 = vadd.f32 %v2841_v16, %v11393_v40  ;;  %v2391_v20 = vpop.f32.mrb[18].mxu0  ;;  %v2843_v21 = vpop.f32.mrb[18].mxu1  ;;  %3432 = vmatprep.mubr.bf16.mxu0 %v2955_v7 }
 0x1fc   : > { %v8683_v22 = vadd.f32 %v2391_v20, %v11384_v37  ;;  %v8715_v23 = vadd.f32 %v2843_v21, %v11387_v38  ;;  %v2393_v24 = vpop.f32.mrb[19].mxu0  ;;  %v2845_v26 = vpop.f32.mrb[19].mxu1  ;;  %3433 = vmatmul.mubr.bf16.gmra.mrb[44].mxu0 %v2954_v4  ;;  %v2910_v34 = vmax.f32 %v8681_v13, 0.0  ;;  %v2912_v41 = vmax.f32 %v8713_v14, 0.0  ;;  %v9636_v14 = vld [vmem:[%s13275_s4 + $0x190] ss:$8 sps:$4 sm:$0xff]  }
 0x1fd   : > { %v8684_v28 = vadd.f32 %v2393_v24, %v11390_v39  ;;  %v8716_v29 = vadd.f32 %v2845_v26, %v11393_v40  ;;  %3496 = vmatpush1.bf16.msra.mxu0 %v9627_v12  ;;  %v2911_v45 = vmax.f32 %v8682_v18, 0.0  ;;  %v2913_v46 = vmax.f32 %v8714_v19, 0.0  ;;  %v9641_v19 = vld [vmem:[%s13275_s4 + $0x1a4] ss:$8 sps:$4 sm:$0xff]  }
 0x1fe   : > { %v2914_v42 = vmax.f32 %v8683_v22, 0.0  ;;  %v2916_v43 = vmax.f32 %v8715_v23, 0.0  ;;  %3497 = vmatprep.subr.bf16.mxu0 %v9632_v17 }
 0x1ff   : > { %v2915_v47 = vmax.f32 %v8684_v28, 0.0  ;;  %v2917_v48 = vmax.f32 %v8716_v29, 0.0 }
 0x200   : > { %v2958_v49 = vpack.c.bf16 %v2914_v42, %v2910_v34  ;;  %v11529_v50 = vpack.c.bf16 %v2916_v43, %v2912_v41  ;;  %v9639_v41 = vld [vmem:[%s13275_s4 + $0x1a0] ss:$8 sps:$4 sm:$0xff]  }
 0x201   : > { %v2959_v52 = vpack.c.bf16 %v2915_v47, %v2911_v45  ;;  %v11531_v54 = vpack.c.bf16 %v2917_v48, %v2913_v46  ;;  %v2397_v56 = vpop.f32.mrb[20].mxu0  ;;  %v2849_v57 = vpop.f32.mrb[20].mxu1  ;;  %3498 = vmatpush1.bf16.msra.mxu0 %v9630_v30  ;;  %v9644_v46 = vld [vmem:[%s13275_s4 + $0x1b4] ss:$8 sps:$4 sm:$0xff]  }
 0x202   : > { %v8685_v59 = vadd.f32 %v2397_v56, %v11384_v37  ;;  %v8717_v60 = vadd.f32 %v2849_v57, %v11387_v38  ;;  %v2399_v61 = vpop.f32.mrb[21].mxu0  ;;  %v2851_v62 = vpop.f32.mrb[21].mxu1  ;;  %3499 = vmatprep.subr.bf16.mxu0 %v9635_v44 }
 0x203   : > { %v8686_v0 = vadd.f32 %v2399_v61, %v11390_v39  ;;  %v8718_v1 = vadd.f32 %v2851_v62, %v11393_v40  ;;  %v2401_v2 = vpop.f32.mrb[22].mxu0  ;;  %v2853_v3 = vpop.f32.mrb[22].mxu1  ;;  %3442 = vmatprep.mubr.bf16.mxu0 %v2959_v52  ;;  %v9642_v62 = vld [vmem:[%s13275_s4 + $0x1b0] ss:$8 sps:$4 sm:$0xff]  }
 0x204   : > { %v8687_v4 = vadd.f32 %v2401_v2, %v11384_v37  ;;  %v8719_v7 = vadd.f32 %v2853_v3, %v11387_v38  ;;  %v2403_v10 = vpop.f32.mrb[23].mxu0  ;;  %v2855_v11 = vpop.f32.mrb[23].mxu1  ;;  %3443 = vmatmul.mubr.bf16.gmra.mrb[48].mxu0 %v2958_v49  ;;  %v2918_v15 = vmax.f32 %v8685_v59, 0.0  ;;  %v2920_v16 = vmax.f32 %v8717_v60, 0.0  ;;  %v9647_v3 = vld [vmem:[%s13275_s4 + $0x1c4] ss:$8 sps:$4 sm:$0xff]  }
 0x205   : > { %v8688_v12 = vadd.f32 %v2403_v10, %v11390_v39  ;;  %v8720_v13 = vadd.f32 %v2855_v11, %v11393_v40  ;;  %3500 = vmatpush1.bf16.msra.mxu0 %v9633_v58  ;;  %v2919_v20 = vmax.f32 %v8686_v0, 0.0  ;;  %v2921_v21 = vmax.f32 %v8718_v1, 0.0 }
 0x206   : > { %v2922_v17 = vmax.f32 %v8687_v4, 0.0  ;;  %v2924_v18 = vmax.f32 %v8719_v7, 0.0  ;;  %3501 = vmatprep.subr.bf16.mxu0 %v9638_v63 }
 0x207   : > { %v2923_v22 = vmax.f32 %v8688_v12, 0.0  ;;  %v2925_v23 = vmax.f32 %v8720_v13, 0.0 }
 0x208   : > { %v2962_v24 = vpack.c.bf16 %v2922_v17, %v2918_v15  ;;  %v11553_v26 = vpack.c.bf16 %v2924_v18, %v2920_v16  ;;  %v9645_v18 = vld [vmem:[%s13275_s4 + $0x1c0] ss:$8 sps:$4 sm:$0xff]  }
 0x209   : > { %v2963_v28 = vpack.c.bf16 %v2923_v22, %v2919_v20  ;;  %v11555_v29 = vpack.c.bf16 %v2925_v23, %v2921_v21  ;;  %v2407_v30 = vpop.f32.mrb[24].mxu0  ;;  %v2859_v34 = vpop.f32.mrb[24].mxu1  ;;  %3502 = vmatpush1.bf16.msra.mxu0 %v9636_v14  ;;  %v9650_v23 = vld [vmem:[%s13275_s4 + $0x1d4] ss:$8 sps:$4 sm:$0xff]  }
 0x20a   : > { %v8689_v42 = vadd.f32 %v2407_v30, %v11384_v37  ;;  %v8721_v43 = vadd.f32 %v2859_v34, %v11387_v38  ;;  %v2409_v44 = vpop.f32.mrb[25].mxu0  ;;  %v2861_v45 = vpop.f32.mrb[25].mxu1  ;;  %3503 = vmatprep.subr.bf16.mxu0 %v9641_v19 }
 0x20b   : > { %v8690_v47 = vadd.f32 %v2409_v44, %v11390_v39  ;;  %v8722_v48 = vadd.f32 %v2861_v45, %v11393_v40  ;;  %v2411_v49 = vpop.f32.mrb[26].mxu0  ;;  %v2863_v52 = vpop.f32.mrb[26].mxu1  ;;  %3452 = vmatprep.mubr.bf16.mxu0 %v2963_v28 }
 0x20c   : > { %v8691_v56 = vadd.f32 %v2411_v49, %v11384_v37  ;;  %v8723_v57 = vadd.f32 %v2863_v52, %v11387_v38  ;;  %v2413_v58 = vpop.f32.mrb[27].mxu0  ;;  %v2865_v59 = vpop.f32.mrb[27].mxu1  ;;  %3453 = vmatmul.mubr.bf16.gmra.mrb[52].mxu0 %v2962_v24  ;;  %v2926_v63 = vmax.f32 %v8689_v42, 0.0  ;;  %v2928_v0 = vmax.f32 %v8721_v43, 0.0 }
 0x20d   : > { %v8692_v60 = vadd.f32 %v2413_v58, %v11390_v39  ;;  %v8724_v61 = vadd.f32 %v2865_v59, %v11393_v40  ;;  %3504 = vmatpush1.bf16.msra.mxu0 %v9639_v41  ;;  %v2927_v4 = vmax.f32 %v8690_v47, 0.0  ;;  %v2929_v7 = vmax.f32 %v8722_v48, 0.0  ;;  %v9648_v47 = vld [vmem:[%s13275_s4 + $0x1d0] ss:$8 sps:$4 sm:$0xff]  }
 0x20e   : > { %v2930_v1 = vmax.f32 %v8691_v56, 0.0  ;;  %v2932_v2 = vmax.f32 %v8723_v57, 0.0  ;;  %3505 = vmatprep.subr.bf16.mxu0 %v9644_v46 }
 0x20f   : > { %v2931_v10 = vmax.f32 %v8692_v60, 0.0  ;;  %v2933_v11 = vmax.f32 %v8724_v61, 0.0 }
 0x210   : > { %v2966_v12 = vpack.c.bf16 %v2930_v1, %v2926_v63  ;;  %v11577_v13 = vpack.c.bf16 %v2932_v2, %v2928_v0  ;;  %v9656_v63 = vld [vmem:[%s13275_s4 + $0x1f4] ss:$8 sps:$4 sm:$0xff]   ;;  %v9654_v0 = vld [vmem:[%s13275_s4 + $0x1f0] ss:$8 sps:$4 sm:$0xff]  }
 0x211   : > { %v2967_v14 = vpack.c.bf16 %v2931_v10, %v2927_v4  ;;  %v2969_v15 = vpack.c.bf16 %v2933_v11, %v2929_v7  ;;  %v2417_v16 = vpop.f32.mrb[28].mxu0  ;;  %v2869_v17 = vpop.f32.mrb[28].mxu1  ;;  %3506 = vmatpush1.bf16.msra.mxu0 %v9642_v62  ;;  %v9651_v62 = vld [vmem:[%s13275_s4 + $0x1e0] ss:$8 sps:$4 sm:$0xff]  }
 0x212   : > { %v8693_v19 = vadd.f32 %v2417_v16, %v11384_v37  ;;  %v8725_v20 = vadd.f32 %v2869_v17, %v11387_v38  ;;  %v2419_v21 = vpop.f32.mrb[29].mxu0  ;;  %v2871_v22 = vpop.f32.mrb[29].mxu1  ;;  %3507 = vmatprep.subr.bf16.mxu0 %v9647_v3 }
 0x213   : > { %v8694_v24 = vadd.f32 %v2419_v21, %v11390_v39  ;;  %v8726_v28 = vadd.f32 %v2871_v22, %v11393_v40  ;;  %v2421_v30 = vpop.f32.mrb[30].mxu0  ;;  %v2873_v34 = vpop.f32.mrb[30].mxu1  ;;  %3462 = vmatprep.mubr.bf16.mxu0 %v2967_v14  ;;  %v455_v22 = vld [vmem:[%s11658_s19] sm:$0xff] }
 0x214   : > { %v8695_v41 = vadd.f32 %v2421_v30, %v11384_v37  ;;  %v8727_v42 = vadd.f32 %v2873_v34, %v11387_v38  ;;  %v2423_v43 = vpop.f32.mrb[31].mxu0  ;;  %v2875_v44 = vpop.f32.mrb[31].mxu1  ;;  %3463 = vmatmul.mubr.bf16.gmra.mrb[56].mxu0 %v2966_v12  ;;  %v2934_v48 = vmax.f32 %v8693_v19, 0.0  ;;  %v2936_v49 = vmax.f32 %v8725_v20, 0.0  ;;  %v9653_v37 = vld [vmem:[%s13275_s4 + $0x1e4] ss:$8 sps:$4 sm:$0xff]  }
 0x215   : > { %v8696_v45 = vadd.f32 %v2423_v43, %v11390_v39  ;;  %v8728_v46 = vadd.f32 %v2875_v44, %v11393_v40  ;;  %3508 = vmatpush1.bf16.msra.mxu0 %v9645_v18  ;;  %v2935_v38 = vmax.f32 %v8694_v24, 0.0  ;;  %v2937_v57 = vmax.f32 %v8726_v28, 0.0  ;;  %v456_v34 = vld [vmem:[%s11658_s19 + $0x8] sm:$0xff] }
 0x216   : > { %v2938_v52 = vmax.f32 %v8695_v41, 0.0  ;;  %v2940_v56 = vmax.f32 %v8727_v42, 0.0  ;;  %3509 = vmatprep.subr.bf16.mxu0 %v9650_v23 }
 0x217   : > { %v2939_v58 = vmax.f32 %v8696_v45, 0.0  ;;  %v2941_v39 = vmax.f32 %v8728_v46, 0.0  ;;  %v9705_v46 = vld [vmem:[%s13279_s8] ss:$28 sps:$4 sm:$0xff]  }
 0x218   : > { %v2970_v59 = vpack.c.bf16 %v2938_v52, %v2934_v48  ;;  %v2972_v40 = vpack.c.bf16 %v2940_v56, %v2936_v49 }
 0x219   : > { %v2971_v60 = vpack.c.bf16 %v2939_v58, %v2935_v38  ;;  %v2973_v61 = vpack.c.bf16 %v2941_v39, %v2937_v57  ;;  %3510 = vmatpush1.bf16.msra.mxu0 %v9648_v47  ;;  %v9707_v47 = vld [vmem:[%s13279_s8 + $0x4] ss:$28 sps:$4 sm:$0xff]   ;;  %v9713_v57 = vld [vmem:[%s13279_s8 + $0x3c] ss:$28 sps:$4 sm:$0xff]  }
 0x21a   : > { %3511 = vmatprep.subr.bf16.mxu0 %v9653_v37 }
 0x21b   : > { %3472 = vmatprep.mubr.bf16.mxu0 %v2971_v60  ;;  %v9719_v60 = vld [vmem:[%s13279_s8 + $0x74] ss:$28 sps:$4 sm:$0xff]  }
 0x21c   : > { %3473 = vmatmul.mubr.bf16.gmra.mrb[60].mxu0 %v2970_v59  ;;  %v9711_v59 = vld [vmem:[%s13279_s8 + $0x38] ss:$28 sps:$4 sm:$0xff]  }
 0x21d   : > { %3512 = vmatpush1.bf16.msra.mxu0 %v9651_v62  ;;  %3515 = vmatprep.mubr.bf16.mxu0 %v11417_v9  ;;  %v9672_v9 = vld [vmem:[%s13277_s6 + $0xa0] ss:$16 sps:$4 sm:$0xff]  }
 0x21e   : > { %3513 = vmatprep.subr.bf16.mxu0 %v9656_v63  ;;  %v9681_v63 = vld [vmem:[%s13277_s6 + $0x8] ss:$16 sps:$4 sm:$0xff]  }
 0x221   : > { %3514 = vmatpush1.bf16.msra.mxu0 %v9654_v0  ;;  %v457_v0 = vld [vmem:[%s11658_s19 + $0x10] sm:$0xff] }
 0x222   : > { %5665 = vmatprep.subr.bf16.mxu0 %v9707_v47 }
 0x224   : > { %3516 = vmatmul.mubr.bf16.vlgmr.msra.gmra.mrb[32].mxu0 %v11412_v6  ;;  %v9674_v6 = vld [vmem:[%s13277_s6 + $0xa4] ss:$16 sps:$4 sm:$0xff]  }
 0x225   : > { %3525 = vmatprep.mubr.bf16.mxu0 %v11453_v55  ;;  %3908 = vmatprep.subr.bf16.mxu1 %v9674_v6  ;;  %v9675_v55 = vld [vmem:[%s13277_s6 + $0xc0] ss:$16 sps:$4 sm:$0xff]  }
 0x226   : > { %3909 = vmatpush1.bf16.msra.mxu1 %v9672_v9  ;;  %5666 = vmatpush1.bf16.msra.mxu0 %v9705_v46  ;;  %v9729_v46 = vld [vmem:[%s13279_s8 + $0xe0] ss:$28 sps:$4 sm:$0xff]  }
 0x227   : > { %5667 = vmatprep.subr.bf16.mxu0 %v9713_v57 }
 0x22a   : > { %5668 = vmatpush1.bf16.msra.mxu0 %v9711_v59  ;;  %v9695_v59 = vld [vmem:[%s13277_s6 + $0x8c] ss:$16 sps:$4 sm:$0xff]  }
 0x22b   : > { %5669 = vmatprep.subr.bf16.mxu0 %v9719_v60 }
 0x22c   : > { %3526 = vmatmul.mubr.bf16.gmra.mrb[36].mxu0 %v11448_v51  ;;  %v9677_v51 = vld [vmem:[%s13277_s6 + $0xc4] ss:$16 sps:$4 sm:$0xff]  }
 0x22d   : > { %3535 = vmatprep.mubr.bf16.mxu0 %v11483_v27  ;;  %3910 = vmatprep.subr.bf16.mxu1 %v9677_v51  ;;  %v9678_v27 = vld [vmem:[%s13277_s6 + $0xe0] ss:$16 sps:$4 sm:$0xff]   ;;  %v9686_v51 = vld [vmem:[%s13277_s6 + $0x2c] ss:$16 sps:$4 sm:$0xff]  }
 0x22e   : > { %3911 = vmatpush1.bf16.msra.mxu1 %v9675_v55 }
 0x234   : > { %3536 = vmatmul.mubr.bf16.gmra.mrb[40].mxu0 %v11481_v25  ;;  %v9680_v25 = vld [vmem:[%s13277_s6 + $0xe4] ss:$16 sps:$4 sm:$0xff]  }
 0x235   : > { %3545 = vmatprep.mubr.bf16.mxu0 %v11507_v8  ;;  %3912 = vmatprep.subr.bf16.mxu1 %v9680_v25  ;;  %v3038_v8 = vld [vmem:[%s13276_s5] sm:$0x3] }
 0x236   : > { %3913 = vmatpush1.bf16.msra.mxu1 %v9678_v27  ;;  %v11661_v21 = vrot.slane %v3038_v8, %v11369_v32 }
 0x23c   : > { %3546 = vmatmul.mubr.bf16.gmra.mrb[44].mxu0 %v11505_v5  ;;  %v9683_v5 = vld [vmem:[%s13277_s6 + $0xc] ss:$16 sps:$4 sm:$0xff]  }
 0x23d   : > { %3555 = vmatprep.mubr.bf16.mxu0 %v11531_v54  ;;  %4011 = vmatprep.subr.bf16.mxu1 %v9683_v5  ;;  %v458_v5 = vld [vmem:[%s11658_s19 + $0x18] sm:$0xff] }
 0x244   : > { %3556 = vmatmul.mubr.bf16.gmra.mrb[48].mxu0 %v11529_v50  ;;  %v11646_v50 = vrot.slane %v3038_v8, %v11378_v35  ;;  %v9717_v8 = vld [vmem:[%s13279_s8 + $0x70] ss:$28 sps:$4 sm:$0xff]  }
 0x245   : > { %3565 = vmatprep.mubr.bf16.mxu0 %v11555_v29  ;;  %5670 = vmatpush1.bf16.msra.mxu0 %v9717_v8  ;;  %v9698_v8 = vld [vmem:[%s13277_s6 + $0xac] ss:$16 sps:$4 sm:$0xff]  }
 0x24c   : > { %3566 = vmatmul.mubr.bf16.gmra.mrb[52].mxu0 %v11553_v26 }
 0x24d   : > { %3575 = vmatprep.mubr.bf16.mxu0 %v2969_v15 }
 0x254   : > { %3576 = vmatmul.mubr.bf16.gmra.mrb[56].mxu0 %v11577_v13 }
 0x255   : > { %3585 = vmatprep.mubr.bf16.mxu0 %v2973_v61 }
 0x25c   : > { %3586 = vmatmul.mubr.bf16.gmra.mrb[60].mxu0 %v2972_v40 }
 0x2f7   : > { %v3517_v54 = vpop.f32.mrb[32].mxu0 }
 0x2f8   : > { %v3519_v26 = vpop.f32.mrb[33].mxu0  ;;  %v8729_v43 = vadd.f32 %v3517_v54, %v11661_v21 }
 0x2f9   : > { %v8730_v29 = vadd.f32 %v3519_v26, %v11646_v50  ;;  %v3521_v1 = vpop.f32.mrb[34].mxu0 }
 0x2fa   : > { %v3523_v2 = vpop.f32.mrb[35].mxu0  ;;  %v8731_v56 = vadd.f32 %v3521_v1, %v11661_v21  ;;  %v9725_v1 = vld [vmem:[%s13279_s8 + $0xac] ss:$28 sps:$4 sm:$0xff]  }
 0x2fb   : > { %v3596_v3 = vmul.f32 0.5, %v8730_v29  ;;  %v8732_v4 = vadd.f32 %v3523_v2, %v11646_v50  ;;  %5671 = vmatprep.subr.bf16.mxu0 %v9725_v1  ;;  %v462_v1 = vld [vmem:[%s11658_s19 + $0x38] sm:$0xff] }
 0x2fd   : > { %v3612_v7 = vmul.f32 1.442695, %v3596_v3  ;;  %v3597_v10 = vmul.f32 0.5, %v8732_v4 }
 0x2ff   : > { %10025 = vpow2.f32 %v3612_v7  ;;  %v3614_v11 = vmul.f32 1.442695, %v3597_v10  ;;  %v3527_v12 = vpop.f32.mrb[36].mxu0  ;;  %v9684_v7 = vld [vmem:[%s13277_s6 + $0x28] ss:$16 sps:$4 sm:$0xff]  }
 0x300   : > { %v3529_v13 = vpop.f32.mrb[37].mxu0  ;;  %v8733_v54 = vadd.f32 %v3527_v12, %v11661_v21 }
 0x301   : > { %10027 = vpow2.f32 %v3614_v11  ;;  %v8734_v14 = vadd.f32 %v3529_v13, %v11646_v50  ;;  %v11652_v15 = vpop.f32.mrb[38].mxu0  ;;  %v9689_v13 = vld [vmem:[%s13277_s6 + $0x4c] ss:$16 sps:$4 sm:$0xff]  }
 0x302   : > { %v3533_v16 = vpop.f32.mrb[39].mxu0  ;;  %v8735_v10 = vadd.f32 %v11652_v15, %v11661_v21  ;;  %v9731_v15 = vld [vmem:[%s13279_s8 + $0xe4] ss:$28 sps:$4 sm:$0xff]  }
 0x303   : > { %v3598_v17 = vmul.f32 0.5, %v8734_v14  ;;  %v8736_v18 = vadd.f32 %v3533_v16, %v11646_v50 }
 0x305   : > { %v3616_v19 = vmul.f32 1.442695, %v3598_v17  ;;  %v3599_v20 = vmul.f32 0.5, %v8736_v18  ;;  %v9723_v17 = vld [vmem:[%s13279_s8 + $0xa8] ss:$28 sps:$4 sm:$0xff]  }
 0x306   : > { %5672 = vmatpush1.bf16.msra.mxu0 %v9723_v17 }
 0x307   : > { %10029 = vpow2.f32 %v3616_v19  ;;  %v3618_v23 = vmul.f32 1.442695, %v3599_v20  ;;  %v11664_v24 = vpop.f32.mrb[40].mxu0  ;;  %5673 = vmatprep.subr.bf16.mxu0 %v9731_v15 }
 0x308   : > { %v3539_v28 = vpop.f32.mrb[41].mxu0  ;;  %v8737_v47 = vadd.f32 %v11664_v24, %v11661_v21  ;;  %v9690_v24 = vld [vmem:[%s13277_s6 + $0x68] ss:$16 sps:$4 sm:$0xff]  }
 0x309   : > { %v10026_v30 = vpop.eup %10025  ;;  %10031 = vpow2.f32 %v3618_v23  ;;  %v8738_v41 = vadd.f32 %v3539_v28, %v11646_v50  ;;  %v11668_v42 = vpop.f32.mrb[42].mxu0  ;;  %v9687_v23 = vld [vmem:[%s13277_s6 + $0x48] ss:$16 sps:$4 sm:$0xff]  }
 0x30a   : > { %v3644_v44 = vmul.f32 %v10026_v30, %v455_v22  ;;  %v3543_v45 = vpop.f32.mrb[43].mxu0  ;;  %v459_v22 = vld [vmem:[%s11658_s19 + $0x20] sm:$0xff]  ;;  %v8739_v57 = vadd.f32 %v11668_v42, %v11661_v21  ;;  %5674 = vmatpush1.bf16.msra.mxu0 %v9729_v46  ;;  %v9743_v42 = vld [vmem:[%s13279_s8 + $0x154] ss:$28 sps:$4 sm:$0xff]  }
 0x30b   : > { %v10028_v48 = vpop.eup %10027  ;;  %v3600_v49 = vmul.f32 0.5, %v8738_v41  ;;  %v8740_v52 = vadd.f32 %v3543_v45, %v11646_v50  ;;  %v460_v45 = vld [vmem:[%s11658_s19 + $0x28] sm:$0xff] }
 0x30c   : > { %v3645_v37 = vmul.f32 %v10028_v48, %v456_v34  ;;  %v3660_v38 = vadd.f32 %v8729_v43, %v3644_v44  ;;  %v9692_v34 = vld [vmem:[%s13277_s6 + $0x6c] ss:$16 sps:$4 sm:$0xff]  }
 0x30d   : > { %v3620_v58 = vmul.f32 1.442695, %v3600_v49  ;;  %v3601_v39 = vmul.f32 0.5, %v8740_v52  ;;  %v9737_v52 = vld [vmem:[%s13279_s8 + $0x11c] ss:$28 sps:$4 sm:$0xff]  }
 0x30e   : > { %v3661_v40 = vadd.f32 %v8731_v56, %v3645_v37  ;;  %5675 = vmatprep.subr.bf16.mxu0 %v9737_v52 }
 0x30f   : > { %10033 = vpow2.f32 %v3620_v58  ;;  %v3622_v61 = vmul.f32 1.442695, %v3601_v39  ;;  %v11688_v62 = vpop.f32.mrb[44].mxu0 }
 0x310   : > { %v3549_v6 = vpop.f32.mrb[45].mxu0  ;;  %v11694_v9 = vpack.c.bf16 %v3661_v40, %v3660_v38 }
 0x311   : > { %v10030_v55 = vpop.eup %10029  ;;  %10035 = vpow2.f32 %v3622_v61  ;;  %v8742_v25 = vadd.f32 %v3549_v6, %v11646_v50  ;;  %v11700_v27 = vpop.f32.mrb[46].mxu0  ;;  %v9735_v61 = vld [vmem:[%s13279_s8 + $0x118] ss:$28 sps:$4 sm:$0xff]  }
 0x312   : > { %v3553_v26 = vpop.f32.mrb[47].mxu0  ;;  %3931 = vmatmul.mubr.bf16.vlgmr.msra.gmra.mrb[32].mxu1 %v11694_v9  ;;  %v3646_v29 = vmul.f32 %v10030_v55, %v457_v0  ;;  %v9693_v55 = vld [vmem:[%s13277_s6 + $0x88] ss:$16 sps:$4 sm:$0xff]   ;;  %5676 = vmatpush1.bf16.msra.mxu0 %v9735_v61 }
 0x313   : > { %v10032_v2 = vpop.eup %10031  ;;  %v3602_v3 = vmul.f32 0.5, %v8742_v25  ;;  %v8744_v4 = vadd.f32 %v3553_v26, %v11646_v50  ;;  %4012 = vmatpush1.bf16.msra.mxu1 %v9681_v63  ;;  %3940 = vmatprep.mubr.bf16.mxu1 %v10514_v53 }
 0x314   : > { %v3647_v11 = vmul.f32 %v10032_v2, %v458_v5  ;;  %v3662_v12 = vadd.f32 %v8733_v54, %v3646_v29  ;;  %4013 = vmatprep.subr.bf16.mxu1 %v9686_v51  ;;  %v461_v51 = vld [vmem:[%s11658_s19 + $0x30] sm:$0xff]  ;;  %5677 = vmatprep.subr.bf16.mxu0 %v9743_v42  ;;  %v9710_v42 = vld [vmem:[%s13279_s8 + $0xc] ss:$28 sps:$4 sm:$0xff]  }
 0x315   : > { %v3624_v14 = vmul.f32 1.442695, %v3602_v3  ;;  %v3603_v16 = vmul.f32 0.5, %v8744_v4  ;;  %v9741_v2 = vld [vmem:[%s13279_s8 + $0x150] ss:$28 sps:$4 sm:$0xff]   ;;  %v8741_v3 = vadd.f32 %v11688_v62, %v11661_v21 }
 0x316   : > { %v3663_v18 = vadd.f32 %v8735_v10, %v3647_v11  ;;  %v9749_v10 = vld [vmem:[%s13279_s8 + $0x18c] ss:$28 sps:$4 sm:$0xff]   ;;  %5678 = vmatpush1.bf16.msra.mxu0 %v9741_v2 }
 0x317   : > { %10037 = vpow2.f32 %v3624_v14  ;;  %v3626_v19 = vmul.f32 1.442695, %v3603_v16  ;;  %v11727_v20 = vpop.f32.mrb[48].mxu0  ;;  %4014 = vmatpush1.bf16.msra.mxu1 %v9684_v7  ;;  %v9696_v62 = vld [vmem:[%s13277_s6 + $0xa8] ss:$16 sps:$4 sm:$0xff]   ;;  %v8743_v14 = vadd.f32 %v11700_v27, %v11661_v21  ;;  %5679 = vmatprep.subr.bf16.mxu0 %v9749_v10 }
 0x318   : > { %v3559_v28 = vpop.f32.mrb[49].mxu0  ;;  %v11733_v30 = vpack.c.bf16 %v3663_v18, %v3662_v12  ;;  %4015 = vmatprep.subr.bf16.mxu1 %v9689_v13  ;;  %v9701_v18 = vld [vmem:[%s13277_s6 + $0xcc] ss:$16 sps:$4 sm:$0xff]   ;;  %v9755_v27 = vld [vmem:[%s13279_s8 + $0x1c4] ss:$28 sps:$4 sm:$0xff]  }
 0x319   : > { %v10034_v41 = vpop.eup %10033  ;;  %10039 = vpow2.f32 %v3626_v19  ;;  %v8746_v43 = vadd.f32 %v3559_v28, %v11646_v50  ;;  %v11739_v44 = vpop.f32.mrb[50].mxu0  ;;  %v466_v10 = vld [vmem:[%s11658_s19 + $0x58] sm:$0xff] }
 0x31a   : > { %v3563_v48 = vpop.f32.mrb[51].mxu0  ;;  %3941 = vmatmul.mubr.bf16.gmra.mrb[36].mxu1 %v11733_v30  ;;  %v3648_v49 = vmul.f32 %v10034_v41, %v459_v22  ;;  %v9747_v22 = vld [vmem:[%s13279_s8 + $0x188] ss:$28 sps:$4 sm:$0xff]  }
 0x31b   : > { %v10036_v56 = vpop.eup %10035  ;;  %v3604_v37 = vmul.f32 0.5, %v8746_v43  ;;  %v8748_v38 = vadd.f32 %v3563_v48, %v11646_v50  ;;  %3950 = vmatprep.mubr.bf16.mxu1 %v10514_v53  ;;  %4016 = vmatpush1.bf16.msra.mxu1 %v9687_v23  ;;  %v463_v41 = vld [vmem:[%s11658_s19 + $0x40] sm:$0xff]  ;;  %v9699_v43 = vld [vmem:[%s13277_s6 + $0xc8] ss:$16 sps:$4 sm:$0xff]  }
 0x31c   : > { %v3649_v58 = vmul.f32 %v10036_v56, %v460_v45  ;;  %v3664_v39 = vadd.f32 %v8737_v47, %v3648_v49  ;;  %4017 = vmatprep.subr.bf16.mxu1 %v9692_v34  ;;  %v9704_v47 = vld [vmem:[%s13277_s6 + $0xec] ss:$16 sps:$4 sm:$0xff]   ;;  %5680 = vmatpush1.bf16.msra.mxu0 %v9747_v22 }
 0x31d   : > { %v3628_v40 = vmul.f32 1.442695, %v3604_v37  ;;  %v3605_v60 = vmul.f32 0.5, %v8748_v38  ;;  %v464_v56 = vld [vmem:[%s11658_s19 + $0x48] sm:$0xff]  ;;  %v9753_v37 = vld [vmem:[%s13279_s8 + $0x1c0] ss:$28 sps:$4 sm:$0xff]   ;;  %v8745_v38 = vadd.f32 %v11727_v20, %v11661_v21  ;;  %5681 = vmatprep.subr.bf16.mxu0 %v9755_v27 }
 0x31e   : > { %v3665_v63 = vadd.f32 %v8739_v57, %v3649_v58  ;;  %v9761_v58 = vld [vmem:[%s13279_s8 + $0x1fc] ss:$28 sps:$4 sm:$0xff]   ;;  %v9771_v27 = vld [vmem:[%s13279_s8 + $0x268] ss:$28 sps:$4 sm:$0xff]  }
 0x31f   : > { %10041 = vpow2.f32 %v3628_v40  ;;  %v3630_v0 = vmul.f32 1.442695, %v3605_v60  ;;  %v11767_v6 = vpop.f32.mrb[52].mxu0  ;;  %4018 = vmatpush1.bf16.msra.mxu1 %v9690_v24  ;;  %v9702_v20 = vld [vmem:[%s13277_s6 + $0xe8] ss:$16 sps:$4 sm:$0xff]   ;;  %v8747_v60 = vadd.f32 %v11739_v44, %v11661_v21 }
 0x320   : > { %v3569_v25 = vpop.f32.mrb[53].mxu0  ;;  %v11773_v5 = vpack.c.bf16 %v3665_v63, %v3664_v39  ;;  %4019 = vmatprep.subr.bf16.mxu1 %v9695_v59  ;;  %5682 = vmatpush1.bf16.msra.mxu0 %v9753_v37  ;;  %v9767_v44 = vld [vmem:[%s13279_s8 + $0x234] ss:$28 sps:$4 sm:$0xff]   ;;  %v9785_v37 = vld [vmem:[%s13279_s8 + $0x2dc] ss:$28 sps:$4 sm:$0xff]  }
 0x321   : > { %v10038_v54 = vpop.eup %10037  ;;  %10043 = vpow2.f32 %v3630_v0  ;;  %v8750_v26 = vadd.f32 %v3569_v25, %v11646_v50  ;;  %v11779_v29 = vpop.f32.mrb[54].mxu0  ;;  %5683 = vmatprep.subr.bf16.mxu0 %v9761_v58 }
 0x322   : > { %v3573_v4 = vpop.f32.mrb[55].mxu0  ;;  %3951 = vmatmul.mubr.bf16.gmra.mrb[40].mxu1 %v11773_v5  ;;  %v3650_v7 = vmul.f32 %v10038_v54, %v461_v51 }
 0x323   : > { %v10040_v11 = vpop.eup %10039  ;;  %v3606_v12 = vmul.f32 0.5, %v8750_v26  ;;  %v8752_v13 = vadd.f32 %v3573_v4, %v11646_v50  ;;  %3960 = vmatprep.mubr.bf16.mxu1 %v10514_v53  ;;  %4020 = vmatpush1.bf16.msra.mxu1 %v9693_v55  ;;  %v9759_v55 = vld [vmem:[%s13279_s8 + $0x1f8] ss:$28 sps:$4 sm:$0xff]  }
 0x324   : > { %v3651_v16 = vmul.f32 %v10040_v11, %v462_v1  ;;  %v3666_v17 = vadd.f32 %v8741_v3, %v3650_v7  ;;  %4021 = vmatprep.subr.bf16.mxu1 %v9698_v8  ;;  %v465_v26 = vld [vmem:[%s11658_s19 + $0x50] sm:$0xff]  ;;  %5684 = vmatpush1.bf16.msra.mxu0 %v9759_v55 }
 0x325   : > { %v3632_v15 = vmul.f32 1.442695, %v3606_v12  ;;  %v3607_v19 = vmul.f32 0.5, %v8752_v13  ;;  %v9765_v11 = vld [vmem:[%s13279_s8 + $0x230] ss:$28 sps:$4 sm:$0xff]   ;;  %v8749_v12 = vadd.f32 %v11767_v6, %v11661_v21  ;;  %5685 = vmatprep.subr.bf16.mxu0 %v9767_v44 }
 0x326   : > { %v3667_v23 = vadd.f32 %v8743_v14, %v3651_v16  ;;  %v9773_v14 = vld [vmem:[%s13279_s8 + $0x26c] ss:$28 sps:$4 sm:$0xff]  }
 0x327   : > { %10045 = vpow2.f32 %v3632_v15  ;;  %v3634_v28 = vmul.f32 1.442695, %v3607_v19  ;;  %v11807_v34 = vpop.f32.mrb[56].mxu0  ;;  %4022 = vmatpush1.bf16.msra.mxu1 %v9696_v62  ;;  %v8751_v15 = vadd.f32 %v11779_v29, %v11661_v21  ;;  %v9708_v44 = vld [vmem:[%s13279_s8 + $0x8] ss:$28 sps:$4 sm:$0xff]  }
 0x328   : > { %v3579_v45 = vpop.f32.mrb[57].mxu0  ;;  %v11813_v46 = vpack.c.bf16 %v3667_v23, %v3666_v17  ;;  %4023 = vmatprep.subr.bf16.mxu1 %v9701_v18  ;;  %5686 = vmatpush1.bf16.msra.mxu0 %v9765_v11  ;;  %v9791_v11 = vld [vmem:[%s13279_s8 + $0x314] ss:$28 sps:$4 sm:$0xff]  }
 0x329   : > { %v10042_v48 = vpop.eup %10041  ;;  %10047 = vpow2.f32 %v3634_v28  ;;  %v8754_v49 = vadd.f32 %v3579_v45, %v11646_v50  ;;  %v11819_v52 = vpop.f32.mrb[58].mxu0  ;;  %5687 = vmatprep.subr.bf16.mxu0 %v9773_v14  ;;  %v9750_v14 = vld [vmem:[%s13279_s8 + $0x190] ss:$28 sps:$4 sm:$0xff]  }
 0x32a   : > { %v3583_v24 = vpop.f32.mrb[59].mxu0  ;;  %3961 = vmatmul.mubr.bf16.gmra.mrb[44].mxu1 %v11813_v46  ;;  %v3652_v57 = vmul.f32 %v10042_v48, %v463_v41  ;;  %v9777_v48 = vld [vmem:[%s13279_s8 + $0x2a0] ss:$28 sps:$4 sm:$0xff]  }
 0x32b   : > { %v10044_v39 = vpop.eup %10043  ;;  %v3608_v59 = vmul.f32 0.5, %v8754_v49  ;;  %v8756_v40 = vadd.f32 %v3583_v24, %v11646_v50  ;;  %3970 = vmatprep.mubr.bf16.mxu1 %v10514_v53  ;;  %4024 = vmatpush1.bf16.msra.mxu1 %v9699_v43  ;;  %v467_v43 = vld [vmem:[%s11658_s19 + $0x60] sm:$0xff]  ;;  %v8753_v49 = vadd.f32 %v11807_v34, %v11661_v21  ;;  %v8755_v24 = vadd.f32 %v11819_v52, %v11661_v21  ;;  %v9783_v34 = vld [vmem:[%s13279_s8 + $0x2d8] ss:$28 sps:$4 sm:$0xff]  }
 0x32c   : > { %v3653_v61 = vmul.f32 %v10044_v39, %v464_v56  ;;  %v3668_v63 = vadd.f32 %v8745_v38, %v3652_v57  ;;  %4025 = vmatprep.subr.bf16.mxu1 %v9704_v47  ;;  %v468_v47 = vld [vmem:[%s11658_s19 + $0x68] sm:$0xff]  ;;  %5688 = vmatpush1.bf16.msra.mxu0 %v9771_v27 }
 0x32d   : > { %v3636_v0 = vmul.f32 1.442695, %v3608_v59  ;;  %v3609_v51 = vmul.f32 0.5, %v8756_v40  ;;  %v469_v59 = vld [vmem:[%s11658_s19 + $0x70] sm:$0xff]  ;;  %v9782_v27 = vld [vmem:[%s13279_s8 + $0x2ac] ss:$28 sps:$4 sm:$0xff]  }
 0x32e   : > { %v3669_v25 = vadd.f32 %v8747_v60, %v3653_v61  ;;  %v470_v60 = vld [vmem:[%s11658_s19 + $0x78] sm:$0xff] }
 0x32f   : > { %10049 = vpow2.f32 %v3636_v0  ;;  %v3638_v8 = vmul.f32 1.442695, %v3609_v51  ;;  %v3587_v54 = vpop.f32.mrb[60].mxu0  ;;  %4026 = vmatpush1.bf16.msra.mxu1 %v9702_v20 }
 0x330   : > { %v3589_v1 = vpop.f32.mrb[61].mxu0  ;;  %v11848_v2 = vpack.c.bf16 %v3669_v25, %v3668_v63  ;;  %5891 = vmatprep.subr.bf16.mxu1 %v9710_v42  ;;  %v8757_v61 = vadd.f32 %v3587_v54, %v11661_v21  ;;  %v9722_v54 = vld [vmem:[%s13279_s8 + $0x7c] ss:$28 sps:$4 sm:$0xff]  }
 0x331   : > { %v10046_v3 = vpop.eup %10045  ;;  %10051 = vpow2.f32 %v3638_v8  ;;  %v8758_v4 = vadd.f32 %v3589_v1, %v11646_v50  ;;  %v3591_v7 = vpop.f32.mrb[62].mxu0  ;;  %v9716_v8 = vld [vmem:[%s13279_s8 + $0x44] ss:$28 sps:$4 sm:$0xff]   ;;  %v9726_v1 = vld [vmem:[%s13279_s8 + $0xb0] ss:$28 sps:$4 sm:$0xff]  }
 0x332   : > { %v3593_v13 = vpop.f32.mrb[63].mxu0  ;;  %3971 = vmatmul.mubr.bf16.gmra.mrb[48].mxu1 %v11848_v2  ;;  %v3654_v62 = vmul.f32 %v10046_v3, %v465_v26  ;;  %v8759_v42 = vadd.f32 %v3591_v7, %v11661_v21  ;;  %v9714_v21 = vld [vmem:[%s13279_s8 + $0x40] ss:$28 sps:$4 sm:$0xff]   ;;  %v9720_v26 = vld [vmem:[%s13279_s8 + $0x78] ss:$28 sps:$4 sm:$0xff]  }
 0x333   : > { %v10048_v16 = vpop.eup %10047  ;;  %v3610_v17 = vmul.f32 0.5, %v8758_v4  ;;  %v8760_v18 = vadd.f32 %v3593_v13, %v11646_v50  ;;  %3980 = vmatprep.mubr.bf16.mxu1 %v10514_v53  ;;  %v9779_v50 = vld [vmem:[%s13279_s8 + $0x2a4] ss:$28 sps:$4 sm:$0xff]   ;;  %v9734_v3 = vld [vmem:[%s13279_s8 + $0xec] ss:$28 sps:$4 sm:$0xff]  }
 0x334   : > { %v3655_v6 = vmul.f32 %v10048_v16, %v466_v10  ;;  %v3670_v19 = vadd.f32 %v8749_v12, %v3654_v62  ;;  %5689 = vmatprep.subr.bf16.mxu0 %v9779_v50  ;;  %v9732_v4 = vld [vmem:[%s13279_s8 + $0xe8] ss:$28 sps:$4 sm:$0xff]   ;;  %v9738_v7 = vld [vmem:[%s13279_s8 + $0x120] ss:$28 sps:$4 sm:$0xff]   ;;  %v9789_v12 = vld [vmem:[%s13279_s8 + $0x310] ss:$28 sps:$4 sm:$0xff]  }
 0x335   : > { %v3640_v22 = vmul.f32 1.442695, %v3610_v17  ;;  %v3611_v23 = vmul.f32 0.5, %v8760_v18  ;;  %5690 = vmatpush1.bf16.msra.mxu0 %v9777_v48  ;;  %v9746_v10 = vld [vmem:[%s13279_s8 + $0x15c] ss:$28 sps:$4 sm:$0xff]  }
 0x336   : > { %v3671_v28 = vadd.f32 %v8751_v15, %v3655_v6  ;;  %5691 = vmatprep.subr.bf16.mxu0 %v9785_v37  ;;  %v9752_v13 = vld [vmem:[%s13279_s8 + $0x194] ss:$28 sps:$4 sm:$0xff]   ;;  %v9797_v62 = vld [vmem:[%s13279_s8 + $0x34c] ss:$28 sps:$4 sm:$0xff]   ;;  %v9803_v17 = vld [vmem:[%s13279_s8 + $0x384] ss:$28 sps:$4 sm:$0xff]  }
 0x337   : > { %10053 = vpow2.f32 %v3640_v22  ;;  %v3642_v41 = vmul.f32 1.442695, %v3611_v23  ;;  %v9795_v16 = vld [vmem:[%s13279_s8 + $0x348] ss:$28 sps:$4 sm:$0xff]   ;;  %v9762_v6 = vld [vmem:[%s13279_s8 + $0x200] ss:$28 sps:$4 sm:$0xff]  }
 0x338   : > { %v11872_v29 = vpack.c.bf16 %v3671_v28, %v3670_v19  ;;  %v9756_v18 = vld [vmem:[%s13279_s8 + $0x1c8] ss:$28 sps:$4 sm:$0xff]   ;;  %v9770_v19 = vld [vmem:[%s13279_s8 + $0x23c] ss:$28 sps:$4 sm:$0xff]   ;;  %v9774_v23 = vld [vmem:[%s13279_s8 + $0x270] ss:$28 sps:$4 sm:$0xff]  }
 0x339   : > { %v10050_v45 = vpop.eup %10049  ;;  %10055 = vpow2.f32 %v3642_v41  ;;  %5692 = vmatpush1.bf16.msra.mxu0 %v9783_v34  ;;  %v9764_v15 = vld [vmem:[%s13279_s8 + $0x204] ss:$28 sps:$4 sm:$0xff]   ;;  %v9768_v22 = vld [vmem:[%s13279_s8 + $0x238] ss:$28 sps:$4 sm:$0xff]  }
 0x33a   : > { %3981 = vmatmul.mubr.bf16.gmra.mrb[52].mxu1 %v11872_v29  ;;  %v3656_v56 = vmul.f32 %v10050_v45, %v467_v43  ;;  %5693 = vmatprep.subr.bf16.mxu0 %v9791_v11  ;;  %v9780_v28 = vld [vmem:[%s13279_s8 + $0x2a8] ss:$28 sps:$4 sm:$0xff]   ;;  %v9786_v41 = vld [vmem:[%s13279_s8 + $0x2e0] ss:$28 sps:$4 sm:$0xff]   ;;  %v9798_v45 = vld [vmem:[%s13279_s8 + $0x350] ss:$28 sps:$4 sm:$0xff]  }
 0x33b   : > { %v10052_v38 = vpop.eup %10051  ;;  %3990 = vmatprep.mubr.bf16.mxu1 %v10514_v53  ;;  %v9788_v50 = vld [vmem:[%s13279_s8 + $0x2e4] ss:$28 sps:$4 sm:$0xff]   ;;  %v9794_v43 = vld [vmem:[%s13279_s8 + $0x31c] ss:$28 sps:$4 sm:$0xff]  }
 0x33c   : > { %v3657_v57 = vmul.f32 %v10052_v38, %v468_v47  ;;  %v3672_v58 = vadd.f32 %v8753_v49, %v3656_v56  ;;  %v9806_v47 = vld [vmem:[%s13279_s8 + $0x38c] ss:$28 sps:$4 sm:$0xff]   ;;  %v12031_v48 = vld [vmem:[%s13278_s7] sm:$0xf]  ;;  %v9818_v11 = vld [vmem:[%s13279_s8 + $0x3fc] ss:$28 sps:$4 sm:$0xff]  }
 0x33d   : > { %5694 = vmatpush1.bf16.msra.mxu0 %v9789_v12  ;;  %v12035_v49 = vrot.slane %v12031_v48, %v11369_v32  ;;  %v12039_v56 = vrot.slane %v12031_v48, %v11378_v35 }
 0x33e   : > { %v3673_v39 = vadd.f32 %v8755_v24, %v3657_v57  ;;  %5695 = vmatprep.subr.bf16.mxu0 %v9797_v62 }
 0x340   : > { %v11891_v40 = vpack.c.bf16 %v3673_v39, %v3672_v58 }
 0x341   : > { %v10054_v20 = vpop.eup %10053  ;;  %5696 = vmatpush1.bf16.msra.mxu0 %v9795_v16  ;;  %v9813_v16 = vld [vmem:[%s13279_s8 + $0x3f0] ss:$28 sps:$4 sm:$0xff]  }
 0x342   : > { %3991 = vmatmul.mubr.bf16.gmra.mrb[56].mxu1 %v11891_v40  ;;  %v3658_v52 = vmul.f32 %v10054_v20, %v469_v59  ;;  %5778 = vmatprep.subr.bf16.mxu0 %v9803_v17 }
 0x343   : > { %v10056_v63 = vpop.eup %10055  ;;  %4000 = vmatprep.mubr.bf16.mxu1 %v10514_v53 }
 0x344   : > { %v3659_v0 = vmul.f32 %v10056_v63, %v470_v60  ;;  %v3674_v51 = vadd.f32 %v8757_v61, %v3658_v52 }
 0x346   : > { %v3675_v55 = vadd.f32 %v8759_v42, %v3659_v0  ;;  %v9801_v0 = vld [vmem:[%s13279_s8 + $0x380] ss:$28 sps:$4 sm:$0xff]  }
 0x348   : > { %v11898_v25 = vpack.c.bf16 %v3675_v55, %v3674_v51  ;;  %v9804_v51 = vld [vmem:[%s13279_s8 + $0x388] ss:$28 sps:$4 sm:$0xff]  }
 0x34a   : > { %4001 = vmatmul.mubr.bf16.gmra.mrb[60].mxu1 %v11898_v25 }
 0x34b   : > { %4043 = vmatprep.mubr.bf16.mxu1 %v10514_v53 }
 0x352   : > { %4044 = vmatmul.mubr.bf16.vlgmr.msra.gmra.mrb[64].mxu1 %v11694_v9  ;;  %v9728_v9 = vld [vmem:[%s13279_s8 + $0xb4] ss:$28 sps:$4 sm:$0xff]  }
 0x353   : > { %4053 = vmatprep.mubr.bf16.mxu1 %v10514_v53  ;;  %5892 = vmatpush1.bf16.msra.mxu1 %v9708_v44  ;;  %v9809_v44 = vld [vmem:[%s13279_s8 + $0x3bc] ss:$28 sps:$4 sm:$0xff]  }
 0x354   : > { %5893 = vmatprep.subr.bf16.mxu1 %v9716_v8  ;;  %v9812_v8 = vld [vmem:[%s13279_s8 + $0x3c4] ss:$28 sps:$4 sm:$0xff]  }
 0x357   : > { %5894 = vmatpush1.bf16.msra.mxu1 %v9714_v21 }
 0x358   : > { %5895 = vmatprep.subr.bf16.mxu1 %v9722_v54 }
 0x35a   : > { %4054 = vmatmul.mubr.bf16.gmra.mrb[68].mxu1 %v11733_v30  ;;  %v9740_v30 = vld [vmem:[%s13279_s8 + $0x124] ss:$28 sps:$4 sm:$0xff]  }
 0x35b   : > { %4063 = vmatprep.mubr.bf16.mxu1 %v10514_v53  ;;  %5896 = vmatpush1.bf16.msra.mxu1 %v9720_v26 }
 0x35c   : > { %5897 = vmatprep.subr.bf16.mxu1 %v9728_v9 }
 0x35f   : > { %5898 = vmatpush1.bf16.msra.mxu1 %v9726_v1 }
 0x360   : > { %5899 = vmatprep.subr.bf16.mxu1 %v9734_v3  ;;  %v9807_v3 = vld [vmem:[%s13279_s8 + $0x3b8] ss:$28 sps:$4 sm:$0xff]  }
 0x362   : > { %4064 = vmatmul.mubr.bf16.gmra.mrb[72].mxu1 %v11773_v5  ;;  %v9744_v5 = vld [vmem:[%s13279_s8 + $0x158] ss:$28 sps:$4 sm:$0xff]  }
 0x363   : > { %4073 = vmatprep.mubr.bf16.mxu1 %v10514_v53  ;;  %5900 = vmatpush1.bf16.msra.mxu1 %v9732_v4  ;;  %v9810_v4 = vld [vmem:[%s13279_s8 + $0x3c0] ss:$28 sps:$4 sm:$0xff]  }
 0x364   : > { %5901 = vmatprep.subr.bf16.mxu1 %v9740_v30 }
 0x367   : > { %5902 = vmatpush1.bf16.msra.mxu1 %v9738_v7 }
 0x368   : > { %5903 = vmatprep.subr.bf16.mxu1 %v9746_v10  ;;  %v9815_v10 = vld [vmem:[%s13279_s8 + $0x3f4] ss:$28 sps:$4 sm:$0xff]  }
 0x36a   : > { %4074 = vmatmul.mubr.bf16.gmra.mrb[76].mxu1 %v11813_v46  ;;  %v9758_v46 = vld [vmem:[%s13279_s8 + $0x1cc] ss:$28 sps:$4 sm:$0xff]  }
 0x36b   : > { %4083 = vmatprep.mubr.bf16.mxu1 %v10514_v53  ;;  %5904 = vmatpush1.bf16.msra.mxu1 %v9744_v5 }
 0x36c   : > { %5905 = vmatprep.subr.bf16.mxu1 %v9752_v13 }
 0x36f   : > { %5906 = vmatpush1.bf16.msra.mxu1 %v9750_v14 }
 0x370   : > { %5907 = vmatprep.subr.bf16.mxu1 %v9758_v46  ;;  %v9816_v46 = vld [vmem:[%s13279_s8 + $0x3f8] ss:$28 sps:$4 sm:$0xff]  }
 0x372   : > { %4084 = vmatmul.mubr.bf16.gmra.mrb[80].mxu1 %v11848_v2  ;;  %v9776_v2 = vld [vmem:[%s13279_s8 + $0x274] ss:$28 sps:$4 sm:$0xff]  }
 0x373   : > { %4093 = vmatprep.mubr.bf16.mxu1 %v10514_v53  ;;  %5908 = vmatpush1.bf16.msra.mxu1 %v9756_v18 }
 0x374   : > { %5909 = vmatprep.subr.bf16.mxu1 %v9764_v15  ;;  %v9821_v15 = vld [vmem:[%s13279_s8 + $0x42c] ss:$28 sps:$4 sm:$0xff]  }
 0x377   : > { %5910 = vmatpush1.bf16.msra.mxu1 %v9762_v6  ;;  %v9824_v6 = vld [vmem:[%s13279_s8 + $0x434] ss:$28 sps:$4 sm:$0xff]  }
 0x378   : > { %5911 = vmatprep.subr.bf16.mxu1 %v9770_v19 }
 0x37a   : > { %4094 = vmatmul.mubr.bf16.gmra.mrb[84].mxu1 %v11872_v29  ;;  %v9792_v29 = vld [vmem:[%s13279_s8 + $0x318] ss:$28 sps:$4 sm:$0xff]  }
 0x37b   : > { %4103 = vmatprep.mubr.bf16.mxu1 %v10514_v53  ;;  %5912 = vmatpush1.bf16.msra.mxu1 %v9768_v22 }
 0x37c   : > { %5913 = vmatprep.subr.bf16.mxu1 %v9776_v2 }
 0x37f   : > { %5914 = vmatpush1.bf16.msra.mxu1 %v9774_v23 }
 0x380   : > { %5915 = vmatprep.subr.bf16.mxu1 %v9782_v27 }
 0x382   : > { %4104 = vmatmul.mubr.bf16.gmra.mrb[88].mxu1 %v11891_v40 }
 0x383   : > { %4113 = vmatprep.mubr.bf16.mxu1 %v10514_v53  ;;  %5916 = vmatpush1.bf16.msra.mxu1 %v9780_v28  ;;  %v9800_v53 = vld [vmem:[%s13279_s8 + $0x354] ss:$28 sps:$4 sm:$0xff]   ;;  %v9819_v28 = vld [vmem:[%s13279_s8 + $0x428] ss:$28 sps:$4 sm:$0xff]  }
 0x384   : > { %5917 = vmatprep.subr.bf16.mxu1 %v9788_v50  ;;  %v9822_v50 = vld [vmem:[%s13279_s8 + $0x430] ss:$28 sps:$4 sm:$0xff]  }
 0x387   : > { %5918 = vmatpush1.bf16.msra.mxu1 %v9786_v41 }
 0x388   : > { %5919 = vmatprep.subr.bf16.mxu1 %v9794_v43 }
 0x38a   : > { %4114 = vmatmul.mubr.bf16.gmra.mrb[92].mxu1 %v11898_v25 }
 0x38b   : > { %5920 = vmatpush1.bf16.msra.mxu1 %v9792_v29  ;;  %v9827_v29 = vld [vmem:[%s13279_s8 + $0x464] ss:$28 sps:$4 sm:$0xff]  }
 0x38c   : > { %5921 = vmatprep.subr.bf16.mxu1 %v9800_v53  ;;  %v9830_v53 = vld [vmem:[%s13279_s8 + $0x46c] ss:$28 sps:$4 sm:$0xff]  }
 0x38f   : > { %5922 = vmatpush1.bf16.msra.mxu1 %v9798_v45 }
 0x390   : > { %6004 = vmatprep.subr.bf16.mxu1 %v9806_v47 }
 0x3e5   : > { %v3932_v37 = vpop.f32.mrb[32].mxu1 }
 0x3e6   : > { %v3933_v38 = vadd.f32 %v3932_v37, %v12035_v49  ;;  %v3934_v24 = vpop.f32.mrb[33].mxu1 }
 0x3e7   : > { %v3935_v57 = vadd.f32 %v3934_v24, %v12039_v56  ;;  %v3936_v58 = vpop.f32.mrb[34].mxu1 }
 0x3e8   : > { %v3937_v34 = vadd.f32 %v3936_v58, %v12035_v49  ;;  %v3938_v39 = vpop.f32.mrb[35].mxu1  ;;  %v4124_v40 = vmax.f32 %v3933_v38, 0.0  ;;  %v9828_v58 = vld [vmem:[%s13279_s8 + $0x468] ss:$28 sps:$4 sm:$0xff]  }
 0x3e9   : > { %v3939_v59 = vadd.f32 %v3938_v39, %v12039_v56  ;;  %v4125_v60 = vmax.f32 %v3935_v57, 0.0  ;;  %v9825_v57 = vld [vmem:[%s13279_s8 + $0x460] ss:$28 sps:$4 sm:$0xff]  }
 0x3ea   : > { %v4128_v20 = vmax.f32 %v3937_v34, 0.0 }
 0x3eb   : > { %v4129_v61 = vmax.f32 %v3939_v59, 0.0  ;;  %v9833_v59 = vld [vmem:[%s13279_s8 + $0x49c] ss:$28 sps:$4 sm:$0xff]  }
 0x3ec   : > { %v12045_v52 = vpack.c.bf16 %v4128_v20, %v4124_v40  ;;  %v9836_v40 = vld [vmem:[%s13279_s8 + $0x4a4] ss:$28 sps:$4 sm:$0xff]  }
 0x3ed   : > { %v12047_v63 = vpack.c.bf16 %v4129_v61, %v4125_v60  ;;  %v3942_v42 = vpop.f32.mrb[36].mxu1 }
 0x3ee   : > { %v3943_v55 = vadd.f32 %v3942_v42, %v12035_v49  ;;  %v3944_v25 = vpop.f32.mrb[37].mxu1 }
 0x3ef   : > { %v3945_v21 = vadd.f32 %v3944_v25, %v12039_v56  ;;  %v3946_v54 = vpop.f32.mrb[38].mxu1  ;;  %5697 = vmatprep.mubr.bf16.mxu0 %v12047_v63  ;;  %5923 = vmatprep.mubr.bf16.mxu1 %v12047_v63 }
 0x3f0   : > { %v3947_v26 = vadd.f32 %v3946_v54, %v12035_v49  ;;  %v3948_v9 = vpop.f32.mrb[39].mxu1  ;;  %5698 = vmatmul.mubr.bf16.vlgmr.msra.gmra.mrb[64].mxu0 %v12045_v52  ;;  %5924 = vmatmul.mubr.bf16.vlgmr.msra.gmra.mrb[96].mxu1 %v12045_v52  ;;  %v4132_v30 = vmax.f32 %v3943_v55, 0.0  ;;  %v9834_v55 = vld [vmem:[%s13279_s8 + $0x4a0] ss:$28 sps:$4 sm:$0xff]  }
 0x3f1   : > { %v3949_v1 = vadd.f32 %v3948_v9, %v12039_v56  ;;  %5779 = vmatpush1.bf16.msra.mxu0 %v9801_v0  ;;  %6005 = vmatpush1.bf16.msra.mxu1 %v9804_v51  ;;  %v4133_v5 = vmax.f32 %v3945_v21, 0.0  ;;  %v9831_v51 = vld [vmem:[%s13279_s8 + $0x498] ss:$28 sps:$4 sm:$0xff]  }
 0x3f2   : > { %v4136_v7 = vmax.f32 %v3947_v26, 0.0  ;;  %5780 = vmatprep.subr.bf16.mxu0 %v9809_v44  ;;  %6006 = vmatprep.subr.bf16.mxu1 %v9812_v8  ;;  %v9839_v8 = vld [vmem:[%s13279_s8 + $0x4d4] ss:$28 sps:$4 sm:$0xff]   ;;  %v9842_v21 = vld [vmem:[%s13279_s8 + $0x4dc] ss:$28 sps:$4 sm:$0xff]  }
 0x3f3   : > { %v4137_v12 = vmax.f32 %v3949_v1, 0.0 }
 0x3f4   : > { %v12081_v13 = vpack.c.bf16 %v4136_v7, %v4132_v30  ;;  %v9840_v30 = vld [vmem:[%s13279_s8 + $0x4d8] ss:$28 sps:$4 sm:$0xff]  }
 0x3f5   : > { %v12083_v62 = vpack.c.bf16 %v4137_v12, %v4133_v5  ;;  %v3952_v14 = vpop.f32.mrb[40].mxu1  ;;  %5781 = vmatpush1.bf16.msra.mxu0 %v9807_v3  ;;  %6007 = vmatpush1.bf16.msra.mxu1 %v9810_v4  ;;  %v9837_v4 = vld [vmem:[%s13279_s8 + $0x4d0] ss:$28 sps:$4 sm:$0xff]  }
 0x3f6   : > { %v3953_v17 = vadd.f32 %v3952_v14, %v12035_v49  ;;  %v3954_v18 = vpop.f32.mrb[41].mxu1  ;;  %5782 = vmatprep.subr.bf16.mxu0 %v9815_v10  ;;  %6008 = vmatprep.subr.bf16.mxu1 %v9818_v11  ;;  %v9845_v11 = vld [vmem:[%s13279_s8 + $0x50c] ss:$28 sps:$4 sm:$0xff]   ;;  %v9848_v5 = vld [vmem:[%s13279_s8 + $0x514] ss:$28 sps:$4 sm:$0xff]  }
 0x3f7   : > { %v3955_v19 = vadd.f32 %v3954_v18, %v12039_v56  ;;  %v3956_v22 = vpop.f32.mrb[42].mxu1  ;;  %5707 = vmatprep.mubr.bf16.mxu0 %v12083_v62  ;;  %5933 = vmatprep.mubr.bf16.mxu1 %v12083_v62  ;;  %v9843_v18 = vld [vmem:[%s13279_s8 + $0x508] ss:$28 sps:$4 sm:$0xff]  }
 0x3f8   : > { %v3957_v2 = vadd.f32 %v3956_v22, %v12035_v49  ;;  %v3958_v23 = vpop.f32.mrb[43].mxu1  ;;  %5708 = vmatmul.mubr.bf16.gmra.mrb[68].mxu0 %v12081_v13  ;;  %5934 = vmatmul.mubr.bf16.gmra.mrb[100].mxu1 %v12081_v13  ;;  %v4140_v41 = vmax.f32 %v3953_v17, 0.0  ;;  %v9851_v22 = vld [vmem:[%s13279_s8 + $0x544] ss:$28 sps:$4 sm:$0xff]  }
 0x3f9   : > { %v3959_v27 = vadd.f32 %v3958_v23, %v12039_v56  ;;  %5783 = vmatpush1.bf16.msra.mxu0 %v9813_v16  ;;  %6009 = vmatpush1.bf16.msra.mxu1 %v9816_v46  ;;  %v4141_v45 = vmax.f32 %v3955_v19, 0.0 }
 0x3fa   : > { %v4144_v43 = vmax.f32 %v3957_v2, 0.0  ;;  %5784 = vmatprep.subr.bf16.mxu0 %v9821_v15  ;;  %6010 = vmatprep.subr.bf16.mxu1 %v9824_v6  ;;  %v9846_v15 = vld [vmem:[%s13279_s8 + $0x510] ss:$28 sps:$4 sm:$0xff]  }
 0x3fb   : > { %v4145_v47 = vmax.f32 %v3959_v27, 0.0  ;;  %v9854_v2 = vld [vmem:[%s13279_s8 + $0x54c] ss:$28 sps:$4 sm:$0xff]  }
 0x3fc   : > { %v12117_v37 = vpack.c.bf16 %v4144_v43, %v4140_v41  ;;  %v9849_v43 = vld [vmem:[%s13279_s8 + $0x540] ss:$28 sps:$4 sm:$0xff]  }
 0x3fd   : > { %v12119_v38 = vpack.c.bf16 %v4145_v47, %v4141_v45  ;;  %v3962_v24 = vpop.f32.mrb[44].mxu1  ;;  %5785 = vmatpush1.bf16.msra.mxu0 %v9819_v28  ;;  %6011 = vmatpush1.bf16.msra.mxu1 %v9822_v50  ;;  %v9857_v47 = vld [vmem:[%s13279_s8 + $0x57c] ss:$28 sps:$4 sm:$0xff]  }
 0x3fe   : > { %v3963_v34 = vadd.f32 %v3962_v24, %v12035_v49  ;;  %v3964_v39 = vpop.f32.mrb[45].mxu1  ;;  %5786 = vmatprep.subr.bf16.mxu0 %v9827_v29  ;;  %6012 = vmatprep.subr.bf16.mxu1 %v9830_v53  ;;  %v9852_v29 = vld [vmem:[%s13279_s8 + $0x548] ss:$28 sps:$4 sm:$0xff]  }
 0x3ff   : > { %v3965_v20 = vadd.f32 %v3964_v39, %v12039_v56  ;;  %v3966_v60 = vpop.f32.mrb[46].mxu1  ;;  %5717 = vmatprep.mubr.bf16.mxu0 %v12119_v38  ;;  %5943 = vmatprep.mubr.bf16.mxu1 %v12119_v38  ;;  %v9860_v24 = vld [vmem:[%s13279_s8 + $0x584] ss:$28 sps:$4 sm:$0xff]  }
 0x400   : > { %v3967_v61 = vadd.f32 %v3966_v60, %v12035_v49  ;;  %v3968_v42 = vpop.f32.mrb[47].mxu1  ;;  %5718 = vmatmul.mubr.bf16.gmra.mrb[72].mxu0 %v12117_v37  ;;  %5944 = vmatmul.mubr.bf16.gmra.mrb[104].mxu1 %v12117_v37  ;;  %v4148_v25 = vmax.f32 %v3963_v34, 0.0 }
 0x401   : > { %v3969_v0 = vadd.f32 %v3968_v42, %v12039_v56  ;;  %5787 = vmatpush1.bf16.msra.mxu0 %v9825_v57  ;;  %6013 = vmatpush1.bf16.msra.mxu1 %v9828_v58  ;;  %v4149_v54 = vmax.f32 %v3965_v20, 0.0  ;;  %v9858_v20 = vld [vmem:[%s13279_s8 + $0x580] ss:$28 sps:$4 sm:$0xff]   ;;  %v9863_v42 = vld [vmem:[%s13279_s8 + $0x5b4] ss:$28 sps:$4 sm:$0xff]  }
 0x402   : > { %v4152_v44 = vmax.f32 %v3967_v61, 0.0  ;;  %5788 = vmatprep.subr.bf16.mxu0 %v9833_v59  ;;  %6014 = vmatprep.subr.bf16.mxu1 %v9836_v40  ;;  %v9855_v40 = vld [vmem:[%s13279_s8 + $0x578] ss:$28 sps:$4 sm:$0xff]  }
 0x403   : > { %v4153_v26 = vmax.f32 %v3969_v0, 0.0  ;;  %v9866_v0 = vld [vmem:[%s13279_s8 + $0x5bc] ss:$28 sps:$4 sm:$0xff]  }
 0x404   : > { %v12153_v9 = vpack.c.bf16 %v4152_v44, %v4148_v25 }
 0x405   : > { %v12155_v1 = vpack.c.bf16 %v4153_v26, %v4149_v54  ;;  %v3972_v3 = vpop.f32.mrb[48].mxu1  ;;  %5789 = vmatpush1.bf16.msra.mxu0 %v9831_v51  ;;  %6015 = vmatpush1.bf16.msra.mxu1 %v9834_v55  ;;  %v9864_v54 = vld [vmem:[%s13279_s8 + $0x5b8] ss:$28 sps:$4 sm:$0xff]  }
 0x406   : > { %v3973_v7 = vadd.f32 %v3972_v3, %v12035_v49  ;;  %v3974_v10 = vpop.f32.mrb[49].mxu1  ;;  %5790 = vmatprep.subr.bf16.mxu0 %v9839_v8  ;;  %6016 = vmatprep.subr.bf16.mxu1 %v9842_v21  ;;  %v9861_v21 = vld [vmem:[%s13279_s8 + $0x5b0] ss:$28 sps:$4 sm:$0xff]  }
 0x407   : > { %v3975_v12 = vadd.f32 %v3974_v10, %v12039_v56  ;;  %v3976_v14 = vpop.f32.mrb[50].mxu1  ;;  %5727 = vmatprep.mubr.bf16.mxu0 %v12155_v1  ;;  %5953 = vmatprep.mubr.bf16.mxu1 %v12155_v1 }
 0x408   : > { %v3977_v16 = vadd.f32 %v3976_v14, %v12035_v49  ;;  %v3978_v46 = vpop.f32.mrb[51].mxu1  ;;  %5728 = vmatmul.mubr.bf16.gmra.mrb[76].mxu0 %v12153_v9  ;;  %5954 = vmatmul.mubr.bf16.gmra.mrb[108].mxu1 %v12153_v9  ;;  %v4156_v6 = vmax.f32 %v3973_v7, 0.0  ;;  %v9867_v14 = vld [vmem:[%s13279_s8 + $0x5e8] ss:$28 sps:$4 sm:$0xff]  }
 0x409   : > { %v3979_v17 = vadd.f32 %v3978_v46, %v12039_v56  ;;  %5791 = vmatpush1.bf16.msra.mxu0 %v9837_v4  ;;  %6017 = vmatpush1.bf16.msra.mxu1 %v9840_v30  ;;  %v4157_v23 = vmax.f32 %v3975_v12, 0.0  ;;  %v9869_v4 = vld [vmem:[%s13279_s8 + $0x5ec] ss:$28 sps:$4 sm:$0xff]   ;;  %v9872_v30 = vld [vmem:[%s13279_s8 + $0x5f4] ss:$28 sps:$4 sm:$0xff]  }
 0x40a   : > { %v4160_v19 = vmax.f32 %v3977_v16, 0.0  ;;  %5792 = vmatprep.subr.bf16.mxu0 %v9845_v11  ;;  %6018 = vmatprep.subr.bf16.mxu1 %v9848_v5  ;;  %v9870_v16 = vld [vmem:[%s13279_s8 + $0x5f0] ss:$28 sps:$4 sm:$0xff]  }
 0x40b   : > { %v4161_v27 = vmax.f32 %v3979_v17, 0.0 }
 0x40c   : > { %v12189_v28 = vpack.c.bf16 %v4160_v19, %v4156_v6 }
 0x40d   : > { %v12191_v50 = vpack.c.bf16 %v4161_v27, %v4157_v23  ;;  %v3982_v41 = vpop.f32.mrb[52].mxu1  ;;  %5793 = vmatpush1.bf16.msra.mxu0 %v9843_v18  ;;  %6019 = vmatpush1.bf16.msra.mxu1 %v9846_v15  ;;  %v9875_v18 = vld [vmem:[%s13279_s8 + $0x624] ss:$28 sps:$4 sm:$0xff]   ;;  %v9878_v15 = vld [vmem:[%s13279_s8 + $0x62c] ss:$28 sps:$4 sm:$0xff]  }
 0x40e   : > { %v3983_v53 = vadd.f32 %v3982_v41, %v12035_v49  ;;  %v3984_v45 = vpop.f32.mrb[53].mxu1  ;;  %5794 = vmatprep.subr.bf16.mxu0 %v9851_v22  ;;  %6020 = vmatprep.subr.bf16.mxu1 %v9854_v2  ;;  %v9873_v27 = vld [vmem:[%s13279_s8 + $0x620] ss:$28 sps:$4 sm:$0xff]   ;;  %v9876_v41 = vld [vmem:[%s13279_s8 + $0x628] ss:$28 sps:$4 sm:$0xff]  }
 0x40f   : > { %v3985_v57 = vadd.f32 %v3984_v45, %v12039_v56  ;;  %v3986_v58 = vpop.f32.mrb[54].mxu1  ;;  %5737 = vmatprep.mubr.bf16.mxu0 %v12191_v50  ;;  %5963 = vmatprep.mubr.bf16.mxu1 %v12191_v50  ;;  %v9884_v45 = vld [vmem:[%s13279_s8 + $0x664] ss:$28 sps:$4 sm:$0xff]  }
 0x410   : > { %v3987_v34 = vadd.f32 %v3986_v58, %v12035_v49  ;;  %v3988_v39 = vpop.f32.mrb[55].mxu1  ;;  %5738 = vmatmul.mubr.bf16.gmra.mrb[80].mxu0 %v12189_v28  ;;  %5964 = vmatmul.mubr.bf16.gmra.mrb[112].mxu1 %v12189_v28  ;;  %v4164_v60 = vmax.f32 %v3983_v53, 0.0  ;;  %v9881_v53 = vld [vmem:[%s13279_s8 + $0x65c] ss:$28 sps:$4 sm:$0xff]  }
 0x411   : > { %v3989_v59 = vadd.f32 %v3988_v39, %v12039_v56  ;;  %5795 = vmatpush1.bf16.msra.mxu0 %v9849_v43  ;;  %6021 = vmatpush1.bf16.msra.mxu1 %v9852_v29  ;;  %v4165_v51 = vmax.f32 %v3985_v57, 0.0  ;;  %v9879_v39 = vld [vmem:[%s13279_s8 + $0x658] ss:$28 sps:$4 sm:$0xff]  }
 0x412   : > { %v4168_v61 = vmax.f32 %v3987_v34, 0.0  ;;  %5796 = vmatprep.subr.bf16.mxu0 %v9857_v47  ;;  %6022 = vmatprep.subr.bf16.mxu1 %v9860_v24 }
 0x413   : > { %v4169_v55 = vmax.f32 %v3989_v59, 0.0  ;;  %v9882_v59 = vld [vmem:[%s13279_s8 + $0x660] ss:$28 sps:$4 sm:$0xff]  }
 0x414   : > { %v12225_v25 = vpack.c.bf16 %v4168_v61, %v4164_v60  ;;  %v9890_v60 = vld [vmem:[%s13279_s8 + $0x69c] ss:$28 sps:$4 sm:$0xff]  }
 0x415   : > { %v12227_v44 = vpack.c.bf16 %v4169_v55, %v4165_v51  ;;  %v3992_v8 = vpop.f32.mrb[56].mxu1  ;;  %5797 = vmatpush1.bf16.msra.mxu0 %v9855_v40  ;;  %6023 = vmatpush1.bf16.msra.mxu1 %v9858_v20 }
 0x416   : > { %v3993_v26 = vadd.f32 %v3992_v8, %v12035_v49  ;;  %v3994_v3 = vpop.f32.mrb[57].mxu1  ;;  %5798 = vmatprep.subr.bf16.mxu0 %v9863_v42  ;;  %6024 = vmatprep.subr.bf16.mxu1 %v9866_v0  ;;  %v12303_v0 = vrot.slane %v12031_v48, %v11381_v36 }
 0x417   : > { %v3995_v7 = vadd.f32 %v3994_v3, %v12039_v56  ;;  %v3996_v10 = vpop.f32.mrb[58].mxu1  ;;  %5747 = vmatprep.mubr.bf16.mxu0 %v12227_v44  ;;  %5973 = vmatprep.mubr.bf16.mxu1 %v12227_v44 }
 0x418   : > { %v3997_v11 = vadd.f32 %v3996_v10, %v12035_v49  ;;  %v3998_v5 = vpop.f32.mrb[59].mxu1  ;;  %5748 = vmatmul.mubr.bf16.gmra.mrb[84].mxu0 %v12225_v25  ;;  %5974 = vmatmul.mubr.bf16.gmra.mrb[116].mxu1 %v12225_v25  ;;  %v4172_v46 = vmax.f32 %v3993_v26, 0.0 }
 0x419   : > { %v3999_v12 = vadd.f32 %v3998_v5, %v12039_v56  ;;  %5799 = vmatpush1.bf16.msra.mxu0 %v9861_v21  ;;  %6025 = vmatpush1.bf16.msra.mxu1 %v9864_v54  ;;  %v4173_v6 = vmax.f32 %v3995_v7, 0.0  ;;  %v9885_v21 = vld [vmem:[%s13279_s8 + $0x690] ss:$28 sps:$4 sm:$0xff]   ;;  %v9888_v54 = vld [vmem:[%s13279_s8 + $0x698] ss:$28 sps:$4 sm:$0xff]  }
 0x41a   : > { %v4176_v17 = vmax.f32 %v3997_v11, 0.0  ;;  %5800 = vmatprep.subr.bf16.mxu0 %v9869_v4  ;;  %6026 = vmatprep.subr.bf16.mxu1 %v9872_v30  ;;  %v9896_v4 = vld [vmem:[%s13279_s8 + $0x6d4] ss:$28 sps:$4 sm:$0xff]  }
 0x41b   : > { %v4177_v19 = vmax.f32 %v3999_v12, 0.0  ;;  %v9891_v12 = vld [vmem:[%s13279_s8 + $0x6c8] ss:$28 sps:$4 sm:$0xff]  }
 0x41c   : > { %v12261_v22 = vpack.c.bf16 %v4176_v17, %v4172_v46  ;;  %v9899_v17 = vld [vmem:[%s13279_s8 + $0x14] ss:$28 sps:$4 sm:$0xff]  }
 0x41d   : > { %v12263_v2 = vpack.c.bf16 %v4177_v19, %v4173_v6  ;;  %v4002_v23 = vpop.f32.mrb[60].mxu1  ;;  %5801 = vmatpush1.bf16.msra.mxu0 %v9867_v14  ;;  %6027 = vmatpush1.bf16.msra.mxu1 %v9870_v16  ;;  %v9894_v14 = vld [vmem:[%s13279_s8 + $0x6d0] ss:$28 sps:$4 sm:$0xff]  }
 0x41e   : > { %v4003_v43 = vadd.f32 %v4002_v23, %v12035_v49  ;;  %v4004_v29 = vpop.f32.mrb[61].mxu1  ;;  %5802 = vmatprep.subr.bf16.mxu0 %v9875_v18  ;;  %6028 = vmatprep.subr.bf16.mxu1 %v9878_v15  ;;  %v9900_v18 = vld [vmem:[%s13279_s8 + $0x1d8] ss:$28 sps:$4 sm:$0xff]  }
 0x41f   : > { %v4005_v47 = vadd.f32 %v4004_v29, %v12039_v56  ;;  %v4006_v24 = vpop.f32.mrb[62].mxu1  ;;  %5757 = vmatprep.mubr.bf16.mxu0 %v12263_v2  ;;  %5983 = vmatprep.mubr.bf16.mxu1 %v12263_v2 }
 0x420   : > { %v4007_v57 = vadd.f32 %v4006_v24, %v12035_v49  ;;  %v4008_v58 = vpop.f32.mrb[63].mxu1  ;;  %5758 = vmatmul.mubr.bf16.gmra.mrb[88].mxu0 %v12261_v22  ;;  %5984 = vmatmul.mubr.bf16.gmra.mrb[120].mxu1 %v12261_v22  ;;  %v4180_v40 = vmax.f32 %v4003_v43, 0.0  ;;  %v12293_v49 = vrot.slane %v12031_v48, %v11372_v33  ;;  %v9893_v48 = vld [vmem:[%s13279_s8 + $0x6cc] ss:$28 sps:$4 sm:$0xff]   ;;  %v9901_v43 = vld [vmem:[%s13279_s8 + $0x18] ss:$28 sps:$4 sm:$0xff]  }
 0x421   : > { %v4009_v34 = vadd.f32 %v4008_v58, %v12039_v56  ;;  %5803 = vmatpush1.bf16.msra.mxu0 %v9873_v27  ;;  %6029 = vmatpush1.bf16.msra.mxu1 %v9876_v41  ;;  %v9887_v56 = vld [vmem:[%s13279_s8 + $0x694] ss:$28 sps:$4 sm:$0xff]   ;;  %v4181_v61 = vmax.f32 %v4005_v47, 0.0 }
 0x422   : > { %v4184_v20 = vmax.f32 %v4007_v57, 0.0  ;;  %5804 = vmatprep.subr.bf16.mxu0 %v9881_v53  ;;  %6030 = vmatprep.subr.bf16.mxu1 %v9884_v45  ;;  %v9897_v41 = vld [vmem:[%s13279_s8 + $0x10] ss:$28 sps:$4 sm:$0xff]  }
 0x423   : > { %v4185_v42 = vmax.f32 %v4009_v34, 0.0  ;;  %v9904_v45 = vld [vmem:[%s13279_s8 + $0x4c] ss:$28 sps:$4 sm:$0xff]  }
 0x424   : > { %v12305_v51 = vpack.c.bf16 %v4184_v20, %v4180_v40  ;;  %v9908_v47 = vld [vmem:[%s13279_s8 + $0x210] ss:$28 sps:$4 sm:$0xff]  }
 0x425   : > { %v12307_v55 = vpack.c.bf16 %v4185_v42, %v4181_v61  ;;  %v4045_v8 = vpop.f32.mrb[64].mxu1  ;;  %5805 = vmatpush1.bf16.msra.mxu0 %v9879_v39  ;;  %6031 = vmatpush1.bf16.msra.mxu1 %v9882_v59  ;;  %v9902_v59 = vld [vmem:[%s13279_s8 + $0x48] ss:$28 sps:$4 sm:$0xff]   ;;  %v9909_v40 = vld [vmem:[%s13279_s8 + $0x50] ss:$28 sps:$4 sm:$0xff]  }
 0x426   : > { %v4046_v26 = vadd.f32 %v4045_v8, %v12293_v49  ;;  %v4047_v3 = vpop.f32.mrb[65].mxu1  ;;  %5806 = vmatprep.subr.bf16.mxu0 %v9887_v56  ;;  %6032 = vmatprep.subr.bf16.mxu1 %v9890_v60  ;;  %v9907_v60 = vld [vmem:[%s13279_s8 + $0x84] ss:$28 sps:$4 sm:$0xff]  }
 0x427   : > { %v4048_v30 = vadd.f32 %v4047_v3, %v12303_v0  ;;  %v4049_v7 = vpop.f32.mrb[66].mxu1  ;;  %5767 = vmatprep.mubr.bf16.mxu0 %v12307_v55  ;;  %5993 = vmatprep.mubr.bf16.mxu1 %v12307_v55  ;;  %v9916_v61 = vld [vmem:[%s13279_s8 + $0x248] ss:$28 sps:$4 sm:$0xff]   ;;  %v9905_v3 = vld [vmem:[%s13279_s8 + $0x80] ss:$28 sps:$4 sm:$0xff]  }
 0x428   : > { %v4050_v10 = vadd.f32 %v4049_v7, %v12293_v49  ;;  %v4051_v11 = vpop.f32.mrb[67].mxu1  ;;  %5768 = vmatmul.mubr.bf16.gmra.mrb[92].mxu0 %v12305_v51  ;;  %5994 = vmatmul.mubr.bf16.gmra.mrb[124].mxu1 %v12305_v51  ;;  %v4126_v16 = vmax.f32 %v4046_v26, 0.0  ;;  %v9912_v7 = vld [vmem:[%s13279_s8 + $0xbc] ss:$28 sps:$4 sm:$0xff]  }
 0x429   : > { %v4052_v5 = vadd.f32 %v4051_v11, %v12303_v0  ;;  %5807 = vmatpush1.bf16.msra.mxu0 %v9885_v21  ;;  %6033 = vmatpush1.bf16.msra.mxu1 %v9888_v54  ;;  %v4127_v15 = vmax.f32 %v4048_v30, 0.0 }
 0x42a   : > { %v4130_v46 = vmax.f32 %v4050_v10, 0.0  ;;  %5808 = vmatprep.subr.bf16.mxu0 %v9893_v48  ;;  %6034 = vmatprep.subr.bf16.mxu1 %v9896_v4  ;;  %v9917_v48 = vld [vmem:[%s13279_s8 + $0x88] ss:$28 sps:$4 sm:$0xff]   ;;  %v9924_v10 = vld [vmem:[%s13279_s8 + $0x280] ss:$28 sps:$4 sm:$0xff]  }
 0x42b   : > { %v4131_v6 = vmax.f32 %v4052_v5, 0.0 }
 0x42c   : > { %v12341_v19 = vpack.c.bf16 %v4130_v46, %v4126_v16  ;;  %v9910_v46 = vld [vmem:[%s13279_s8 + $0xb8] ss:$28 sps:$4 sm:$0xff]  }
 0x42d   : > { %v12343_v23 = vpack.c.bf16 %v4131_v6, %v4127_v15  ;;  %v4055_v27 = vpop.f32.mrb[68].mxu1  ;;  %5809 = vmatpush1.bf16.msra.mxu0 %v9891_v12  ;;  %6035 = vmatpush1.bf16.msra.mxu1 %v9894_v14  ;;  %v9915_v6 = vld [vmem:[%s13279_s8 + $0xf4] ss:$28 sps:$4 sm:$0xff]  }
 0x42e   : > { %v4056_v29 = vadd.f32 %v4055_v27, %v12293_v49  ;;  %v4057_v53 = vpop.f32.mrb[69].mxu1  ;;  %6117 = vmatprep.subr.bf16.mxu0 %v9899_v17  ;;  %8537 = vmatprep.subr.bf16.mxu1 %v9900_v18  ;;  %v9925_v17 = vld [vmem:[%s13279_s8 + $0xc0] ss:$28 sps:$4 sm:$0xff]   ;;  %v9932_v27 = vld [vmem:[%s13279_s8 + $0x2b8] ss:$28 sps:$4 sm:$0xff]  }
 0x42f   : > { %v4058_v24 = vadd.f32 %v4057_v53, %v12303_v0  ;;  %v4059_v57 = vpop.f32.mrb[70].mxu1  ;;  %5810 = vmatprep.mubr.bf16.mxu0 %v12343_v23  ;;  %6036 = vmatprep.mubr.bf16.mxu1 %v12343_v23 }
 0x430   : > { %v4060_v58 = vadd.f32 %v4059_v57, %v12293_v49  ;;  %v4061_v34 = vpop.f32.mrb[71].mxu1  ;;  %5811 = vmatmul.mubr.bf16.vlgmr.msra.gmra.mrb[64].mxu0 %v12341_v19  ;;  %6037 = vmatmul.mubr.bf16.vlgmr.msra.gmra.mrb[96].mxu1 %v12341_v19  ;;  %v4134_v20 = vmax.f32 %v4056_v29, 0.0 }
 0x431   : > { %v4062_v39 = vadd.f32 %v4061_v34, %v12303_v0  ;;  %6118 = vmatpush1.bf16.msra.mxu0 %v9897_v41  ;;  %8538 = vmatpush3.bf16.msra.mxu1 %v9901_v43  ;;  %v4135_v42 = vmax.f32 %v4058_v24, 0.0  ;;  %v9933_v24 = vld [vmem:[%s13279_s8 + $0xf8] ss:$28 sps:$4 sm:$0xff]   ;;  %v9920_v34 = vld [vmem:[%s13279_s8 + $0x12c] ss:$28 sps:$4 sm:$0xff]  }
 0x432   : > { %v4138_v56 = vmax.f32 %v4060_v58, 0.0  ;;  %6119 = vmatprep.subr.bf16.mxu0 %v9904_v45  ;;  %8539 = vmatprep.subr.bf16.mxu1 %v9908_v47  ;;  %v9913_v47 = vld [vmem:[%s13279_s8 + $0xf0] ss:$28 sps:$4 sm:$0xff]  }
 0x433   : > { %v4139_v8 = vmax.f32 %v4062_v39, 0.0  ;;  %v9940_v39 = vld [vmem:[%s13279_s8 + $0x2f0] ss:$28 sps:$4 sm:$0xff]  }
 0x434   : > { %v12377_v21 = vpack.c.bf16 %v4138_v56, %v4134_v20 }
 0x435   : > { %v12379_v54 = vpack.c.bf16 %v4139_v8, %v4135_v42  ;;  %v4065_v26 = vpop.f32.mrb[72].mxu1  ;;  %6120 = vmatpush1.bf16.msra.mxu0 %v9902_v59  ;;  %8540 = vmatpush3.bf16.msra.mxu1 %v9909_v40  ;;  %v9941_v42 = vld [vmem:[%s13279_s8 + $0x130] ss:$28 sps:$4 sm:$0xff]  }
 0x436   : > { %v4066_v4 = vadd.f32 %v4065_v26, %v12293_v49  ;;  %v4067_v30 = vpop.f32.mrb[73].mxu1  ;;  %6121 = vmatprep.subr.bf16.mxu0 %v9907_v60  ;;  %8541 = vmatprep.subr.bf16.mxu1 %v9916_v61  ;;  %v9918_v61 = vld [vmem:[%s13279_s8 + $0x128] ss:$28 sps:$4 sm:$0xff]  }
 0x437   : > { %v4068_v11 = vadd.f32 %v4067_v30, %v12303_v0  ;;  %v4069_v5 = vpop.f32.mrb[74].mxu1  ;;  %5820 = vmatprep.mubr.bf16.mxu0 %v12379_v54  ;;  %6046 = vmatprep.mubr.bf16.mxu1 %v12379_v54 }
 0x438   : > { %v4070_v12 = vadd.f32 %v4069_v5, %v12293_v49  ;;  %v4071_v14 = vpop.f32.mrb[75].mxu1  ;;  %5821 = vmatmul.mubr.bf16.gmra.mrb[68].mxu0 %v12377_v21  ;;  %6047 = vmatmul.mubr.bf16.gmra.mrb[100].mxu1 %v12377_v21  ;;  %v4142_v18 = vmax.f32 %v4066_v4, 0.0  ;;  %v9921_v5 = vld [vmem:[%s13279_s8 + $0x160] ss:$28 sps:$4 sm:$0xff]  }
 0x439   : > { %v4072_v16 = vadd.f32 %v4071_v14, %v12303_v0  ;;  %6122 = vmatpush1.bf16.msra.mxu0 %v9905_v3  ;;  %8542 = vmatpush3.bf16.msra.mxu1 %v9917_v48  ;;  %v4143_v41 = vmax.f32 %v4068_v11, 0.0  ;;  %v9923_v3 = vld [vmem:[%s13279_s8 + $0x164] ss:$28 sps:$4 sm:$0xff]  }
 0x43a   : > { %v4146_v15 = vmax.f32 %v4070_v12, 0.0  ;;  %6123 = vmatprep.subr.bf16.mxu0 %v9912_v7  ;;  %8543 = vmatprep.subr.bf16.mxu1 %v9924_v10  ;;  %v9948_v48 = vld [vmem:[%s13279_s8 + $0x328] ss:$28 sps:$4 sm:$0xff]  }
 0x43b   : > { %v4147_v43 = vmax.f32 %v4072_v16, 0.0  ;;  %v9949_v12 = vld [vmem:[%s13279_s8 + $0x168] ss:$28 sps:$4 sm:$0xff]  }
 0x43c   : > { %v12413_v29 = vpack.c.bf16 %v4146_v15, %v4142_v18 }
 0x43d   : > { %v12415_v53 = vpack.c.bf16 %v4147_v43, %v4143_v41  ;;  %v4075_v45 = vpop.f32.mrb[76].mxu1  ;;  %6124 = vmatpush1.bf16.msra.mxu0 %v9910_v46  ;;  %8544 = vmatpush3.bf16.msra.mxu1 %v9925_v17  ;;  %v9928_v46 = vld [vmem:[%s13279_s8 + $0x19c] ss:$28 sps:$4 sm:$0xff]  }
 0x43e   : > { %v4076_v57 = vadd.f32 %v4075_v45, %v12293_v49  ;;  %v4077_v58 = vpop.f32.mrb[77].mxu1  ;;  %6125 = vmatprep.subr.bf16.mxu0 %v9915_v6  ;;  %8545 = vmatprep.subr.bf16.mxu1 %v9932_v27  ;;  %v9956_v17 = vld [vmem:[%s13279_s8 + $0x360] ss:$28 sps:$4 sm:$0xff]   ;;  %v9926_v43 = vld [vmem:[%s13279_s8 + $0x198] ss:$28 sps:$4 sm:$0xff]  }
 0x43f   : > { %v4078_v59 = vadd.f32 %v4077_v58, %v12303_v0  ;;  %v4079_v40 = vpop.f32.mrb[78].mxu1  ;;  %5830 = vmatprep.mubr.bf16.mxu0 %v12415_v53  ;;  %6056 = vmatprep.mubr.bf16.mxu1 %v12415_v53  ;;  %v9957_v45 = vld [vmem:[%s13279_s8 + $0x1a0] ss:$28 sps:$4 sm:$0xff]   ;;  %v9964_v58 = vld [vmem:[%s13279_s8 + $0x558] ss:$28 sps:$4 sm:$0xff]  }
 0x440   : > { %v4080_v20 = vadd.f32 %v4079_v40, %v12293_v49  ;;  %v4081_v56 = vpop.f32.mrb[79].mxu1  ;;  %5831 = vmatmul.mubr.bf16.gmra.mrb[72].mxu0 %v12413_v29  ;;  %6057 = vmatmul.mubr.bf16.gmra.mrb[104].mxu1 %v12413_v29  ;;  %v4150_v8 = vmax.f32 %v4076_v57, 0.0  ;;  %v9931_v57 = vld [vmem:[%s13279_s8 + $0x1d4] ss:$28 sps:$4 sm:$0xff]  }
 0x441   : > { %v4082_v60 = vadd.f32 %v4081_v56, %v12303_v0  ;;  %6126 = vmatpush1.bf16.msra.mxu0 %v9913_v47  ;;  %8546 = vmatpush3.bf16.msra.mxu1 %v9933_v24  ;;  %v4151_v4 = vmax.f32 %v4078_v59, 0.0  ;;  %v9929_v56 = vld [vmem:[%s13279_s8 + $0x1d0] ss:$28 sps:$4 sm:$0xff]  }
 0x442   : > { %v4154_v26 = vmax.f32 %v4080_v20, 0.0  ;;  %6127 = vmatprep.subr.bf16.mxu0 %v9920_v34  ;;  %8547 = vmatprep.subr.bf16.mxu1 %v9940_v39 }
 0x443   : > { %v4155_v30 = vmax.f32 %v4082_v60, 0.0 }
 0x444   : > { %v12449_v7 = vpack.c.bf16 %v4154_v26, %v4150_v8 }
 0x445   : > { %v12451_v10 = vpack.c.bf16 %v4155_v30, %v4151_v4  ;;  %v4085_v11 = vpop.f32.mrb[80].mxu1  ;;  %6128 = vmatpush1.bf16.msra.mxu0 %v9918_v61  ;;  %8548 = vmatpush3.bf16.msra.mxu1 %v9941_v42  ;;  %v9936_v42 = vld [vmem:[%s13279_s8 + $0x20c] ss:$28 sps:$4 sm:$0xff]  }
 0x446   : > { %v4086_v14 = vadd.f32 %v4085_v11, %v12293_v49  ;;  %v4087_v16 = vpop.f32.mrb[81].mxu1  ;;  %6129 = vmatprep.subr.bf16.mxu0 %v9923_v3  ;;  %8549 = vmatprep.subr.bf16.mxu1 %v9948_v48  ;;  %v9934_v30 = vld [vmem:[%s13279_s8 + $0x208] ss:$28 sps:$4 sm:$0xff]  }
 0x447   : > { %v4088_v18 = vadd.f32 %v4087_v16, %v12303_v0  ;;  %v4089_v15 = vpop.f32.mrb[82].mxu1  ;;  %5840 = vmatprep.mubr.bf16.mxu0 %v12451_v10  ;;  %6066 = vmatprep.mubr.bf16.mxu1 %v12451_v10 }
 0x448   : > { %v4090_v6 = vadd.f32 %v4089_v15, %v12293_v49  ;;  %v4091_v27 = vpop.f32.mrb[83].mxu1  ;;  %5841 = vmatmul.mubr.bf16.gmra.mrb[76].mxu0 %v12449_v7  ;;  %6067 = vmatmul.mubr.bf16.gmra.mrb[108].mxu1 %v12449_v7  ;;  %v4158_v47 = vmax.f32 %v4086_v14, 0.0  ;;  %v9937_v15 = vld [vmem:[%s13279_s8 + $0x240] ss:$28 sps:$4 sm:$0xff]  }
 0x449   : > { %v4092_v41 = vadd.f32 %v4091_v27, %v12303_v0  ;;  %6130 = vmatpush1.bf16.msra.mxu0 %v9921_v5  ;;  %8550 = vmatpush3.bf16.msra.mxu1 %v9949_v12  ;;  %v4159_v34 = vmax.f32 %v4088_v18, 0.0  ;;  %v9939_v12 = vld [vmem:[%s13279_s8 + $0x244] ss:$28 sps:$4 sm:$0xff]  }
 0x44a   : > { %v4162_v24 = vmax.f32 %v4090_v6, 0.0  ;;  %6131 = vmatprep.subr.bf16.mxu0 %v9928_v46  ;;  %8551 = vmatprep.subr.bf16.mxu1 %v9956_v17 }
 0x44b   : > { %v4163_v39 = vmax.f32 %v4092_v41, 0.0  ;;  %v9944_v41 = vld [vmem:[%s13279_s8 + $0x27c] ss:$28 sps:$4 sm:$0xff]  }
 0x44c   : > { %v12485_v59 = vpack.c.bf16 %v4162_v24, %v4158_v47 }
 0x44d   : > { %v12487_v40 = vpack.c.bf16 %v4163_v39, %v4159_v34  ;;  %v4095_v20 = vpop.f32.mrb[84].mxu1  ;;  %6132 = vmatpush1.bf16.msra.mxu0 %v9926_v43  ;;  %8552 = vmatpush3.bf16.msra.mxu1 %v9957_v45 }
 0x44e   : > { %v4096_v60 = vadd.f32 %v4095_v20, %v12293_v49  ;;  %v4097_v61 = vpop.f32.mrb[85].mxu1  ;;  %6133 = vmatprep.subr.bf16.mxu0 %v9931_v57  ;;  %8601 = vmatprep.subr.bf16.mxu1 %v9964_v58  ;;  %v9942_v58 = vld [vmem:[%s13279_s8 + $0x278] ss:$28 sps:$4 sm:$0xff]  }
 0x44f   : > { %v4098_v8 = vadd.f32 %v4097_v61, %v12303_v0  ;;  %v4099_v26 = vpop.f32.mrb[86].mxu1  ;;  %5850 = vmatprep.mubr.bf16.mxu0 %v12487_v40  ;;  %6076 = vmatprep.mubr.bf16.mxu1 %v12487_v40  ;;  %v9947_v20 = vld [vmem:[%s13279_s8 + $0x2b4] ss:$28 sps:$4 sm:$0xff]  }
 0x450   : > { %v4100_v3 = vadd.f32 %v4099_v26, %v12293_v49  ;;  %v4101_v48 = vpop.f32.mrb[87].mxu1  ;;  %5851 = vmatmul.mubr.bf16.gmra.mrb[80].mxu0 %v12485_v59  ;;  %6077 = vmatmul.mubr.bf16.gmra.mrb[112].mxu1 %v12485_v59  ;;  %v4166_v11 = vmax.f32 %v4096_v60, 0.0  ;;  %v9945_v26 = vld [vmem:[%s13279_s8 + $0x2b0] ss:$28 sps:$4 sm:$0xff]  }
 0x451   : > { %v4102_v4 = vadd.f32 %v4101_v48, %v12303_v0  ;;  %6134 = vmatpush1.bf16.msra.mxu0 %v9929_v56  ;;  %v4167_v14 = vmax.f32 %v4098_v8, 0.0 }
 0x452   : > { %v4170_v5 = vmax.f32 %v4100_v3, 0.0  ;;  %6135 = vmatprep.subr.bf16.mxu0 %v9936_v42 }
 0x453   : > { %v4171_v16 = vmax.f32 %v4102_v4, 0.0  ;;  %v9952_v4 = vld [vmem:[%s13279_s8 + $0x2ec] ss:$28 sps:$4 sm:$0xff]  }
 0x454   : > { %v12509_v46 = vpack.c.bf16 %v4170_v5, %v4166_v11 }
 0x455   : > { %v12511_v17 = vpack.c.bf16 %v4171_v16, %v4167_v14  ;;  %v4105_v18 = vpop.f32.mrb[88].mxu1  ;;  %6136 = vmatpush1.bf16.msra.mxu0 %v9934_v30  ;;  %v9950_v16 = vld [vmem:[%s13279_s8 + $0x2e8] ss:$28 sps:$4 sm:$0xff]  }
 0x456   : > { %v4106_v6 = vadd.f32 %v4105_v18, %v12293_v49  ;;  %v4107_v27 = vpop.f32.mrb[89].mxu1  ;;  %6137 = vmatprep.subr.bf16.mxu0 %v9939_v12 }
 0x457   : > { %v4108_v43 = vadd.f32 %v4107_v27, %v12303_v0  ;;  %v4109_v45 = vpop.f32.mrb[90].mxu1  ;;  %5860 = vmatprep.mubr.bf16.mxu0 %v12511_v17  ;;  %6086 = vmatprep.mubr.bf16.mxu1 %v12511_v17 }
 0x458   : > { %v4110_v47 = vadd.f32 %v4109_v45, %v12293_v49  ;;  %v4111_v24 = vpop.f32.mrb[91].mxu1  ;;  %5861 = vmatmul.mubr.bf16.gmra.mrb[84].mxu0 %v12509_v46  ;;  %6087 = vmatmul.mubr.bf16.gmra.mrb[116].mxu1 %v12509_v46  ;;  %v4174_v34 = vmax.f32 %v4106_v6, 0.0  ;;  %v9955_v6 = vld [vmem:[%s13279_s8 + $0x324] ss:$28 sps:$4 sm:$0xff]   ;;  %v9960_v45 = vld [vmem:[%s13279_s8 + $0x35c] ss:$28 sps:$4 sm:$0xff]  }
 0x459   : > { %v4112_v57 = vadd.f32 %v4111_v24, %v12303_v0  ;;  %6138 = vmatpush1.bf16.msra.mxu0 %v9937_v15  ;;  %v4175_v56 = vmax.f32 %v4108_v43, 0.0  ;;  %v9963_v24 = vld [vmem:[%s13279_s8 + $0x394] ss:$28 sps:$4 sm:$0xff]  }
 0x45a   : > { %v4178_v39 = vmax.f32 %v4110_v47, 0.0  ;;  %6139 = vmatprep.subr.bf16.mxu0 %v9944_v41  ;;  %v9958_v47 = vld [vmem:[%s13279_s8 + $0x358] ss:$28 sps:$4 sm:$0xff]  }
 0x45b   : > { %v4179_v60 = vmax.f32 %v4112_v57, 0.0  ;;  %v9961_v57 = vld [vmem:[%s13279_s8 + $0x390] ss:$28 sps:$4 sm:$0xff]  }
 0x45c   : > { %v12533_v61 = vpack.c.bf16 %v4178_v39, %v4174_v34  ;;  %v9968_v34 = vld [vmem:[%s13279_s8 + $0x3cc] ss:$28 sps:$4 sm:$0xff]  }
 0x45d   : > { %v12535_v42 = vpack.c.bf16 %v4179_v60, %v4175_v56  ;;  %v4115_v8 = vpop.f32.mrb[92].mxu1  ;;  %6140 = vmatpush1.bf16.msra.mxu0 %v9942_v58  ;;  %v9965_v58 = vld [vmem:[%s13279_s8 + $0x398] ss:$28 sps:$4 sm:$0xff]   ;;  %v9966_v39 = vld [vmem:[%s13279_s8 + $0x3c8] ss:$28 sps:$4 sm:$0xff]  }
 0x45e   : > { %v4116_v3 = vadd.f32 %v4115_v8, %v12293_v49  ;;  %v4117_v48 = vpop.f32.mrb[93].mxu1  ;;  %6141 = vmatprep.subr.bf16.mxu0 %v9947_v20  ;;  %v9971_v20 = vld [vmem:[%s13279_s8 + $0x404] ss:$28 sps:$4 sm:$0xff]   ;;  %v9973_v56 = vld [vmem:[%s13279_s8 + $0x3d0] ss:$28 sps:$4 sm:$0xff]  }
 0x45f   : > { %v4118_v30 = vadd.f32 %v4117_v48, %v12303_v0  ;;  %v4119_v11 = vpop.f32.mrb[94].mxu1  ;;  %5870 = vmatprep.mubr.bf16.mxu0 %v12535_v42  ;;  %6096 = vmatprep.mubr.bf16.mxu1 %v12535_v42  ;;  %v9976_v60 = vld [vmem:[%s13279_s8 + $0x43c] ss:$28 sps:$4 sm:$0xff]   ;;  %v9981_v8 = vld [vmem:[%s13279_s8 + $0x408] ss:$28 sps:$4 sm:$0xff]  }
 0x460   : > { %v4120_v5 = vadd.f32 %v4119_v11, %v12293_v49  ;;  %v4121_v12 = vpop.f32.mrb[95].mxu1  ;;  %5871 = vmatmul.mubr.bf16.gmra.mrb[88].mxu0 %v12533_v61  ;;  %6097 = vmatmul.mubr.bf16.gmra.mrb[120].mxu1 %v12533_v61  ;;  %v4182_v18 = vmax.f32 %v4116_v3, 0.0  ;;  %v9974_v3 = vld [vmem:[%s13279_s8 + $0x438] ss:$28 sps:$4 sm:$0xff]  }
 0x461   : > { %v4122_v14 = vadd.f32 %v4121_v12, %v12303_v0  ;;  %6142 = vmatpush1.bf16.msra.mxu0 %v9945_v26  ;;  %v4183_v49 = vmax.f32 %v4118_v30, 0.0  ;;  %v9953_v0 = vld [vmem:[%s13279_s8 + $0x320] ss:$28 sps:$4 sm:$0xff]   ;;  %v9979_v48 = vld [vmem:[%s13279_s8 + $0x474] ss:$28 sps:$4 sm:$0xff]  }
 0x462   : > { %v4186_v15 = vmax.f32 %v4120_v5, 0.0  ;;  %6143 = vmatprep.subr.bf16.mxu0 %v9952_v4  ;;  %v9988_v26 = vld [vmem:[%s13279_s8 + $0x600] ss:$28 sps:$4 sm:$0xff]   ;;  %v9977_v4 = vld [vmem:[%s13279_s8 + $0x470] ss:$28 sps:$4 sm:$0xff]  }
 0x463   : > { %v4187_v27 = vmax.f32 %v4122_v14, 0.0  ;;  %v9996_v30 = vld [vmem:[%s13279_s8 + $0x638] ss:$28 sps:$4 sm:$0xff]   ;;  %v9982_v5 = vld [vmem:[%s13279_s8 + $0x4a8] ss:$28 sps:$4 sm:$0xff]  }
 0x464   : > { %v12557_v41 = vpack.c.bf16 %v4186_v15, %v4182_v18  ;;  %v9997_v11 = vld [vmem:[%s13279_s8 + $0x478] ss:$28 sps:$4 sm:$0xff]   ;;  %v10004_v12 = vld [vmem:[%s13279_s8 + $0x670] ss:$28 sps:$4 sm:$0xff]   ;;  %v9985_v14 = vld [vmem:[%s13279_s8 + $0x4e0] ss:$28 sps:$4 sm:$0xff]  }
 0x465   : > { %v12559_v43 = vpack.c.bf16 %v4187_v27, %v4183_v49  ;;  %6144 = vmatpush1.bf16.msra.mxu0 %v9950_v16  ;;  %v9992_v16 = vld [vmem:[%s13279_s8 + $0x51c] ss:$28 sps:$4 sm:$0xff]   ;;  %v10012_v18 = vld [vmem:[%s13279_s8 + $0x6a8] ss:$28 sps:$4 sm:$0xff]   ;;  %v9993_v49 = vld [vmem:[%s13279_s8 + $0x550] ss:$28 sps:$4 sm:$0xff]  }
 0x466   : > { %6145 = vmatprep.subr.bf16.mxu0 %v9955_v6  ;;  %v9990_v15 = vld [vmem:[%s13279_s8 + $0x518] ss:$28 sps:$4 sm:$0xff]   ;;  %v10020_v27 = vld [vmem:[%s13279_s8 + $0x6e0] ss:$28 sps:$4 sm:$0xff]  }
 0x467   : > { %5880 = vmatprep.mubr.bf16.mxu0 %v12559_v43  ;;  %6106 = vmatprep.mubr.bf16.mxu1 %v12559_v43  ;;  %v9995_v6 = vld [vmem:[%s13279_s8 + $0x554] ss:$28 sps:$4 sm:$0xff]  }
 0x468   : > { %5881 = vmatmul.mubr.bf16.gmra.mrb[92].mxu0 %v12557_v41  ;;  %6107 = vmatmul.mubr.bf16.gmra.mrb[124].mxu1 %v12557_v41 }
 0x469   : > { %6146 = vmatpush1.bf16.msra.mxu0 %v9953_v0  ;;  %6149 = vmatprep.mubr.bf16.mxu0 %v12047_v63  ;;  %v10021_v0 = vld [vmem:[%s13279_s8 + $0x520] ss:$28 sps:$4 sm:$0xff]  }
 0x46a   : > { %6375 = vmatprep.mubr.bf16.mxu1 %v12047_v63  ;;  %6147 = vmatprep.subr.bf16.mxu0 %v9960_v45  ;;  %v9972_v63 = vld [vmem:[%s13279_s8 + $0x590] ss:$28 sps:$4 sm:$0xff]   ;;  %v9998_v45 = vld [vmem:[%s13279_s8 + $0x588] ss:$28 sps:$4 sm:$0xff]  }
 0x46d   : > { %6148 = vmatpush1.bf16.msra.mxu0 %v9958_v47  ;;  %v10003_v47 = vld [vmem:[%s13279_s8 + $0x5c4] ss:$28 sps:$4 sm:$0xff]  }
 0x46e   : > { %6230 = vmatprep.subr.bf16.mxu0 %v9963_v24  ;;  %v10008_v24 = vld [vmem:[%s13279_s8 + $0x5fc] ss:$28 sps:$4 sm:$0xff]  }
 0x470   : > { %6150 = vmatmul.mubr.bf16.vlgmr.msra.gmra.mrb[96].mxu0 %v12045_v52  ;;  %6376 = vmatmul.mubr.bf16.vlgmr.msra.gmra.mrb[128].mxu1 %v12045_v52  ;;  %v9980_v52 = vld [vmem:[%s13279_s8 + $0x5c8] ss:$28 sps:$4 sm:$0xff]  }
 0x471   : > { %6159 = vmatprep.mubr.bf16.mxu0 %v12083_v62  ;;  %6231 = vmatpush1.bf16.msra.mxu0 %v9961_v57  ;;  %v10011_v57 = vld [vmem:[%s13279_s8 + $0x634] ss:$28 sps:$4 sm:$0xff]  }
 0x472   : > { %6383 = vmatprep.mubr.bf16.mxu1 %v12083_v62  ;;  %8602 = vmatpush3.bf16.msra.mxu1 %v9965_v58  ;;  %v9969_v62 = vld [vmem:[%s13279_s8 + $0x400] ss:$28 sps:$4 sm:$0xff]   ;;  %v10009_v58 = vld [vmem:[%s13279_s8 + $0x630] ss:$28 sps:$4 sm:$0xff]  }
 0x473   : > { %6232 = vmatprep.subr.bf16.mxu0 %v9968_v34  ;;  %8603 = vmatprep.subr.bf16.mxu1 %v9972_v63  ;;  %v10019_v34 = vld [vmem:[%s13279_s8 + $0x6a4] ss:$28 sps:$4 sm:$0xff]  }
 0x474   : > { %v10017_v63 = vld [vmem:[%s13279_s8 + $0x6a0] ss:$28 sps:$4 sm:$0xff]  }
 0x475   : > { %6233 = vmatpush1.bf16.msra.mxu0 %v9966_v39 }
 0x476   : > { %6234 = vmatprep.subr.bf16.mxu0 %v9971_v20  ;;  %8604 = vmatpush3.bf16.msra.mxu1 %v9973_v56 }
 0x477   : > { %8605 = vmatprep.subr.bf16.mxu1 %v9980_v52 }
 0x478   : > { %6160 = vmatmul.mubr.bf16.gmra.mrb[100].mxu0 %v12081_v13  ;;  %6384 = vmatmul.mubr.bf16.gmra.mrb[132].mxu1 %v12081_v13  ;;  %v9989_v13 = vld [vmem:[%s13279_s8 + $0x440] ss:$28 sps:$4 sm:$0xff]  }
 0x479   : > { %6169 = vmatprep.mubr.bf16.mxu0 %v12119_v38  ;;  %6235 = vmatpush1.bf16.msra.mxu0 %v9969_v62 }
 0x47a   : > { %6391 = vmatprep.mubr.bf16.mxu1 %v12119_v38  ;;  %6236 = vmatprep.subr.bf16.mxu0 %v9976_v60  ;;  %v9984_v38 = vld [vmem:[%s13279_s8 + $0x4ac] ss:$28 sps:$4 sm:$0xff]  }
 0x47b   : > { %8606 = vmatpush3.bf16.msra.mxu1 %v9981_v8 }
 0x47c   : > { %8607 = vmatprep.subr.bf16.mxu1 %v9988_v26 }
 0x47d   : > { %6237 = vmatpush1.bf16.msra.mxu0 %v9974_v3 }
 0x47e   : > { %6238 = vmatprep.subr.bf16.mxu0 %v9979_v48 }
 0x47f   : > { %8608 = vmatpush3.bf16.msra.mxu1 %v9989_v13 }
 0x480   : > { %6170 = vmatmul.mubr.bf16.gmra.mrb[104].mxu0 %v12117_v37  ;;  %6392 = vmatmul.mubr.bf16.gmra.mrb[136].mxu1 %v12117_v37  ;;  %v9987_v37 = vld [vmem:[%s13279_s8 + $0x4e4] ss:$28 sps:$4 sm:$0xff]  }
 0x481   : > { %6179 = vmatprep.mubr.bf16.mxu0 %v12155_v1  ;;  %6239 = vmatpush1.bf16.msra.mxu0 %v9977_v4 }
 0x482   : > { %6399 = vmatprep.mubr.bf16.mxu1 %v12155_v1  ;;  %6240 = vmatprep.subr.bf16.mxu0 %v9984_v38  ;;  %v10005_v1 = vld [vmem:[%s13279_s8 + $0x4b0] ss:$28 sps:$4 sm:$0xff]  }
 0x483   : > { %8609 = vmatprep.subr.bf16.mxu1 %v9996_v30 }
 0x484   : > { %8610 = vmatpush3.bf16.msra.mxu1 %v9997_v11 }
 0x485   : > { %6241 = vmatpush1.bf16.msra.mxu0 %v9982_v5  ;;  %8611 = vmatprep.subr.bf16.mxu1 %v10004_v12 }
 0x486   : > { %6242 = vmatprep.subr.bf16.mxu0 %v9987_v37 }
 0x488   : > { %6180 = vmatmul.mubr.bf16.gmra.mrb[108].mxu0 %v12153_v9  ;;  %6400 = vmatmul.mubr.bf16.gmra.mrb[140].mxu1 %v12153_v9  ;;  %v10013_v9 = vld [vmem:[%s13279_s8 + $0x4e8] ss:$28 sps:$4 sm:$0xff]  }
 0x489   : > { %6189 = vmatprep.mubr.bf16.mxu0 %v12191_v50  ;;  %6243 = vmatpush1.bf16.msra.mxu0 %v9985_v14 }
 0x48a   : > { %6407 = vmatprep.mubr.bf16.mxu1 %v12191_v50  ;;  %6244 = vmatprep.subr.bf16.mxu0 %v9992_v16  ;;  %v10000_v50 = vld [vmem:[%s13279_s8 + $0x58c] ss:$28 sps:$4 sm:$0xff]  }
 0x48b   : > { %8612 = vmatpush3.bf16.msra.mxu1 %v10005_v1 }
 0x48c   : > { %8613 = vmatprep.subr.bf16.mxu1 %v10012_v18 }
 0x48d   : > { %6245 = vmatpush1.bf16.msra.mxu0 %v9990_v15 }
 0x48e   : > { %6246 = vmatprep.subr.bf16.mxu0 %v9995_v6 }
 0x48f   : > { %8614 = vmatpush3.bf16.msra.mxu1 %v10013_v9 }
 0x490   : > { %6190 = vmatmul.mubr.bf16.gmra.mrb[112].mxu0 %v12189_v28  ;;  %6408 = vmatmul.mubr.bf16.gmra.mrb[144].mxu1 %v12189_v28  ;;  %v10001_v28 = vld [vmem:[%s13279_s8 + $0x5c0] ss:$28 sps:$4 sm:$0xff]  }
 0x491   : > { %6199 = vmatprep.mubr.bf16.mxu0 %v12227_v44  ;;  %6247 = vmatpush1.bf16.msra.mxu0 %v9993_v49 }
 0x492   : > { %6415 = vmatprep.mubr.bf16.mxu1 %v12227_v44  ;;  %6248 = vmatprep.subr.bf16.mxu0 %v10000_v50  ;;  %v10006_v44 = vld [vmem:[%s13279_s8 + $0x5f8] ss:$28 sps:$4 sm:$0xff]  }
 0x493   : > { %8615 = vmatprep.subr.bf16.mxu1 %v10020_v27 }
 0x494   : > { %8616 = vmatpush3.bf16.msra.mxu1 %v10021_v0 }
 0x495   : > { %6249 = vmatpush1.bf16.msra.mxu0 %v9998_v45 }
 0x496   : > { %6250 = vmatprep.subr.bf16.mxu0 %v10003_v47 }
 0x498   : > { %6200 = vmatmul.mubr.bf16.gmra.mrb[116].mxu0 %v12225_v25  ;;  %6416 = vmatmul.mubr.bf16.gmra.mrb[148].mxu1 %v12225_v25  ;;  %v10016_v25 = vld [vmem:[%s13279_s8 + $0x66c] ss:$28 sps:$4 sm:$0xff]  }
 0x499   : > { %6209 = vmatprep.mubr.bf16.mxu0 %v12263_v2  ;;  %6251 = vmatpush1.bf16.msra.mxu0 %v10001_v28 }
 0x49a   : > { %6423 = vmatprep.mubr.bf16.mxu1 %v12263_v2  ;;  %6252 = vmatprep.subr.bf16.mxu0 %v10008_v24  ;;  %v10014_v2 = vld [vmem:[%s13279_s8 + $0x668] ss:$28 sps:$4 sm:$0xff]  }
 0x49d   : > { %6253 = vmatpush1.bf16.msra.mxu0 %v10006_v44 }
 0x49e   : > { %6254 = vmatprep.subr.bf16.mxu0 %v10011_v57 }
 0x4a0   : > { %6210 = vmatmul.mubr.bf16.gmra.mrb[120].mxu0 %v12261_v22  ;;  %6424 = vmatmul.mubr.bf16.gmra.mrb[152].mxu1 %v12261_v22  ;;  %v10024_v22 = vld [vmem:[%s13279_s8 + $0x6dc] ss:$28 sps:$4 sm:$0xff]  }
 0x4a1   : > { %6219 = vmatprep.mubr.bf16.mxu0 %v12307_v55  ;;  %6255 = vmatpush1.bf16.msra.mxu0 %v10009_v58 }
 0x4a2   : > { %6431 = vmatprep.mubr.bf16.mxu1 %v12307_v55  ;;  %6256 = vmatprep.subr.bf16.mxu0 %v10016_v25  ;;  %v10022_v55 = vld [vmem:[%s13279_s8 + $0x6d8] ss:$28 sps:$4 sm:$0xff]  }
 0x4a5   : > { %6257 = vmatpush1.bf16.msra.mxu0 %v10014_v2 }
 0x4a6   : > { %6258 = vmatprep.subr.bf16.mxu0 %v10019_v34 }
 0x4a8   : > { %6220 = vmatmul.mubr.bf16.gmra.mrb[124].mxu0 %v12305_v51  ;;  %6432 = vmatmul.mubr.bf16.gmra.mrb[156].mxu1 %v12305_v51  ;;  %v4476_v51 = vld [vmem:[%s13280_s9] sm:$0x7f] }
 0x4a9   : > { %6259 = vmatpush1.bf16.msra.mxu0 %v10017_v63  ;;  %6262 = vmatprep.mubr.bf16.mxu0 %v12343_v23 }
 0x4aa   : > { %6472 = vmatprep.mubr.bf16.mxu1 %v12343_v23  ;;  %6260 = vmatprep.subr.bf16.mxu0 %v10024_v22  ;;  %v12786_v23 = vrot.slane %v4476_v51, %v11372_v33 }
 0x4ad   : > { %6261 = vmatpush1.bf16.msra.mxu0 %v10022_v55 }
 0x4b0   : > { %6263 = vmatmul.mubr.bf16.vlgmr.msra.gmra.mrb[96].mxu0 %v12341_v19  ;;  %6473 = vmatmul.mubr.bf16.vlgmr.msra.gmra.mrb[160].mxu1 %v12341_v19  ;;  %v12783_v19 = vrot.slane %v4476_v51, %v11369_v32 }
 0x4b1   : > { %6272 = vmatprep.mubr.bf16.mxu0 %v12379_v54  ;;  %6480 = vmatprep.mubr.bf16.mxu1 %v12379_v54  ;;  %v12792_v54 = vrot.slane %v4476_v51, %v11381_v36 }
 0x4b8   : > { %6273 = vmatmul.mubr.bf16.gmra.mrb[100].mxu0 %v12377_v21  ;;  %6481 = vmatmul.mubr.bf16.gmra.mrb[164].mxu1 %v12377_v21  ;;  %v12789_v21 = vrot.slane %v4476_v51, %v11378_v35 }
 0x4b9   : > { %6282 = vmatprep.mubr.bf16.mxu0 %v12415_v53  ;;  %6488 = vmatprep.mubr.bf16.mxu1 %v12415_v53 }
 0x4c0   : > { %6283 = vmatmul.mubr.bf16.gmra.mrb[104].mxu0 %v12413_v29  ;;  %6489 = vmatmul.mubr.bf16.gmra.mrb[168].mxu1 %v12413_v29 }
 0x4c1   : > { %6292 = vmatprep.mubr.bf16.mxu0 %v12451_v10  ;;  %6496 = vmatprep.mubr.bf16.mxu1 %v12451_v10 }
 0x4c8   : > { %6293 = vmatmul.mubr.bf16.gmra.mrb[108].mxu0 %v12449_v7  ;;  %6497 = vmatmul.mubr.bf16.gmra.mrb[172].mxu1 %v12449_v7 }
 0x4c9   : > { %6302 = vmatprep.mubr.bf16.mxu0 %v12487_v40  ;;  %6504 = vmatprep.mubr.bf16.mxu1 %v12487_v40 }
 0x4d0   : > { %6303 = vmatmul.mubr.bf16.gmra.mrb[112].mxu0 %v12485_v59  ;;  %6505 = vmatmul.mubr.bf16.gmra.mrb[176].mxu1 %v12485_v59 }
 0x4d1   : > { %6312 = vmatprep.mubr.bf16.mxu0 %v12511_v17  ;;  %6512 = vmatprep.mubr.bf16.mxu1 %v12511_v17 }
 0x4d8   : > { %6313 = vmatmul.mubr.bf16.gmra.mrb[116].mxu0 %v12509_v46  ;;  %6513 = vmatmul.mubr.bf16.gmra.mrb[180].mxu1 %v12509_v46 }
 0x4d9   : > { %6322 = vmatprep.mubr.bf16.mxu0 %v12535_v42  ;;  %6520 = vmatprep.mubr.bf16.mxu1 %v12535_v42 }
 0x4e0   : > { %6323 = vmatmul.mubr.bf16.gmra.mrb[120].mxu0 %v12533_v61  ;;  %6521 = vmatmul.mubr.bf16.gmra.mrb[184].mxu1 %v12533_v61 }
 0x4e1   : > { %6332 = vmatprep.mubr.bf16.mxu0 %v12559_v43  ;;  %6528 = vmatprep.mubr.bf16.mxu1 %v12559_v43 }
 0x4e8   : > { %6333 = vmatmul.mubr.bf16.gmra.mrb[124].mxu0 %v12557_v41  ;;  %6529 = vmatmul.mubr.bf16.gmra.mrb[188].mxu1 %v12557_v41 }
 0x503   : > { %v5812_v29 = vpop.f32.mrb[64].mxu0  ;;  %v6038_v53 = vpop.f32.mrb[96].mxu1 }
 0x504   : > { %v8761_v7 = vadd.f32 %v5812_v29, %v12783_v19  ;;  %v8793_v10 = vadd.f32 %v6038_v53, %v12786_v23  ;;  %v5814_v59 = vpop.f32.mrb[65].mxu0  ;;  %v6040_v40 = vpop.f32.mrb[97].mxu1 }
 0x505   : > { %v8762_v32 = vadd.f32 %v5814_v59, %v12789_v21  ;;  %v8794_v46 = vadd.f32 %v6040_v40, %v12792_v54  ;;  %v5816_v33 = vpop.f32.mrb[66].mxu0  ;;  %v6042_v17 = vpop.f32.mrb[98].mxu1 }
 0x506   : > { %v8295_v61 = vmul.f32 -1.442695, %v8761_v7  ;;  %v8297_v35 = vmul.f32 -1.442695, %v8793_v10  ;;  %v8763_v42 = vadd.f32 %v5816_v33, %v12783_v19  ;;  %v8795_v36 = vadd.f32 %v6042_v17, %v12786_v23  ;;  %v5818_v41 = vpop.f32.mrb[67].mxu0  ;;  %v6044_v43 = vpop.f32.mrb[99].mxu1 }
 0x507   : > { %v8296_v39 = vmul.f32 -1.442695, %v8762_v32  ;;  %v8298_v20 = vmul.f32 -1.442695, %v8794_v46  ;;  %v8764_v56 = vadd.f32 %v5818_v41, %v12789_v21  ;;  %v8796_v52 = vadd.f32 %v6044_v43, %v12792_v54 }
 0x508   : > { %10057 = vpow2.f32 %v8295_v61  ;;  %v8302_v62 = vmul.f32 -1.442695, %v8763_v42  ;;  %v8304_v60 = vmul.f32 -1.442695, %v8795_v36 }
 0x509   : > { %10059 = vpow2.f32 %v8297_v35  ;;  %v8303_v8 = vmul.f32 -1.442695, %v8764_v56  ;;  %v8305_v26 = vmul.f32 -1.442695, %v8796_v52 }
 0x50a   : > { %10061 = vpow2.f32 %v8296_v39 }
 0x50b   : > { %10063 = vpow2.f32 %v8298_v20  ;;  %v5822_v3 = vpop.f32.mrb[68].mxu0  ;;  %v6048_v48 = vpop.f32.mrb[100].mxu1 }
 0x50c   : > { %10065 = vpow2.f32 %v8302_v62  ;;  %v8765_v13 = vadd.f32 %v5822_v3, %v12783_v19  ;;  %v8797_v4 = vadd.f32 %v6048_v48, %v12786_v23  ;;  %v5824_v38 = vpop.f32.mrb[69].mxu0  ;;  %v6050_v30 = vpop.f32.mrb[101].mxu1 }
 0x50d   : > { %10067 = vpow2.f32 %v8304_v60  ;;  %v8766_v11 = vadd.f32 %v5824_v38, %v12789_v21  ;;  %v8798_v5 = vadd.f32 %v6050_v30, %v12792_v54  ;;  %v5826_v12 = vpop.f32.mrb[70].mxu0  ;;  %v6052_v37 = vpop.f32.mrb[102].mxu1 }
 0x50e   : > { %10069 = vpow2.f32 %v8303_v8  ;;  %v8309_v14 = vmul.f32 -1.442695, %v8765_v13  ;;  %v8311_v16 = vmul.f32 -1.442695, %v8797_v4  ;;  %v8767_v1 = vadd.f32 %v5826_v12, %v12783_v19  ;;  %v5828_v18 = vpop.f32.mrb[71].mxu0  ;;  %v6054_v15 = vpop.f32.mrb[103].mxu1 }
 0x50f   : > { %10071 = vpow2.f32 %v8305_v26  ;;  %v8310_v6 = vmul.f32 -1.442695, %v8766_v11  ;;  %v8312_v9 = vmul.f32 -1.442695, %v8798_v5  ;;  %v8799_v33 = vadd.f32 %v6052_v37, %v12786_v23 }
 0x510   : > { %10073 = vpow2.f32 %v8309_v14  ;;  %v8316_v49 = vmul.f32 -1.442695, %v8767_v1  ;;  %v8768_v35 = vadd.f32 %v5828_v18, %v12789_v21  ;;  %v8800_v43 = vadd.f32 %v6054_v15, %v12792_v54 }
 0x511   : > { %10075 = vpow2.f32 %v8311_v16  ;;  %v8318_v48 = vmul.f32 -1.442695, %v8799_v33 }
 0x512   : > { %v10058_v50 = vpop.eup %10057  ;;  %10077 = vpow2.f32 %v8310_v6  ;;  %v8317_v5 = vmul.f32 -1.442695, %v8768_v35  ;;  %v8319_v16 = vmul.f32 -1.442695, %v8800_v43 }
 0x513   : > { %v10060_v27 = vpop.eup %10059  ;;  %v6873_v0 = vadd.f32 1.0, %v10058_v50  ;;  %10079 = vpow2.f32 %v8312_v9  ;;  %v5832_v45 = vpop.f32.mrb[72].mxu0 }
 0x514   : > { %v6058_v47 = vpop.f32.mrb[104].mxu1  ;;  %v10062_v28 = vpop.eup %10061  ;;  %v6875_v24 = vadd.f32 1.0, %v10060_v27  ;;  %10081 = vpow2.f32 %v8316_v49  ;;  %v8769_v62 = vadd.f32 %v5832_v45, %v12783_v19 }
 0x515   : > { %v5834_v44 = vpop.f32.mrb[73].mxu0  ;;  %v6060_v57 = vpop.f32.mrb[105].mxu1  ;;  %10083 = vrcp.f32 %v6873_v0  ;;  %v6874_v25 = vadd.f32 1.0, %v10062_v28  ;;  %v8801_v13 = vadd.f32 %v6058_v47, %v12786_v23 }
 0x516   : > { %v10064_v58 = vpop.eup %10063  ;;  %v5836_v2 = vpop.f32.mrb[74].mxu0  ;;  %10085 = vrcp.f32 %v6875_v24  ;;  %v8770_v12 = vadd.f32 %v5834_v44, %v12789_v21  ;;  %v8802_v1 = vadd.f32 %v6060_v57, %v12792_v54  ;;  %v8323_v15 = vmul.f32 -1.442695, %v8769_v62 }
 0x517   : > { %v6062_v34 = vpop.f32.mrb[106].mxu1  ;;  %v10066_v63 = vpop.eup %10065  ;;  %v6876_v22 = vadd.f32 1.0, %v10064_v58  ;;  %10087 = vrcp.f32 %v6874_v25  ;;  %v8771_v6 = vadd.f32 %v5836_v2, %v12783_v19  ;;  %v8325_v50 = vmul.f32 -1.442695, %v8801_v13 }
 0x518   : > { %v12807_v55 = vpop.f32.mrb[75].mxu0  ;;  %v10068_v51 = vpop.eup %10067  ;;  %v6880_v29 = vadd.f32 1.0, %v10066_v63  ;;  %v8803_v27 = vadd.f32 %v6062_v34, %v12786_v23  ;;  %v8324_v47 = vmul.f32 -1.442695, %v8770_v12  ;;  %v8326_v58 = vmul.f32 -1.442695, %v8802_v1 }
 0x519   : > { %v12809_v53 = vpop.f32.mrb[107].mxu1  ;;  %v10070_v7 = vpop.eup %10069  ;;  %10089 = vrcp.f32 %v6876_v22  ;;  %v6882_v10 = vadd.f32 1.0, %v10068_v51  ;;  %v8772_v28 = vadd.f32 %v12807_v55, %v12789_v21  ;;  %v8330_v22 = vmul.f32 -1.442695, %v8771_v6 }
 0x51a   : > { %v10072_v59 = vpop.eup %10071  ;;  %10091 = vrcp.f32 %v6880_v29  ;;  %v6881_v40 = vadd.f32 1.0, %v10070_v7  ;;  %v8804_v25 = vadd.f32 %v12809_v53, %v12792_v54 }
 0x51b   : > { %v10074_v32 = vpop.eup %10073  ;;  %10093 = vrcp.f32 %v6882_v10  ;;  %v6883_v46 = vadd.f32 1.0, %v10072_v59  ;;  %v5842_v42 = vpop.f32.mrb[76].mxu0  ;;  %v8332_v59 = vmul.f32 -1.442695, %v8803_v27 }
 0x51c   : > { %v10076_v17 = vpop.eup %10075  ;;  %10095 = vrcp.f32 %v6881_v40  ;;  %v6887_v61 = vadd.f32 1.0, %v10074_v32  ;;  %v6068_v39 = vpop.f32.mrb[108].mxu1  ;;  %v8773_v55 = vadd.f32 %v5842_v42, %v12783_v19  ;;  %v8333_v35 = vmul.f32 -1.442695, %v8804_v25 }
 0x51d   : > { %v10078_v36 = vpop.eup %10077  ;;  %10097 = vrcp.f32 %v6883_v46  ;;  %v6889_v41 = vadd.f32 1.0, %v10076_v17  ;;  %v12814_v20 = vpop.f32.mrb[77].mxu0  ;;  %v8805_v53 = vadd.f32 %v6068_v39, %v12786_v23  ;;  %v8331_v17 = vmul.f32 -1.442695, %v8772_v28 }
 0x51e   : > { %v10080_v56 = vpop.eup %10079  ;;  %10099 = vrcp.f32 %v6887_v61  ;;  %v6888_v52 = vadd.f32 1.0, %v10078_v36  ;;  %v12817_v60 = vpop.f32.mrb[109].mxu1 }
 0x51f   : > { %v12819_v8 = vpop.f32.mrb[78].mxu0  ;;  %v10082_v26 = vpop.eup %10081  ;;  %10101 = vrcp.f32 %v6889_v41  ;;  %v6890_v3 = vadd.f32 1.0, %v10080_v56  ;;  %v8337_v41 = vmul.f32 -1.442695, %v8773_v55 }
 0x520   : > { %v12822_v4 = vpop.f32.mrb[110].mxu1  ;;  %v12824_v38 = vpop.f32.mrb[79].mxu0  ;;  %10103 = vrcp.f32 %v6888_v52  ;;  %v6894_v11 = vadd.f32 1.0, %v10082_v26  ;;  %v8339_v52 = vmul.f32 -1.442695, %v8805_v53  ;;  %v8775_v53 = vadd.f32 %v12819_v8, %v12783_v19 }
 0x521   : > { %v10084_v30 = vpop.eup %10083  ;;  %v12827_v37 = vpop.f32.mrb[111].mxu1  ;;  %10105 = vrcp.f32 %v6890_v3  ;;  %v8774_v3 = vadd.f32 %v12814_v20, %v12789_v21 }
 0x522   : > { %v10086_v14 = vpop.eup %10085  ;;  %10107 = vrcp.f32 %v6894_v11 }
 0x523   : > { %v10088_v18 = vpop.eup %10087  ;;  %10109 = vpow2.f32 %v8318_v48  ;;  %v12841_v24 = vpop.f32.mrb[80].mxu0 }
 0x524   : > { %v10090_v9 = vpop.eup %10089  ;;  %v8473_v49 = vpack.c.bf16 %v10088_v18, %v10084_v30  ;;  %10111 = vpow2.f32 %v8317_v5  ;;  %v12843_v44 = vpop.f32.mrb[112].mxu1 }
 0x525   : > { %v10092_v0 = vpop.eup %10091  ;;  %v8474_v45 = vpack.c.bf16 %v10090_v9, %v10086_v14  ;;  %10113 = vpow2.f32 %v8319_v16  ;;  %v12848_v2 = vpop.f32.mrb[81].mxu0 }
 0x526   : > { %v10094_v57 = vpop.eup %10093  ;;  %7561 = vst [vmem:[%s12835_s12] sm:$0xff] %v8473_v49  ;;  %v12850_v34 = vpop.f32.mrb[113].mxu1  ;;  %10115 = vpow2.f32 %v8323_v15 }
 0x527   : > { %v10096_v63 = vpop.eup %10095  ;;  %7562 = vst [vmem:[%s12835_s12 + $0x8] sm:$0xff] %v8474_v45  ;;  %v12854_v51 = vpop.f32.mrb[82].mxu0  ;;  %10117 = vpow2.f32 %v8325_v50  ;;  %v8806_v50 = vadd.f32 %v12817_v60, %v12792_v54 }
 0x528   : > { %v6082_v29 = vpop.f32.mrb[114].mxu1  ;;  %v10098_v7 = vpop.eup %10097  ;;  %v8477_v10 = vpack.c.bf16 %v10096_v63, %v10092_v0  ;;  %10119 = vpow2.f32 %v8324_v47  ;;  %v12887_v47 = vmul.f32 -1.442695, %v8774_v3 }
 0x529   : > { %v12857_v40 = vpop.f32.mrb[83].mxu0  ;;  %v6084_v32 = vpop.f32.mrb[115].mxu1  ;;  %v8478_v33 = vpack.c.bf16 %v10098_v7, %v10094_v57  ;;  %10121 = vpow2.f32 %v8326_v58  ;;  %v12861_v42 = vadd.f32 %v6082_v29, %v12786_v23 }
 0x52a   : > { %v10100_v46 = vpop.eup %10099  ;;  %7566 = vst [vmem:[%s12835_s12 + $0x1c] sm:$0xff] %v8477_v10  ;;  %10123 = vpow2.f32 %v8330_v22  ;;  %v12865_v43 = vadd.f32 %v6084_v32, %v12792_v54 }
 0x52b   : > { %v10102_v61 = vpop.eup %10101  ;;  %7567 = vst [vmem:[%s12835_s12 + $0x24] sm:$0xff] %v8478_v33  ;;  %10125 = vpow2.f32 %v8332_v59  ;;  %v5862_v48 = vpop.f32.mrb[84].mxu0  ;;  %v12901_v59 = vmul.f32 -1.442695, %v8806_v50  ;;  %v8807_v33 = vadd.f32 %v12822_v4, %v12786_v23 }
 0x52c   : > { %v10104_v36 = vpop.eup %10103  ;;  %10127 = vpow2.f32 %v8331_v17  ;;  %v6088_v13 = vpop.f32.mrb[116].mxu1  ;;  %v12873_v11 = vadd.f32 %v5862_v48, %v12783_v19  ;;  %v8776_v17 = vadd.f32 %v12824_v38, %v12789_v21 }
 0x52d   : > { %v10106_v39 = vpop.eup %10105  ;;  %v8481_v56 = vpack.c.bf16 %v10104_v36, %v10100_v46  ;;  %10129 = vpow2.f32 %v8333_v35  ;;  %v12876_v5 = vadd.f32 %v6088_v13, %v12786_v23  ;;  %v5864_v12 = vpop.f32.mrb[85].mxu0 }
 0x52e   : > { %v12867_v62 = vpop.eup %10107  ;;  %v8482_v26 = vpack.c.bf16 %v10106_v39, %v10102_v61  ;;  %v6090_v14 = vpop.f32.mrb[117].mxu1  ;;  %10131 = vpow2.f32 %v8337_v41  ;;  %v12880_v18 = vadd.f32 %v5864_v12, %v12789_v21  ;;  %v8808_v41 = vadd.f32 %v12827_v37, %v12792_v54 }
 0x52f   : > { %v10110_v30 = vpop.eup %10109  ;;  %7570 = vst [vmem:[%s12835_s12 + $0x38] sm:$0xff] %v8481_v56  ;;  %v12883_v20 = vadd.f32 %v6090_v14, %v12792_v54  ;;  %v5866_v15 = vpop.f32.mrb[86].mxu0  ;;  %10133 = vpow2.f32 %v8339_v52  ;;  %v8344_v37 = vmul.f32 -1.442695, %v8775_v53 }
 0x530   : > { %v10112_v16 = vpop.eup %10111  ;;  %7571 = vst [vmem:[%s12835_s12 + $0x40] sm:$0xff] %v8482_v26  ;;  %v6896_v1 = vadd.f32 1.0, %v10110_v30  ;;  %v6092_v6 = vpop.f32.mrb[118].mxu1  ;;  %v12890_v25 = vadd.f32 %v5866_v15, %v12783_v19 }
 0x531   : > { %v10114_v9 = vpop.eup %10113  ;;  %v6895_v49 = vadd.f32 1.0, %v10112_v16  ;;  %v5868_v27 = vpop.f32.mrb[87].mxu0  ;;  %v12893_v63 = vadd.f32 %v6092_v6, %v12786_v23  ;;  %v8346_v6 = vmul.f32 -1.442695, %v8807_v33  ;;  %v8810_v33 = vadd.f32 %v12850_v34, %v12792_v54 }
 0x532   : > { %v10116_v0 = vpop.eup %10115  ;;  %10135 = vrcp.f32 %v6896_v1  ;;  %v6897_v45 = vadd.f32 1.0, %v10114_v9  ;;  %v6094_v28 = vpop.f32.mrb[119].mxu1  ;;  %v12896_v60 = vadd.f32 %v5868_v27, %v12789_v21  ;;  %v8345_v9 = vmul.f32 -1.442695, %v8776_v17 }
 0x533   : > { %v10118_v57 = vpop.eup %10117  ;;  %10137 = vrcp.f32 %v6895_v49  ;;  %v6901_v58 = vadd.f32 1.0, %v10116_v0  ;;  %v12899_v29 = vadd.f32 %v6094_v28, %v12792_v54  ;;  %v5872_v61 = vpop.f32.mrb[88].mxu0  ;;  %v8777_v0 = vadd.f32 %v12841_v24, %v12783_v19 }
 0x534   : > { %v10120_v22 = vpop.eup %10119  ;;  %10139 = vrcp.f32 %v6897_v45  ;;  %v6903_v55 = vadd.f32 1.0, %v10118_v57  ;;  %v12912_v39 = vadd.f32 %v5872_v61, %v12783_v19  ;;  %v6098_v8 = vpop.f32.mrb[120].mxu1 }
 0x535   : > { %v10122_v7 = vpop.eup %10121  ;;  %10141 = vrcp.f32 %v6901_v58  ;;  %v6902_v10 = vadd.f32 1.0, %v10120_v22  ;;  %v5874_v56 = vpop.f32.mrb[89].mxu0  ;;  %v12915_v4 = vadd.f32 %v6098_v8, %v12786_v23 }
 0x536   : > { %v10124_v32 = vpop.eup %10123  ;;  %10143 = vrcp.f32 %v6903_v55  ;;  %v6904_v46 = vadd.f32 1.0, %v10122_v7  ;;  %v12918_v38 = vadd.f32 %v5874_v56, %v12789_v21  ;;  %v6100_v3 = vpop.f32.mrb[121].mxu1  ;;  %v8347_v7 = vmul.f32 -1.442695, %v8808_v41 }
 0x537   : > { %v10126_v35 = vpop.eup %10125  ;;  %10145 = vrcp.f32 %v6902_v10  ;;  %v6908_v36 = vadd.f32 1.0, %v10124_v32  ;;  %v5876_v48 = vpop.f32.mrb[90].mxu0  ;;  %v12921_v12 = vadd.f32 %v6100_v3, %v12792_v54  ;;  %v8809_v10 = vadd.f32 %v12843_v44, %v12786_v23 }
 0x538   : > { %v10128_v52 = vpop.eup %10127  ;;  %10147 = vrcp.f32 %v6904_v46  ;;  %v6910_v26 = vadd.f32 1.0, %v10126_v35  ;;  %v6102_v14 = vpop.f32.mrb[122].mxu1  ;;  %v12926_v45 = vadd.f32 %v5876_v48, %v12783_v19  ;;  %v8778_v46 = vadd.f32 %v12848_v2, %v12789_v21 }
 0x539   : > { %v10130_v13 = vpop.eup %10129  ;;  %10149 = vrcp.f32 %v6908_v36  ;;  %v6909_v30 = vadd.f32 1.0, %v10128_v52  ;;  %v5878_v16 = vpop.f32.mrb[91].mxu0  ;;  %v12929_v58 = vadd.f32 %v6102_v14, %v12786_v23  ;;  %v8351_v44 = vmul.f32 -1.442695, %v8777_v0 }
 0x53a   : > { %v10132_v1 = vpop.eup %10131  ;;  %10151 = vrcp.f32 %v6910_v26  ;;  %v6911_v15 = vadd.f32 1.0, %v10130_v13  ;;  %v6104_v49 = vpop.f32.mrb[123].mxu1  ;;  %v12932_v22 = vadd.f32 %v5878_v16, %v12789_v21  ;;  %v8779_v48 = vadd.f32 %v12854_v51, %v12783_v19 }
 0x53b   : > { %v10134_v50 = vpop.eup %10133  ;;  %10153 = vrcp.f32 %v6909_v30  ;;  %v6915_v27 = vadd.f32 1.0, %v10132_v1  ;;  %v12937_v24 = vadd.f32 %v6104_v49, %v12792_v54  ;;  %v5882_v17 = vpop.f32.mrb[92].mxu0  ;;  %v8780_v51 = vadd.f32 %v12857_v40, %v12789_v21 }
 0x53c   : > { %v10136_v28 = vpop.eup %10135  ;;  %10155 = vrcp.f32 %v6911_v15  ;;  %v6917_v57 = vadd.f32 1.0, %v10134_v50  ;;  %v6108_v61 = vpop.f32.mrb[124].mxu1  ;;  %v12946_v41 = vadd.f32 %v5882_v17, %v12783_v19  ;;  %v8353_v15 = vmul.f32 -1.442695, %v8809_v10 }
 0x53d   : > { %v10138_v55 = vpop.eup %10137  ;;  %10157 = vrcp.f32 %v6915_v27  ;;  %v5884_v8 = vpop.f32.mrb[93].mxu0  ;;  %v12951_v2 = vadd.f32 %v6108_v61, %v12786_v23  ;;  %v8360_v40 = vmul.f32 -1.442695, %v12861_v42 }
 0x53e   : > { %v10140_v53 = vpop.eup %10139  ;;  %v8485_v32 = vpack.c.bf16 %v10138_v55, %v12867_v62  ;;  %10159 = vrcp.f32 %v6917_v57  ;;  %v6110_v62 = vpop.f32.mrb[125].mxu1  ;;  %v12954_v34 = vadd.f32 %v5884_v8, %v12789_v21 }
 0x53f   : > { %v10142_v35 = vpop.eup %10141  ;;  %v8486_v36 = vpack.c.bf16 %v10140_v53, %v10136_v28  ;;  %10161 = vpow2.f32 %v12887_v47  ;;  %v12957_v52 = vadd.f32 %v6110_v62, %v12792_v54  ;;  %v5886_v47 = vpop.f32.mrb[94].mxu0  ;;  %v8358_v28 = vmul.f32 -1.442695, %v8779_v48 }
 0x540   : > { %v10144_v56 = vpop.eup %10143  ;;  %7574 = vst [vmem:[%s12835_s12 + $0x54] sm:$0xff] %v8485_v32  ;;  %10163 = vpow2.f32 %v12901_v59  ;;  %v6112_v26 = vpop.f32.mrb[126].mxu1  ;;  %v12963_v59 = vadd.f32 %v5886_v47, %v12783_v19  ;;  %v8354_v19 = vmul.f32 -1.442695, %v8810_v33 }
 0x541   : > { %v10146_v3 = vpop.eup %10145  ;;  %7575 = vst [vmem:[%s12835_s12 + $0x5c] sm:$0xff] %v8486_v36  ;;  %10165 = vpow2.f32 %v8344_v37  ;;  %v12966_v13 = vadd.f32 %v6112_v26, %v12786_v23  ;;  %v5888_v30 = vpop.f32.mrb[95].mxu0  ;;  %v8352_v37 = vmul.f32 -1.442695, %v8778_v46 }
 0x542   : > { %v6114_v14 = vpop.f32.mrb[127].mxu1  ;;  %v10148_v16 = vpop.eup %10147  ;;  %v8489_v1 = vpack.c.bf16 %v10146_v3, %v10142_v35  ;;  %10167 = vpow2.f32 %v8346_v6  ;;  %v12972_v23 = vadd.f32 %v5888_v30, %v12789_v21  ;;  %v8359_v21 = vmul.f32 -1.442695, %v8780_v51 }
 0x543   : > { %v10150_v49 = vpop.eup %10149  ;;  %v8490_v50 = vpack.c.bf16 %v10148_v16, %v10144_v56  ;;  %10169 = vpow2.f32 %v8345_v9  ;;  %v12975_v0 = vadd.f32 %v6114_v14, %v12792_v54  ;;  %v8553_v55 = vpop.f32.mrb[128].mxu1 }
 0x544   : > { %v10152_v27 = vpop.eup %10151  ;;  %7578 = vst [vmem:[%s12835_s12 + $0x70] sm:$0xff] %v8489_v1  ;;  %10171 = vpow2.f32 %v8347_v7  ;;  %v8554_v53 = vpop.f32.mrb[129].mxu1 }
 0x545   : > { %v10154_v6 = vpop.eup %10153  ;;  %7579 = vst [vmem:[%s12835_s12 + $0x78] sm:$0xff] %v8490_v50  ;;  %10173 = vpow2.f32 %v8351_v44  ;;  %v12984_v32 = vadd.f32 %v8554_v53, %v8553_v55  ;;  %v8556_v46 = vpop.f32.mrb[130].mxu1  ;;  %v8361_v53 = vmul.f32 -1.442695, %v12865_v43  ;;  %v8366_v43 = vmul.f32 -1.442695, %v12880_v18 }
 0x546   : > { %v10156_v9 = vpop.eup %10155  ;;  %v8493_v57 = vpack.c.bf16 %v10154_v6, %v10150_v49  ;;  %10175 = vpow2.f32 %v8353_v15  ;;  %v8557_v17 = vpop.f32.mrb[131].mxu1 }
 0x547   : > { %v12979_v7 = vpop.eup %10157  ;;  %v8494_v10 = vpack.c.bf16 %v10156_v9, %v10152_v27  ;;  %10177 = vpow2.f32 %v8352_v37  ;;  %v12987_v35 = vadd.f32 %v8557_v17, %v8556_v46  ;;  %v8365_v17 = vmul.f32 -1.442695, %v12873_v11 }
 0x548   : > { %v12981_v54 = vpop.eup %10159  ;;  %7582 = vst [vmem:[%s12835_s12 + $0x8c] sm:$0xff] %v8493_v57  ;;  %10179 = vpow2.f32 %v8354_v19  ;;  %v8368_v11 = vmul.f32 -1.442695, %v12883_v20  ;;  %v8373_v20 = vmul.f32 -1.442695, %v12896_v60 }
 0x549   : > { %v10162_v33 = vpop.eup %10161  ;;  %7583 = vst [vmem:[%s12835_s12 + $0x94] sm:$0xff] %v8494_v10  ;;  %10181 = vpow2.f32 %v8358_v28 }
 0x54a   : > { %v10164_v61 = vpop.eup %10163  ;;  %v6916_v42 = vadd.f32 1.0, %v10162_v33  ;;  %10183 = vpow2.f32 %v8360_v40 }
 0x54b   : > { %v10166_v36 = vpop.eup %10165  ;;  %v6918_v44 = vadd.f32 1.0, %v10164_v61  ;;  %10185 = vpow2.f32 %v8359_v21  ;;  %v8559_v48 = vpop.f32.mrb[132].mxu1 }
 0x54c   : > { %v10168_v8 = vpop.eup %10167  ;;  %10187 = vrcp.f32 %v6916_v42  ;;  %v6922_v62 = vadd.f32 1.0, %v10166_v36  ;;  %v8560_v16 = vpop.f32.mrb[133].mxu1 }
 0x54d   : > { %v10170_v56 = vpop.eup %10169  ;;  %10189 = vrcp.f32 %v6918_v44  ;;  %v6924_v47 = vadd.f32 1.0, %v10168_v8  ;;  %v12989_v49 = vadd.f32 %v8560_v16, %v8559_v48  ;;  %v8562_v50 = vpop.f32.mrb[134].mxu1  ;;  %v8367_v44 = vmul.f32 -1.442695, %v12876_v5 }
 0x54e   : > { %v10172_v26 = vpop.eup %10171  ;;  %10191 = vrcp.f32 %v6922_v62  ;;  %v6923_v3 = vadd.f32 1.0, %v10170_v56  ;;  %v8563_v27 = vpop.f32.mrb[135].mxu1  ;;  %v8372_v5 = vmul.f32 -1.442695, %v12890_v25  ;;  %v8379_v25 = vmul.f32 -1.442695, %v12912_v39 }
 0x54f   : > { %v10174_v30 = vpop.eup %10173  ;;  %10193 = vrcp.f32 %v6924_v47  ;;  %v6925_v14 = vadd.f32 1.0, %v10172_v26  ;;  %v12991_v28 = vadd.f32 %v8563_v27, %v8562_v50  ;;  %v8375_v50 = vmul.f32 -1.442695, %v12899_v29 }
 0x550   : > { %v10176_v1 = vpop.eup %10175  ;;  %10195 = vrcp.f32 %v6923_v3  ;;  %v6929_v15 = vadd.f32 1.0, %v10174_v30  ;;  %v8382_v39 = vmul.f32 -1.442695, %v12921_v12 }
 0x551   : > { %v10178_v37 = vpop.eup %10177  ;;  %10197 = vrcp.f32 %v6925_v14  ;;  %v6931_v51 = vadd.f32 1.0, %v10176_v1  ;;  %v8374_v14 = vmul.f32 -1.442695, %v12893_v63  ;;  %v8381_v63 = vmul.f32 -1.442695, %v12915_v4 }
 0x552   : > { %v10180_v19 = vpop.eup %10179  ;;  %10199 = vrcp.f32 %v6929_v15  ;;  %v6930_v6 = vadd.f32 1.0, %v10178_v37 }
 0x553   : > { %v10182_v9 = vpop.eup %10181  ;;  %10201 = vrcp.f32 %v6931_v51  ;;  %v6932_v57 = vadd.f32 1.0, %v10180_v19  ;;  %v8565_v61 = vpop.f32.mrb[136].mxu1 }
 0x554   : > { %v10184_v40 = vpop.eup %10183  ;;  %10203 = vrcp.f32 %v6930_v6  ;;  %v6936_v55 = vadd.f32 1.0, %v10182_v9  ;;  %v8566_v8 = vpop.f32.mrb[137].mxu1 }
 0x555   : > { %v10186_v10 = vpop.eup %10185  ;;  %10205 = vrcp.f32 %v6932_v57  ;;  %v6938_v21 = vadd.f32 1.0, %v10184_v40  ;;  %v12999_v47 = vadd.f32 %v8566_v8, %v8565_v61  ;;  %v8568_v26 = vpop.f32.mrb[138].mxu1  ;;  %v8380_v57 = vmul.f32 -1.442695, %v12918_v38 }
 0x556   : > { %v10188_v46 = vpop.eup %10187  ;;  %10207 = vrcp.f32 %v6936_v55  ;;  %v6937_v33 = vadd.f32 1.0, %v10186_v10 }
 0x557   : > { %v10190_v42 = vpop.eup %10189  ;;  %v8497_v36 = vpack.c.bf16 %v10188_v46, %v12979_v7  ;;  %10209 = vrcp.f32 %v6938_v21  ;;  %v8569_v7 = vpop.f32.mrb[139].mxu1 }
 0x558   : > { %v10192_v62 = vpop.eup %10191  ;;  %v8498_v56 = vpack.c.bf16 %v10190_v42, %v12981_v54  ;;  %10211 = vrcp.f32 %v6937_v33  ;;  %v13005_v54 = vadd.f32 %v8569_v7, %v8568_v26 }
 0x559   : > { %v10194_v3 = vpop.eup %10193  ;;  %7586 = vst [vmem:[%s12835_s12 + $0xa8] sm:$0xff] %v8497_v36  ;;  %10213 = vpow2.f32 %v8361_v53 }
 0x55a   : > { %v10196_v48 = vpop.eup %10195  ;;  %7587 = vst [vmem:[%s12835_s12 + $0xb0] sm:$0xff] %v8498_v56  ;;  %10215 = vpow2.f32 %v8365_v17 }
 0x55b   : > { %v10198_v30 = vpop.eup %10197  ;;  %v8501_v18 = vpack.c.bf16 %v10196_v48, %v10192_v62  ;;  %10217 = vpow2.f32 %v8367_v44  ;;  %v8571_v51 = vpop.f32.mrb[140].mxu1 }
 0x55c   : > { %v10200_v16 = vpop.eup %10199  ;;  %v8502_v1 = vpack.c.bf16 %v10198_v30, %v10194_v3  ;;  %10219 = vpow2.f32 %v8366_v43  ;;  %v8572_v6 = vpop.f32.mrb[141].mxu1 }
 0x55d   : > { %v10202_v15 = vpop.eup %10201  ;;  %7590 = vst [vmem:[%s12835_s12 + $0xc4] sm:$0xff] %v8501_v18  ;;  %10221 = vpow2.f32 %v8368_v11  ;;  %v13015_v29 = vadd.f32 %v8572_v6, %v8571_v51  ;;  %v8574_v40 = vpop.f32.mrb[142].mxu1 }
 0x55e   : > { %v10204_v37 = vpop.eup %10203  ;;  %7591 = vst [vmem:[%s12835_s12 + $0xcc] sm:$0xff] %v8502_v1  ;;  %10223 = vpow2.f32 %v8372_v5  ;;  %v8575_v10 = vpop.f32.mrb[143].mxu1 }
 0x55f   : > { %v10206_v27 = vpop.eup %10205  ;;  %v8505_v19 = vpack.c.bf16 %v10204_v37, %v10200_v16  ;;  %10225 = vpow2.f32 %v8374_v14  ;;  %v13022_v4 = vadd.f32 %v8575_v10, %v8574_v40 }
 0x560   : > { %v10208_v60 = vpop.eup %10207  ;;  %v8506_v9 = vpack.c.bf16 %v10206_v27, %v10202_v15  ;;  %10227 = vpow2.f32 %v8373_v20 }
 0x561   : > { %v13017_v55 = vpop.eup %10209  ;;  %7594 = vst [vmem:[%s12835_s12 + $0xe0] sm:$0xff] %v8505_v19  ;;  %10229 = vpow2.f32 %v8375_v50 }
 0x562   : > { %v10212_v21 = vpop.eup %10211  ;;  %7595 = vst [vmem:[%s12835_s12 + $0xe8] sm:$0xff] %v8506_v9  ;;  %10231 = vpow2.f32 %v8379_v25 }
 0x563   : > { %v10214_v53 = vpop.eup %10213  ;;  %v8509_v46 = vpack.c.bf16 %v10212_v21, %v10208_v60  ;;  %10233 = vpow2.f32 %v8381_v63  ;;  %v8577_v12 = vpop.f32.mrb[144].mxu1  ;;  %v8386_v63 = vmul.f32 -1.442695, %v12926_v45  ;;  %v8389_v45 = vmul.f32 -1.442695, %v12937_v24 }
 0x564   : > { %v10216_v38 = vpop.eup %10215  ;;  %v6939_v33 = vadd.f32 1.0, %v10214_v53  ;;  %10235 = vpow2.f32 %v8380_v57  ;;  %v8578_v62 = vpop.f32.mrb[145].mxu1  ;;  %v8388_v57 = vmul.f32 -1.442695, %v12929_v58  ;;  %v8387_v53 = vmul.f32 -1.442695, %v12932_v22 }
 0x565   : > { %v10218_v17 = vpop.eup %10217  ;;  %7598 = vst [vmem:[%s12835_s12 + $0xfc] sm:$0xff] %v8509_v46  ;;  %v6943_v61 = vadd.f32 1.0, %v10216_v38  ;;  %10237 = vpow2.f32 %v8382_v39  ;;  %v13025_v26 = vadd.f32 %v8578_v62, %v8577_v12  ;;  %v8580_v3 = vpop.f32.mrb[146].mxu1  ;;  %v8393_v58 = vmul.f32 -1.442695, %v12946_v41 }
 0x566   : > { %v10220_v42 = vpop.eup %10219  ;;  %10239 = vrcp.f32 %v6939_v33  ;;  %v6945_v36 = vadd.f32 1.0, %v10218_v17  ;;  %v8581_v48 = vpop.f32.mrb[147].mxu1  ;;  %v8395_v22 = vmul.f32 -1.442695, %v12951_v2  ;;  %v8394_v24 = vmul.f32 -1.442695, %v12954_v34 }
 0x567   : > { %v10222_v44 = vpop.eup %10221  ;;  %10241 = vrcp.f32 %v6943_v61  ;;  %v6944_v8 = vadd.f32 1.0, %v10220_v42  ;;  %v13027_v18 = vadd.f32 %v8581_v48, %v8580_v3  ;;  %v4504_v61 = vsub.s32 6, %v11366_v31  ;;  %v13050_v2 = vld [vmem:[%s13280_s9] sm:$0x7f] }
 0x568   : > { %v10224_v56 = vpop.eup %10223  ;;  %10243 = vrcp.f32 %v6945_v36  ;;  %v6946_v43 = vadd.f32 1.0, %v10222_v44 }
 0x569   : > { %v10226_v11 = vpop.eup %10225  ;;  %10245 = vrcp.f32 %v6944_v8  ;;  %v6950_v7 = vadd.f32 1.0, %v10224_v56  ;;  %v8396_v8 = vmul.f32 -1.442695, %v12957_v52  ;;  %v8400_v56 = vmul.f32 -1.442695, %v12963_v59 }
 0x56a   : > { %v10228_v5 = vpop.eup %10227  ;;  %10247 = vrcp.f32 %v6946_v43  ;;  %v6952_v30 = vadd.f32 1.0, %v10226_v11  ;;  %v13053_v43 = vrot.slane %v13050_v2, %v4504_v61  ;;  %v8402_v52 = vmul.f32 -1.442695, %v12966_v13 }
 0x56b   : > { %v10230_v14 = vpop.eup %10229  ;;  %10249 = vrcp.f32 %v6950_v7  ;;  %v6951_v16 = vadd.f32 1.0, %v10228_v5  ;;  %v8583_v51 = vpop.f32.mrb[148].mxu1 }
 0x56c   : > { %v10232_v1 = vpop.eup %10231  ;;  %10251 = vrcp.f32 %v6952_v30  ;;  %v6953_v20 = vadd.f32 1.0, %v10230_v14  ;;  %v8584_v6 = vpop.f32.mrb[149].mxu1  ;;  %v8401_v30 = vmul.f32 -1.442695, %v12972_v23 }
 0x56d   : > { %v10234_v15 = vpop.eup %10233  ;;  %10253 = vrcp.f32 %v6951_v16  ;;  %v6957_v50 = vadd.f32 1.0, %v10232_v1  ;;  %v13031_v40 = vadd.f32 %v8584_v6, %v8583_v51  ;;  %v8586_v39 = vpop.f32.mrb[150].mxu1  ;;  %v8403_v1 = vmul.f32 -1.442695, %v12975_v0 }
 0x56e   : > { %v10236_v37 = vpop.eup %10235  ;;  %10255 = vrcp.f32 %v6953_v20  ;;  %v6959_v25 = vadd.f32 1.0, %v10234_v15  ;;  %v8587_v46 = vpop.f32.mrb[151].mxu1 }
 0x56f   : > { %v10238_v27 = vpop.eup %10237  ;;  %10257 = vrcp.f32 %v6957_v50  ;;  %v6958_v19 = vadd.f32 1.0, %v10236_v37  ;;  %v13036_v33 = vadd.f32 %v8587_v46, %v8586_v39 }
 0x570   : > { %v10240_v60 = vpop.eup %10239  ;;  %10259 = vrcp.f32 %v6959_v25  ;;  %v6960_v9 = vadd.f32 1.0, %v10238_v27 }
 0x571   : > { %v10242_v10 = vpop.eup %10241  ;;  %v8510_v21 = vpack.c.bf16 %v10240_v60, %v13017_v55  ;;  %10261 = vrcp.f32 %v6958_v19 }
 0x572   : > { %v10244_v38 = vpop.eup %10243  ;;  %10263 = vrcp.f32 %v6960_v9  ;;  %v4496_v9 = vsub.s32 4, %v11366_v31 }
 0x573   : > { %v10246_v17 = vpop.eup %10245  ;;  %7599 = vst [vmem:[%s12835_s12 + $0x104] sm:$0xff] %v8510_v21  ;;  %10265 = vpow2.f32 %v8386_v63  ;;  %v8589_v62 = vpop.f32.mrb[152].mxu1 }
 0x574   : > { %v10248_v55 = vpop.eup %10247  ;;  %v8513_v42 = vpack.c.bf16 %v10246_v17, %v10242_v10  ;;  %10267 = vpow2.f32 %v8388_v57  ;;  %v8590_v34 = vpop.f32.mrb[153].mxu1 }
 0x575   : > { %v10250_v36 = vpop.eup %10249  ;;  %v8514_v12 = vpack.c.bf16 %v10248_v55, %v10244_v38  ;;  %10269 = vpow2.f32 %v8387_v53  ;;  %v8591_v7 = vadd.f32 %v8590_v34, %v8589_v62  ;;  %v8592_v48 = vpop.f32.mrb[154].mxu1  ;;  %v4500_v53 = vsub.s32 5, %v11366_v31 }
 0x576   : > { %v10252_v44 = vpop.eup %10251  ;;  %7602 = vst [vmem:[%s12835_s12 + $0x118] sm:$0xff] %v8513_v42  ;;  %10271 = vpow2.f32 %v8389_v45  ;;  %v8593_v14 = vpop.f32.mrb[155].mxu1 }
 0x577   : > { %v10254_v41 = vpop.eup %10253  ;;  %7603 = vst [vmem:[%s12835_s12 + $0x120] sm:$0xff] %v8514_v12  ;;  %10273 = vpow2.f32 %v8393_v58  ;;  %v13060_v20 = vadd.f32 %v8591_v7, %v13053_v43  ;;  %v8594_v15 = vadd.f32 %v8593_v14, %v8592_v48  ;;  %v6378_v7 = vadd.f32 %v12984_v32, %v13053_v43 }
 0x578   : > { %v10256_v3 = vpop.eup %10255  ;;  %v8517_v11 = vpack.c.bf16 %v10254_v41, %v10250_v36  ;;  %10275 = vpow2.f32 %v8395_v22  ;;  %v13074_v36 = vrot.slane %v13050_v2, %v4496_v9 }
 0x579   : > { %v10258_v5 = vpop.eup %10257  ;;  %v8518_v59 = vpack.c.bf16 %v10256_v3, %v10252_v44  ;;  %10277 = vpow2.f32 %v8394_v24  ;;  %v13064_v23 = vadd.f32 %v8594_v15, %v13053_v43  ;;  %v13080_v44 = vrot.slane %v13050_v2, %v4500_v53 }
 0x57a   : > { %v10260_v16 = vpop.eup %10259  ;;  %7606 = vst [vmem:[%s12835_s12 + $0x134] sm:$0xff] %v8517_v11  ;;  %10279 = vpow2.f32 %v8396_v8 }
 0x57b   : > { %v10262_v50 = vpop.eup %10261  ;;  %7607 = vst [vmem:[%s12835_s12 + $0x13c] sm:$0xff] %v8518_v59  ;;  %10281 = vpow2.f32 %v8400_v56  ;;  %v8595_v19 = vpop.f32.mrb[156].mxu1 }
 0x57c   : > { %v10264_v13 = vpop.eup %10263  ;;  %v8521_v37 = vpack.c.bf16 %v10262_v50, %v10258_v5  ;;  %10283 = vpow2.f32 %v8402_v52  ;;  %v8596_v60 = vpop.f32.mrb[157].mxu1 }
 0x57d   : > { %v10266_v25 = vpop.eup %10265  ;;  %v8522_v51 = vpack.c.bf16 %v10264_v13, %v10260_v16  ;;  %10285 = vpow2.f32 %v8401_v30  ;;  %v8597_v10 = vadd.f32 %v8596_v60, %v8595_v19  ;;  %v8598_v21 = vpop.f32.mrb[158].mxu1 }
 0x57e   : > { %v10268_v27 = vpop.eup %10267  ;;  %7610 = vst [vmem:[%s12835_s12 + $0x150] sm:$0xff] %v8521_v37  ;;  %v6964_v0 = vadd.f32 1.0, %v10266_v25  ;;  %10287 = vpow2.f32 %v8403_v1  ;;  %v8599_v45 = vpop.f32.mrb[159].mxu1 }
 0x57f   : > { %v10270_v63 = vpop.eup %10269  ;;  %7611 = vst [vmem:[%s12835_s12 + $0x158] sm:$0xff] %v8522_v51  ;;  %v6966_v6 = vadd.f32 1.0, %v10268_v27  ;;  %v13071_v61 = vadd.f32 %v8597_v10, %v13053_v43  ;;  %v8600_v55 = vadd.f32 %v8599_v45, %v8598_v21 }
 0x580   : > { %v10272_v57 = vpop.eup %10271  ;;  %10289 = vrcp.f32 %v6964_v0  ;;  %v6965_v39 = vadd.f32 1.0, %v10270_v63 }
 0x581   : > { %v10274_v46 = vpop.eup %10273  ;;  %10291 = vrcp.f32 %v6966_v6  ;;  %v6967_v38 = vadd.f32 1.0, %v10272_v57  ;;  %v13077_v24 = vadd.f32 %v8600_v55, %v13053_v43  ;;  %v6381_v6 = vadd.f32 %v12987_v35, %v13053_v43 }
 0x582   : > { %v10276_v17 = vpop.eup %10275  ;;  %10293 = vrcp.f32 %v6965_v39  ;;  %v6971_v58 = vadd.f32 1.0, %v10274_v46 }
 0x583   : > { %v10278_v42 = vpop.eup %10277  ;;  %10295 = vrcp.f32 %v6967_v38  ;;  %v6973_v22 = vadd.f32 1.0, %v10276_v17  ;;  %v6264_v34 = vpop.f32.mrb[96].mxu0 }
 0x584   : > { %v10280_v12 = vpop.eup %10279  ;;  %10297 = vrcp.f32 %v6971_v58  ;;  %v6972_v31 = vadd.f32 1.0, %v10278_v42  ;;  %v8617_v3 = vpop.f32.mrb[160].mxu1  ;;  %v8825_v48 = vadd.f32 %v6264_v34, %v13074_v36 }
 0x585   : > { %v10282_v8 = vpop.eup %10281  ;;  %10299 = vrcp.f32 %v6973_v22  ;;  %v6974_v62 = vadd.f32 1.0, %v10280_v12  ;;  %v6266_v5 = vpop.f32.mrb[97].mxu0 }
 0x586   : > { %v10284_v41 = vpop.eup %10283  ;;  %10301 = vrcp.f32 %v6972_v31  ;;  %v6978_v56 = vadd.f32 1.0, %v10282_v8  ;;  %v8618_v59 = vpop.f32.mrb[161].mxu1  ;;  %v8826_v14 = vadd.f32 %v6266_v5, %v13080_v44  ;;  %v8299_v13 = vmul.f32 -1.442695, %v8825_v48 }
 0x587   : > { %v10286_v11 = vpop.eup %10285  ;;  %10303 = vrcp.f32 %v6974_v62  ;;  %v6980_v52 = vadd.f32 1.0, %v10284_v41  ;;  %v8619_v16 = vadd.f32 %v8618_v59, %v8617_v3  ;;  %v6268_v1 = vpop.f32.mrb[98].mxu0  ;;  %v6386_v8 = vadd.f32 %v12989_v49, %v13053_v43 }
 0x588   : > { %v10288_v2 = vpop.eup %10287  ;;  %10305 = vrcp.f32 %v6978_v56  ;;  %v6979_v30 = vadd.f32 1.0, %v10286_v11  ;;  %v8620_v15 = vpop.f32.mrb[162].mxu1  ;;  %v8827_v37 = vadd.f32 %v6268_v1, %v13074_v36  ;;  %v8300_v27 = vmul.f32 -1.442695, %v8826_v14 }
 0x589   : > { %10307 = vrcp.f32 %v6980_v52  ;;  %v6981_v50 = vadd.f32 1.0, %v10288_v2  ;;  %v6270_v25 = vpop.f32.mrb[99].mxu0  ;;  %v8621_v51 = vpop.f32.mrb[163].mxu1  ;;  %v6475_v0 = vadd.f32 %v8619_v16, %v6378_v7  ;;  %v6389_v1 = vadd.f32 %v12991_v28, %v13053_v43 }
 0x58a   : > { %v10290_v32 = vpop.eup %10289  ;;  %10309 = vrcp.f32 %v6979_v30  ;;  %v8828_v19 = vadd.f32 %v6270_v25, %v13080_v44  ;;  %v8306_v60 = vmul.f32 -1.442695, %v8827_v37  ;;  %v8622_v9 = vadd.f32 %v8621_v51, %v8620_v15 }
 0x58b   : > { %v10292_v63 = vpop.eup %10291  ;;  %10311 = vrcp.f32 %v6981_v50  ;;  %v8301_v39 = vmul.f32 -1.442695, %v6475_v0  ;;  %v6274_v17 = vpop.f32.mrb[100].mxu0 }
 0x58c   : > { %v10294_v57 = vpop.eup %10293  ;;  %10313 = vpow2.f32 %v8299_v13  ;;  %v8307_v10 = vmul.f32 -1.442695, %v8828_v19  ;;  %v6478_v46 = vadd.f32 %v8622_v9, %v6381_v6  ;;  %v8623_v58 = vpop.f32.mrb[164].mxu1  ;;  %v8829_v42 = vadd.f32 %v6274_v17, %v13074_v36 }
 0x58d   : > { %v10296_v21 = vpop.eup %10295  ;;  %v8525_v53 = vpack.c.bf16 %v10294_v57, %v10290_v32  ;;  %10315 = vpow2.f32 %v8300_v27  ;;  %v6276_v22 = vpop.f32.mrb[101].mxu0 }
 0x58e   : > { %v10298_v38 = vpop.eup %10297  ;;  %v8526_v45 = vpack.c.bf16 %v10296_v21, %v10292_v63  ;;  %10317 = vpow2.f32 %v8301_v39  ;;  %v8308_v35 = vmul.f32 -1.442695, %v6478_v46  ;;  %v8624_v12 = vpop.f32.mrb[165].mxu1  ;;  %v8830_v62 = vadd.f32 %v6276_v22, %v13080_v44 }
 0x58f   : > { %v10300_v55 = vpop.eup %10299  ;;  %7614 = vst [vmem:[%s12835_s12 + $0x16c] sm:$0xff] %v8525_v53  ;;  %10319 = vpow2.f32 %v8306_v60  ;;  %v8625_v41 = vadd.f32 %v8624_v12, %v8623_v58  ;;  %v6278_v56 = vpop.f32.mrb[102].mxu0  ;;  %v8313_v52 = vmul.f32 -1.442695, %v8829_v42 }
 0x590   : > { %v10302_v31 = vpop.eup %10301  ;;  %7615 = vst [vmem:[%s12835_s12 + $0x174] sm:$0xff] %v8526_v45  ;;  %10321 = vpow2.f32 %v8307_v10  ;;  %v8626_v34 = vpop.f32.mrb[166].mxu1  ;;  %v8831_v7 = vadd.f32 %v6278_v56, %v13074_v36  ;;  %v8314_v30 = vmul.f32 -1.442695, %v8830_v62  ;;  %v6394_v10 = vadd.f32 %v12999_v47, %v13053_v43 }
 0x591   : > { %v10304_v3 = vpop.eup %10303  ;;  %v8529_v11 = vpack.c.bf16 %v10302_v31, %v10298_v38  ;;  %10323 = vpow2.f32 %v8308_v35  ;;  %v6280_v48 = vpop.f32.mrb[103].mxu0  ;;  %v6483_v49 = vadd.f32 %v8625_v41, %v6386_v8  ;;  %v6397_v31 = vadd.f32 %v13005_v54, %v13053_v43 }
 0x592   : > { %v8627_v5 = vpop.f32.mrb[167].mxu1  ;;  %v10306_v59 = vpop.eup %10305  ;;  %v8530_v2 = vpack.c.bf16 %v10304_v3, %v10300_v55  ;;  %v8832_v14 = vadd.f32 %v6280_v48, %v13080_v44  ;;  %10325 = vpow2.f32 %v8313_v52  ;;  %v8320_v15 = vmul.f32 -1.442695, %v8831_v7 }
 0x593   : > { %v10308_v16 = vpop.eup %10307  ;;  %7618 = vst [vmem:[%s12835_s12 + $0x188] sm:$0xff] %v8529_v11  ;;  %v8628_v50 = vadd.f32 %v8627_v5, %v8626_v34  ;;  %10327 = vpow2.f32 %v8314_v30  ;;  %v8315_v37 = vmul.f32 -1.442695, %v6483_v49  ;;  %v6284_v63 = vpop.f32.mrb[104].mxu0  ;;  %v6402_v54 = vadd.f32 %v13015_v29, %v13053_v43 }
 0x594   : > { %v10310_v13 = vpop.eup %10309  ;;  %7619 = vst [vmem:[%s12835_s12 + $0x190] sm:$0xff] %v8530_v2  ;;  %v8321_v25 = vmul.f32 -1.442695, %v8832_v14  ;;  %10329 = vpow2.f32 %v8320_v15  ;;  %v8629_v6 = vpop.f32.mrb[168].mxu1  ;;  %v8833_v41 = vadd.f32 %v6284_v63, %v13074_v36 }
 0x595   : > { %v10312_v51 = vpop.eup %10311  ;;  %v8533_v32 = vpack.c.bf16 %v10310_v13, %v10306_v59  ;;  %v6486_v27 = vadd.f32 %v8628_v50, %v6389_v1  ;;  %10331 = vpow2.f32 %v8315_v37  ;;  %v6286_v9 = vpop.f32.mrb[105].mxu0 }
 0x596   : > { %v10314_v0 = vpop.eup %10313  ;;  %v8534_v19 = vpack.c.bf16 %v10312_v51, %v10308_v16  ;;  %10333 = vpow2.f32 %v8321_v25  ;;  %v8630_v57 = vpop.f32.mrb[169].mxu1  ;;  %v8834_v52 = vadd.f32 %v6286_v9, %v13080_v44  ;;  %v8327_v1 = vmul.f32 -1.442695, %v8833_v41 }
 0x597   : > { %v10316_v28 = vpop.eup %10315  ;;  %7622 = vst [vmem:[%s12835_s12 + $0x1a4] sm:$0xff] %v8533_v32  ;;  %v6877_v60 = vadd.f32 1.0, %v10314_v0  ;;  %v8631_v53 = vadd.f32 %v8630_v57, %v8629_v6  ;;  %v6288_v46 = vpop.f32.mrb[106].mxu0  ;;  %v8322_v47 = vmul.f32 -1.442695, %v6486_v27 }
 0x598   : > { %v10318_v39 = vpop.eup %10317  ;;  %7623 = vst [vmem:[%s12835_s12 + $0x1ac] sm:$0xff] %v8534_v19  ;;  %v6878_v21 = vadd.f32 1.0, %v10316_v28  ;;  %v8632_v38 = vpop.f32.mrb[170].mxu1  ;;  %v8835_v15 = vadd.f32 %v6288_v46, %v13074_v36  ;;  %v8328_v19 = vmul.f32 -1.442695, %v8834_v52 }
 0x599   : > { %v10320_v45 = vpop.eup %10319  ;;  %10335 = vrcp.f32 %v6877_v60  ;;  %v6879_v17 = vadd.f32 1.0, %v10318_v39  ;;  %v6290_v58 = vpop.f32.mrb[107].mxu0  ;;  %v6491_v22 = vadd.f32 %v8631_v53, %v6394_v10  ;;  %v6405_v39 = vadd.f32 %v13022_v4, %v13053_v43 }
 0x59a   : > { %v8633_v55 = vpop.f32.mrb[171].mxu1  ;;  %v10322_v35 = vpop.eup %10321  ;;  %10337 = vrcp.f32 %v6878_v21  ;;  %v6884_v42 = vadd.f32 1.0, %v10320_v45  ;;  %v8836_v51 = vadd.f32 %v6290_v58, %v13080_v44  ;;  %v8334_v10 = vmul.f32 -1.442695, %v8835_v15 }
 0x59b   : > { %v10324_v12 = vpop.eup %10323  ;;  %10339 = vrcp.f32 %v6879_v17  ;;  %v6885_v8 = vadd.f32 1.0, %v10322_v35  ;;  %v8634_v56 = vadd.f32 %v8633_v55, %v8632_v38  ;;  %v6294_v48 = vpop.f32.mrb[108].mxu0  ;;  %v8329_v63 = vmul.f32 -1.442695, %v6491_v22 }
 0x59c   : > { %10341 = vrcp.f32 %v6884_v42  ;;  %v6886_v62 = vadd.f32 1.0, %v10324_v12  ;;  %v10326_v34 = vpop.eup %10325  ;;  %v8635_v5 = vpop.f32.mrb[172].mxu1  ;;  %v8837_v28 = vadd.f32 %v6294_v48, %v13074_v36  ;;  %v8335_v46 = vmul.f32 -1.442695, %v8836_v51 }
 0x59d   : > { %10343 = vrcp.f32 %v6885_v8  ;;  %v10328_v3 = vpop.eup %10327  ;;  %v6891_v11 = vadd.f32 1.0, %v10326_v34  ;;  %v6494_v7 = vadd.f32 %v8634_v56, %v6397_v31  ;;  %v6296_v30 = vpop.f32.mrb[109].mxu0 }
 0x59e   : > { %10345 = vrcp.f32 %v6886_v62  ;;  %v10330_v59 = vpop.eup %10329  ;;  %v6892_v2 = vadd.f32 1.0, %v10328_v3  ;;  %v8636_v49 = vpop.f32.mrb[173].mxu1  ;;  %v8838_v38 = vadd.f32 %v6296_v30, %v13080_v44  ;;  %v8341_v22 = vmul.f32 -1.442695, %v8837_v28 }
 0x59f   : > { %10347 = vpow2.f32 %v8322_v47  ;;  %v10332_v14 = vpop.eup %10331  ;;  %v6898_v16 = vadd.f32 1.0, %v10330_v59  ;;  %v6298_v50 = vpop.f32.mrb[110].mxu0  ;;  %v8637_v32 = vadd.f32 %v8636_v49, %v8635_v5  ;;  %v8336_v58 = vmul.f32 -1.442695, %v6494_v7 }
 0x5a0   : > { %10349 = vrcp.f32 %v6891_v11  ;;  %v8638_v13 = vpop.f32.mrb[174].mxu1  ;;  %v10334_v37 = vpop.eup %10333  ;;  %v6893_v25 = vadd.f32 1.0, %v10332_v14  ;;  %v8839_v12 = vadd.f32 %v6298_v50, %v13074_v36  ;;  %v6410_v62 = vadd.f32 %v13025_v26, %v13053_v43 }
 0x5a1   : > { %10351 = vrcp.f32 %v6892_v2  ;;  %v6300_v27 = vpop.f32.mrb[111].mxu0  ;;  %v8639_v29 = vpop.f32.mrb[175].mxu1  ;;  %v6899_v0 = vadd.f32 1.0, %v10334_v37  ;;  %v6499_v60 = vadd.f32 %v8637_v32, %v6402_v54  ;;  %v8342_v7 = vmul.f32 -1.442695, %v8838_v38 }
 0x5a2   : > { %10353 = vrcp.f32 %v6898_v16  ;;  %v8640_v9 = vadd.f32 %v8639_v29, %v8638_v13  ;;  %v8840_v56 = vadd.f32 %v6300_v27, %v13080_v44  ;;  %v6413_v54 = vadd.f32 %v13027_v18, %v13053_v43 }
 0x5a3   : > { %v10336_v6 = vpop.eup %10335  ;;  %10355 = vrcp.f32 %v6893_v25  ;;  %v13118_v35 = vpop.f32.mrb[112].mxu0  ;;  %v8343_v30 = vmul.f32 -1.442695, %v6499_v60  ;;  %v8348_v14 = vmul.f32 -1.442695, %v8839_v12  ;;  %v6418_v60 = vadd.f32 %v13031_v40, %v13053_v43 }
 0x5a4   : > { %v10338_v57 = vpop.eup %10337  ;;  %10357 = vrcp.f32 %v6899_v0  ;;  %v6502_v55 = vadd.f32 %v8640_v9, %v6405_v39  ;;  %v8641_v42 = vpop.f32.mrb[176].mxu1  ;;  %v8349_v13 = vmul.f32 -1.442695, %v8840_v56  ;;  %v6421_v12 = vadd.f32 %v13036_v33, %v13053_v43 }
 0x5a5   : > { %v10340_v21 = vpop.eup %10339  ;;  %v8475_v53 = vpack.c.bf16 %v10338_v57, %v10336_v6  ;;  %10359 = vpow2.f32 %v8327_v1  ;;  %v13122_v31 = vpop.f32.mrb[113].mxu0 }
 0x5a6   : > { %v10342_v45 = vpop.eup %10341  ;;  %v8476_v17 = vpack.c.bf16 %v10340_v21, %v10340_v21  ;;  %10361 = vpow2.f32 %v8328_v19  ;;  %v8642_v8 = vpop.f32.mrb[177].mxu1  ;;  %v8350_v18 = vmul.f32 -1.442695, %v6502_v55 }
 0x5a7   : > { %v10344_v4 = vpop.eup %10343  ;;  %7563 = vst [vmem:[%s12835_s12 + $0x10] sm:$0xff] %v8475_v53  ;;  %10363 = vpow2.f32 %v8329_v63  ;;  %v13129_v34 = vpop.f32.mrb[114].mxu0  ;;  %v8643_v48 = vadd.f32 %v8642_v8, %v8641_v42 }
 0x5a8   : > { %v10346_v47 = vpop.eup %10345  ;;  %7565 = vst.msk [vmem:[%s12835_s12 + $0x18] sm:$0xf] %vm7564_vm1, %v8476_v17  ;;  %v8479_v41 = vpack.c.bf16 %v10344_v4, %v10342_v45  ;;  %10365 = vpow2.f32 %v8334_v10  ;;  %v8644_v3 = vpop.f32.mrb[178].mxu1  ;;  %v8843_v33 = vadd.f32 %v13129_v34, %v13074_v36 }
 0x5a9   : > { %v10348_v11 = vpop.eup %10347  ;;  %v8480_v52 = vpack.c.bf16 %v10346_v47, %v10346_v47  ;;  %10367 = vpow2.f32 %v8335_v46  ;;  %v13131_v5 = vpop.f32.mrb[115].mxu0  ;;  %v13138_v16 = vadd.f32 %v8643_v48, %v6410_v62  ;;  %v8841_v46 = vadd.f32 %v13118_v35, %v13074_v36 }
 0x5aa   : > { %v8645_v59 = vpop.f32.mrb[179].mxu1  ;;  %v10350_v26 = vpop.eup %10349  ;;  %7568 = vst [vmem:[%s12835_s12 + $0x2c] sm:$0xff] %v8479_v41  ;;  %v6900_v2 = vadd.f32 1.0, %v10348_v11  ;;  %10369 = vpow2.f32 %v8336_v58  ;;  %v8842_v58 = vadd.f32 %v13122_v31, %v13080_v44 }
 0x5ab   : > { %v10352_v49 = vpop.eup %10351  ;;  %7569 = vst.msk [vmem:[%s12835_s12 + $0x34] sm:$0xf] %vm7564_vm1, %v8480_v52  ;;  %10371 = vpow2.f32 %v8341_v22  ;;  %v8646_v1 = vadd.f32 %v8645_v59, %v8644_v3  ;;  %v13143_v27 = vpop.f32.mrb[116].mxu0  ;;  %v8355_v41 = vmul.f32 -1.442695, %v8841_v46 }
 0x5ac   : > { %v10354_v15 = vpop.eup %10353  ;;  %v8483_v50 = vpack.c.bf16 %v10352_v49, %v10350_v26  ;;  %10373 = vrcp.f32 %v6900_v2  ;;  %v8647_v29 = vpop.f32.mrb[180].mxu1  ;;  %v8356_v31 = vmul.f32 -1.442695, %v8842_v58  ;;  %v8844_v49 = vadd.f32 %v13131_v5, %v13080_v44 }
 0x5ad   : > { %v10356_v37 = vpop.eup %10355  ;;  %10375 = vpow2.f32 %v8342_v7  ;;  %v13140_v25 = vadd.f32 %v8646_v1, %v6413_v54  ;;  %v13145_v63 = vpop.f32.mrb[117].mxu0  ;;  %v8845_v5 = vadd.f32 %v13143_v27, %v13074_v36 }
 0x5ae   : > { %v10358_v51 = vpop.eup %10357  ;;  %7572 = vst [vmem:[%s12835_s12 + $0x48] sm:$0xff] %v8483_v50  ;;  %v8484_v32 = vpack.c.bf16 %v10356_v37, %v10356_v37  ;;  %10377 = vpow2.f32 %v8343_v30  ;;  %v8648_v6 = vpop.f32.mrb[181].mxu1 }
 0x5af   : > { %v10360_v0 = vpop.eup %10359  ;;  %v8487_v19 = vpack.c.bf16 %v10358_v51, %v10354_v15  ;;  %10379 = vpow2.f32 %v8348_v14  ;;  %v8649_v57 = vadd.f32 %v8648_v6, %v8647_v29  ;;  %v13151_v39 = vpop.f32.mrb[118].mxu0  ;;  %v8364_v46 = vmul.f32 -1.442695, %v13140_v25 }
 0x5b0   : > { %v10362_v28 = vpop.eup %10361  ;;  %7573 = vst.msk [vmem:[%s12835_s12 + $0x50] sm:$0xf] %vm7564_vm1, %v8484_v32  ;;  %v6905_v9 = vadd.f32 1.0, %v10360_v0  ;;  %10381 = vpow2.f32 %v8349_v13  ;;  %v8650_v10 = vpop.f32.mrb[182].mxu1  ;;  %v8357_v13 = vmul.f32 -1.442695, %v13138_v16 }
 0x5b1   : > { %v10364_v21 = vpop.eup %10363  ;;  %7576 = vst [vmem:[%s12835_s12 + $0x64] sm:$0xff] %v8487_v19  ;;  %v6906_v53 = vadd.f32 1.0, %v10362_v28  ;;  %10383 = vpow2.f32 %v8350_v18  ;;  %v13156_v38 = vpop.f32.mrb[119].mxu0  ;;  %v13160_v55 = vadd.f32 %v8649_v57, %v6418_v60  ;;  %v8846_v57 = vadd.f32 %v13145_v63, %v13080_v44 }
 0x5b2   : > { %v8651_v45 = vpop.f32.mrb[183].mxu1  ;;  %v10366_v17 = vpop.eup %10365  ;;  %10385 = vrcp.f32 %v6905_v9  ;;  %v6907_v40 = vadd.f32 1.0, %v10364_v21  ;;  %v8362_v21 = vmul.f32 -1.442695, %v8843_v33 }
 0x5b3   : > { %v10368_v42 = vpop.eup %10367  ;;  %10387 = vrcp.f32 %v6906_v53  ;;  %v6912_v4 = vadd.f32 1.0, %v10366_v17  ;;  %v8652_v8 = vadd.f32 %v8651_v45, %v8650_v10  ;;  %v6324_v52 = vpop.f32.mrb[120].mxu0  ;;  %v8363_v53 = vmul.f32 -1.442695, %v8844_v49 }
 0x5b4   : > { %v10370_v22 = vpop.eup %10369  ;;  %10389 = vrcp.f32 %v6907_v40  ;;  %v6913_v35 = vadd.f32 1.0, %v10368_v42  ;;  %v8653_v7 = vpop.f32.mrb[184].mxu1  ;;  %v13169_v43 = vadd.f32 %v6324_v52, %v13074_v36  ;;  %v8369_v17 = vmul.f32 -1.442695, %v8845_v5 }
 0x5b5   : > { %v10372_v47 = vpop.eup %10371  ;;  %10391 = vrcp.f32 %v6912_v4  ;;  %v6914_v62 = vadd.f32 1.0, %v10370_v22  ;;  %v13164_v11 = vadd.f32 %v8652_v8, %v6421_v12  ;;  %v6326_v26 = vpop.f32.mrb[121].mxu0  ;;  %v8847_v22 = vadd.f32 %v13151_v39, %v13074_v36 }
 0x5b6   : > { %v10374_v56 = vpop.eup %10373  ;;  %10393 = vrcp.f32 %v6913_v35  ;;  %v6919_v3 = vadd.f32 1.0, %v10372_v47  ;;  %v8654_v54 = vpop.f32.mrb[185].mxu1  ;;  %v13174_v14 = vadd.f32 %v6326_v26, %v13080_v44  ;;  %v8370_v47 = vmul.f32 -1.442695, %v8846_v57 }
 0x5b7   : > { %v10376_v48 = vpop.eup %10375  ;;  %v8488_v59 = vpack.c.bf16 %v10374_v56, %v10374_v56  ;;  %10395 = vrcp.f32 %v6914_v62  ;;  %v6328_v1 = vpop.f32.mrb[122].mxu0  ;;  %v8655_v37 = vadd.f32 %v8654_v54, %v8653_v7 }
 0x5b8   : > { %v10378_v2 = vpop.eup %10377  ;;  %10397 = vrcp.f32 %v6919_v3  ;;  %v6920_v30 = vadd.f32 1.0, %v10376_v48  ;;  %v8656_v15 = vpop.f32.mrb[186].mxu1  ;;  %v13182_v0 = vadd.f32 %v6328_v1, %v13074_v36  ;;  %v8376_v1 = vmul.f32 -1.442695, %v8847_v22 }
 0x5b9   : > { %v10380_v50 = vpop.eup %10379  ;;  %7577 = vst.msk [vmem:[%s12835_s12 + $0x6c] sm:$0xf] %vm7564_vm1, %v8488_v59  ;;  %v6921_v34 = vadd.f32 1.0, %v10378_v2  ;;  %10399 = vpow2.f32 %v8355_v41  ;;  %v6330_v18 = vpop.f32.mrb[123].mxu0  ;;  %v13185_v28 = vadd.f32 %v8655_v37, %v13060_v20  ;;  %v8371_v2 = vmul.f32 -1.442695, %v13160_v55 }
 0x5ba   : > { %v8657_v51 = vpop.f32.mrb[187].mxu1  ;;  %v10382_v32 = vpop.eup %10381  ;;  %10401 = vrcp.f32 %v6920_v30  ;;  %v6926_v29 = vadd.f32 1.0, %v10380_v50  ;;  %v13188_v16 = vadd.f32 %v6330_v18, %v13080_v44  ;;  %v8383_v18 = vmul.f32 -1.442695, %v13169_v43 }
 0x5bb   : > { %v10384_v19 = vpop.eup %10383  ;;  %10403 = vrcp.f32 %v6921_v34  ;;  %v6927_v6 = vadd.f32 1.0, %v10382_v32  ;;  %v8658_v10 = vadd.f32 %v8657_v51, %v8656_v15  ;;  %v6334_v58 = vpop.f32.mrb[124].mxu0 }
 0x5bc   : > { %v10386_v60 = vpop.eup %10385  ;;  %10405 = vrcp.f32 %v6926_v29  ;;  %v6928_v9 = vadd.f32 1.0, %v10384_v19  ;;  %v8659_v42 = vpop.f32.mrb[188].mxu1  ;;  %v13199_v12 = vadd.f32 %v6334_v58, %v13074_v36 }
 0x5bd   : > { %v10388_v27 = vpop.eup %10387  ;;  %10407 = vrcp.f32 %v6927_v6  ;;  %v13194_v40 = vadd.f32 %v8658_v10, %v13064_v23  ;;  %v6336_v25 = vpop.f32.mrb[125].mxu0 }
 0x5be   : > { %v10390_v45 = vpop.eup %10389  ;;  %v8491_v20 = vpack.c.bf16 %v10388_v27, %v10386_v60  ;;  %10409 = vrcp.f32 %v6928_v9  ;;  %v8660_v35 = vpop.f32.mrb[189].mxu1  ;;  %v13203_v23 = vadd.f32 %v6336_v25, %v13080_v44 }
 0x5bf   : > { %v10392_v4 = vpop.eup %10391  ;;  %v8492_v63 = vpack.c.bf16 %v10390_v45, %v10390_v45  ;;  %10411 = vpow2.f32 %v8356_v31  ;;  %v8661_v62 = vadd.f32 %v8660_v35, %v8659_v42  ;;  %v6338_v41 = vpop.f32.mrb[126].mxu0  ;;  %v8848_v31 = vadd.f32 %v13156_v38, %v13080_v44 }
 0x5c0   : > { %v10394_v8 = vpop.eup %10393  ;;  %7580 = vst [vmem:[%s12835_s12 + $0x80] sm:$0xff] %v8491_v20  ;;  %10413 = vpow2.f32 %v8357_v13  ;;  %v8662_v56 = vpop.f32.mrb[190].mxu1  ;;  %v13210_v52 = vadd.f32 %v6338_v41, %v13074_v36  ;;  %v8378_v13 = vmul.f32 -1.442695, %v13164_v11  ;;  %v8390_v41 = vmul.f32 -1.442695, %v13182_v0 }
 0x5c1   : > { %v10396_v3 = vpop.eup %10395  ;;  %7581 = vst.msk [vmem:[%s12835_s12 + $0x88] sm:$0xf] %vm7564_vm1, %v8492_v63  ;;  %v8495_v39 = vpack.c.bf16 %v10394_v8, %v10392_v4  ;;  %10415 = vpow2.f32 %v8362_v21  ;;  %v6340_v7 = vpop.f32.mrb[127].mxu0  ;;  %v13213_v26 = vadd.f32 %v8661_v62, %v13071_v61  ;;  %v8377_v50 = vmul.f32 -1.442695, %v8848_v31 }
 0x5c2   : > { %v8663_v48 = vpop.f32.mrb[191].mxu1  ;;  %v10398_v59 = vpop.eup %10397  ;;  %v8496_v33 = vpack.c.bf16 %v10396_v3, %v10396_v3  ;;  %10417 = vpow2.f32 %v8363_v53  ;;  %v13218_v30 = vadd.f32 %v6340_v7, %v13080_v44 }
 0x5c3   : > { %v10400_v54 = vpop.eup %10399  ;;  %7584 = vst [vmem:[%s12835_s12 + $0x9c] sm:$0xff] %v8495_v39  ;;  %10419 = vpow2.f32 %v8364_v46  ;;  %v8664_v38 = vadd.f32 %v8663_v48, %v8662_v56  ;;  %v8384_v46 = vmul.f32 -1.442695, %v13174_v14  ;;  %v8385_v14 = vmul.f32 -1.442695, %v13185_v28 }
 0x5c4   : > { %v10402_v36 = vpop.eup %10401  ;;  %7585 = vst.msk [vmem:[%s12835_s12 + $0xa4] sm:$0xf] %vm7564_vm1, %v8496_v33  ;;  %v6933_v49 = vadd.f32 1.0, %v10400_v54  ;;  %10421 = vpow2.f32 %v8369_v17  ;;  %v8391_v39 = vmul.f32 -1.442695, %v13188_v16 }
 0x5c5   : > { %v10404_v15 = vpop.eup %10403  ;;  %v8499_v61 = vpack.c.bf16 %v10402_v36, %v10398_v59  ;;  %10423 = vpow2.f32 %v8370_v47  ;;  %v13223_v34 = vadd.f32 %v8664_v38, %v13077_v24  ;;  %v8392_v48 = vmul.f32 -1.442695, %v13194_v40 }
 0x5c6   : > { %v10406_v55 = vpop.eup %10405  ;;  %v8500_v44 = vpack.c.bf16 %v10404_v15, %v10404_v15  ;;  %10425 = vrcp.f32 %v6933_v49  ;;  %v8397_v28 = vmul.f32 -1.442695, %v13199_v12  ;;  %v8398_v54 = vmul.f32 -1.442695, %v13203_v23 }
 0x5c7   : > { %v10408_v37 = vpop.eup %10407  ;;  %7588 = vst [vmem:[%s12835_s12 + $0xb8] sm:$0xff] %v8499_v61  ;;  %10427 = vpow2.f32 %v8371_v2  ;;  %v8399_v38 = vmul.f32 -1.442695, %v13213_v26  ;;  %v8404_v49 = vmul.f32 -1.442695, %v13210_v52 }
 0x5c8   : > { %v10410_v51 = vpop.eup %10409  ;;  %7589 = vst.msk [vmem:[%s12835_s12 + $0xc0] sm:$0xf] %vm7564_vm1, %v8500_v44  ;;  %v8503_v32 = vpack.c.bf16 %v10408_v37, %v10406_v55  ;;  %10429 = vpow2.f32 %v8376_v1  ;;  %v8405_v23 = vmul.f32 -1.442695, %v13218_v30 }
 0x5c9   : > { %v10412_v29 = vpop.eup %10411  ;;  %v8504_v24 = vpack.c.bf16 %v10410_v51, %v10410_v51  ;;  %10431 = vpow2.f32 %v8377_v50  ;;  %v8406_v50 = vmul.f32 -1.442695, %v13223_v34 }
 0x5ca   : > { %v10414_v5 = vpop.eup %10413  ;;  %7592 = vst [vmem:[%s12835_s12 + $0xd4] sm:$0xff] %v8503_v32  ;;  %v6934_v19 = vadd.f32 1.0, %v10412_v29  ;;  %10433 = vpow2.f32 %v8378_v13 }
 0x5cb   : > { %v10416_v6 = vpop.eup %10415  ;;  %7593 = vst.msk [vmem:[%s12835_s12 + $0xdc] sm:$0xf] %vm7564_vm1, %v8504_v24  ;;  %v6935_v11 = vadd.f32 1.0, %v10414_v5  ;;  %10435 = vpow2.f32 %v8383_v18 }
 0x5cc   : > { %v10418_v60 = vpop.eup %10417  ;;  %10437 = vrcp.f32 %v6934_v19  ;;  %v6940_v43 = vadd.f32 1.0, %v10416_v6 }
 0x5cd   : > { %v10420_v9 = vpop.eup %10419  ;;  %10439 = vrcp.f32 %v6935_v11  ;;  %v6941_v57 = vadd.f32 1.0, %v10418_v60 }
 0x5ce   : > { %v10422_v10 = vpop.eup %10421  ;;  %10441 = vrcp.f32 %v6940_v43  ;;  %v6942_v27 = vadd.f32 1.0, %v10420_v9 }
 0x5cf   : > { %v10424_v21 = vpop.eup %10423  ;;  %10443 = vrcp.f32 %v6941_v57  ;;  %v6947_v53 = vadd.f32 1.0, %v10422_v10 }
 0x5d0   : > { %v10426_v45 = vpop.eup %10425  ;;  %10445 = vrcp.f32 %v6942_v27  ;;  %v6948_v20 = vadd.f32 1.0, %v10424_v21 }
 0x5d1   : > { %v10428_v17 = vpop.eup %10427  ;;  %10447 = vrcp.f32 %v6947_v53 }
 0x5d2   : > { %v10430_v58 = vpop.eup %10429  ;;  %10449 = vrcp.f32 %v6948_v20  ;;  %v6949_v42 = vadd.f32 1.0, %v10428_v17 }
 0x5d3   : > { %v10432_v4 = vpop.eup %10431  ;;  %v6954_v63 = vadd.f32 1.0, %v10430_v58  ;;  %10451 = vpow2.f32 %v8384_v46 }
 0x5d4   : > { %v10434_v22 = vpop.eup %10433  ;;  %10453 = vrcp.f32 %v6949_v42  ;;  %v6955_v25 = vadd.f32 1.0, %v10432_v4 }
 0x5d5   : > { %v10436_v35 = vpop.eup %10435  ;;  %10455 = vrcp.f32 %v6954_v63  ;;  %v6956_v8 = vadd.f32 1.0, %v10434_v22 }
 0x5d6   : > { %v10438_v47 = vpop.eup %10437  ;;  %10457 = vrcp.f32 %v6955_v25  ;;  %v6961_v62 = vadd.f32 1.0, %v10436_v35 }
 0x5d7   : > { %v10440_v56 = vpop.eup %10439  ;;  %v8507_v3 = vpack.c.bf16 %v10438_v47, %v10426_v45  ;;  %10459 = vrcp.f32 %v6956_v8 }
 0x5d8   : > { %v10442_v31 = vpop.eup %10441  ;;  %v8508_v7 = vpack.c.bf16 %v10440_v56, %v10440_v56  ;;  %10461 = vrcp.f32 %v6961_v62 }
 0x5d9   : > { %v10444_v59 = vpop.eup %10443  ;;  %7596 = vst [vmem:[%s12835_s12 + $0xf0] sm:$0xff] %v8507_v3  ;;  %10463 = vpow2.f32 %v8385_v14 }
 0x5da   : > { %v10446_v33 = vpop.eup %10445  ;;  %7597 = vst.msk [vmem:[%s12835_s12 + $0xf8] sm:$0xf] %vm7564_vm1, %v8508_v7  ;;  %v8511_v0 = vpack.c.bf16 %v10444_v59, %v10442_v31  ;;  %10465 = vpow2.f32 %v8390_v41 }
 0x5db   : > { %v10448_v16 = vpop.eup %10447  ;;  %v8512_v2 = vpack.c.bf16 %v10446_v33, %v10446_v33  ;;  %10467 = vpow2.f32 %v8391_v39 }
 0x5dc   : > { %v10450_v40 = vpop.eup %10449  ;;  %7600 = vst [vmem:[%s12835_s12 + $0x10c] sm:$0xff] %v8511_v0  ;;  %10469 = vpow2.f32 %v8392_v48 }
 0x5dd   : > { %v10452_v36 = vpop.eup %10451  ;;  %7601 = vst.msk [vmem:[%s12835_s12 + $0x114] sm:$0xf] %vm7564_vm1, %v8512_v2  ;;  %v8515_v12 = vpack.c.bf16 %v10450_v40, %v10448_v16  ;;  %10471 = vpow2.f32 %v8397_v28 }
 0x5de   : > { %v10454_v1 = vpop.eup %10453  ;;  %v6962_v15 = vadd.f32 1.0, %v10452_v36  ;;  %10473 = vpow2.f32 %v8398_v54 }
 0x5df   : > { %v10456_v61 = vpop.eup %10455  ;;  %7604 = vst [vmem:[%s12835_s12 + $0x128] sm:$0xff] %v8515_v12  ;;  %v8516_v26 = vpack.c.bf16 %v10454_v1, %v10454_v1  ;;  %10475 = vpow2.f32 %v8399_v38 }
 0x5e0   : > { %v10458_v55 = vpop.eup %10457  ;;  %10477 = vrcp.f32 %v6962_v15 }
 0x5e1   : > { %v10460_v44 = vpop.eup %10459  ;;  %7605 = vst.msk [vmem:[%s12835_s12 + $0x130] sm:$0xf] %vm7564_vm1, %v8516_v26  ;;  %v8519_v13 = vpack.c.bf16 %v10458_v55, %v10456_v61  ;;  %10479 = vpow2.f32 %v8404_v49 }
 0x5e2   : > { %v10462_v52 = vpop.eup %10461  ;;  %v8520_v37 = vpack.c.bf16 %v10460_v44, %v10460_v44  ;;  %10481 = vpow2.f32 %v8405_v23 }
 0x5e3   : > { %v10464_v18 = vpop.eup %10463  ;;  %7608 = vst [vmem:[%s12835_s12 + $0x144] sm:$0xff] %v8519_v13  ;;  %10483 = vpow2.f32 %v8406_v50 }
 0x5e4   : > { %v10466_v30 = vpop.eup %10465  ;;  %7609 = vst.msk [vmem:[%s12835_s12 + $0x14c] sm:$0xf] %vm7564_vm1, %v8520_v37  ;;  %v6963_v51 = vadd.f32 1.0, %v10464_v18 }
 0x5e5   : > { %v10468_v32 = vpop.eup %10467  ;;  %v6968_v29 = vadd.f32 1.0, %v10466_v30 }
 0x5e6   : > { %v10470_v34 = vpop.eup %10469  ;;  %10485 = vrcp.f32 %v6963_v51  ;;  %v6969_v24 = vadd.f32 1.0, %v10468_v32 }
 0x5e7   : > { %v10472_v5 = vpop.eup %10471  ;;  %10487 = vrcp.f32 %v6968_v29  ;;  %v6970_v19 = vadd.f32 1.0, %v10470_v34 }
 0x5e8   : > { %v10474_v6 = vpop.eup %10473  ;;  %10489 = vrcp.f32 %v6969_v24  ;;  %v6975_v11 = vadd.f32 1.0, %v10472_v5 }
 0x5e9   : > { %v10476_v60 = vpop.eup %10475  ;;  %10491 = vrcp.f32 %v6970_v19  ;;  %v6976_v43 = vadd.f32 1.0, %v10474_v6 }
 0x5ea   : > { %v10478_v9 = vpop.eup %10477  ;;  %10493 = vrcp.f32 %v6975_v11  ;;  %v6977_v57 = vadd.f32 1.0, %v10476_v60 }
 0x5eb   : > { %v10480_v10 = vpop.eup %10479  ;;  %v8523_v27 = vpack.c.bf16 %v10478_v9, %v10462_v52  ;;  %10495 = vrcp.f32 %v6976_v43 }
 0x5ec   : > { %v10482_v21 = vpop.eup %10481  ;;  %10497 = vrcp.f32 %v6977_v57  ;;  %v6982_v53 = vadd.f32 1.0, %v10480_v10 }
 0x5ed   : > { %v10484_v46 = vpop.eup %10483  ;;  %7612 = vst [vmem:[%s12835_s12 + $0x160] sm:$0xff] %v8523_v27  ;;  %v6983_v45 = vadd.f32 1.0, %v10482_v21 }
 0x5ee   : > { %10499 = vrcp.f32 %v6982_v53  ;;  %v6984_v20 = vadd.f32 1.0, %v10484_v46 }
 0x5ef   : > { %10501 = vrcp.f32 %v6983_v45 }
 0x5f0   : > { %v10486_v17 = vpop.eup %10485  ;;  %10503 = vrcp.f32 %v6984_v20 }
 0x5f1   : > { %v10488_v58 = vpop.eup %10487  ;;  %v8524_v42 = vpack.c.bf16 %v10486_v17, %v10486_v17 }
 0x5f2   : > { %v10490_v4 = vpop.eup %10489 }
 0x5f3   : > { %v10492_v63 = vpop.eup %10491  ;;  %7613 = vst.msk [vmem:[%s12835_s12 + $0x168] sm:$0xf] %vm7564_vm1, %v8524_v42  ;;  %v8527_v22 = vpack.c.bf16 %v10490_v4, %v10488_v58 }
 0x5f4   : > { %v10494_v25 = vpop.eup %10493  ;;  %v8528_v35 = vpack.c.bf16 %v10492_v63, %v10492_v63 }
 0x5f5   : > { %v10496_v8 = vpop.eup %10495  ;;  %7616 = vst [vmem:[%s12835_s12 + $0x17c] sm:$0xff] %v8527_v22 }
 0x5f6   : > { %v10498_v14 = vpop.eup %10497  ;;  %7617 = vst.msk [vmem:[%s12835_s12 + $0x184] sm:$0xf] %vm7564_vm1, %v8528_v35  ;;  %v8531_v47 = vpack.c.bf16 %v10496_v8, %v10494_v25 }
 0x5f7   : > { %v8532_v62 = vpack.c.bf16 %v10498_v14, %v10498_v14 }
 0x5f8   : > { %v10500_v41 = vpop.eup %10499  ;;  %7620 = vst [vmem:[%s12835_s12 + $0x198] sm:$0xff] %v8531_v47 }
 0x5f9   : > { %v10502_v56 = vpop.eup %10501  ;;  %7621 = vst.msk [vmem:[%s12835_s12 + $0x1a0] sm:$0xf] %vm7564_vm1, %v8532_v62 }
 0x5fa   : > { %v10504_v3 = vpop.eup %10503  ;;  %v8535_v39 = vpack.c.bf16 %v10502_v56, %v10500_v41 }
 0x5fb   : > { %v8536_v31 = vpack.c.bf16 %v10504_v3, %v10504_v3 }
 0x5fc   : > { %7624 = vst [vmem:[%s12835_s12 + $0x1b4] sm:$0xff] %v8535_v39 }
 0x5fd   : > { %7625 = vst.msk [vmem:[%s12835_s12 + $0x1bc] sm:$0xf] %vm7564_vm1, %v8536_v31 }
 0x5fe PF: > { %s20_s13 = sadd.s32 1, %s10512_s13  }
 0x5ff   : > { %p17_p4 = scmp.ge.s32.totalorder %s20_s13, 4  }
 0x601   :  { %19 = sbr.rel (!%p17_p4) target bundleno = 1 (0x1), region = 93 }

</bundles_post_ra>
